<compile_context>
chip_gen: v5e
topology: v5e:2x2
jax: 0.10.0
libtpu: 0.0.40
codegen_flags: <defaults>
</compile_context>

<pallas_src>
import jax
import jax.numpy as jnp
from jax.experimental import pallas as pl
from jax.experimental.pallas import tpu as pltpu

LN_EPS = 1e-5


def _round_up(n, m):
    return ((n + m - 1) // m) * m


def _make_fused_kernel(meta, compute_dtype):
    """Build the fused-stack kernel.

    meta: tuple of bools, one per block -- True iff the block has a Linear
    (projection) shortcut (in_features != out_features).
    Per-block flattened inputs (in order):
        w1 (in, hid) compute_dtype
        b1 (1, hid)  float32
        w2 (hid, out) compute_dtype
        [ws (in, out) compute_dtype]            -- only if projection shortcut
        vec (3 or 4, out) float32 = [b2; gamma; beta; (bs)]
    """

    def kernel(*refs):
        x_ref = refs[0]
        o_ref = refs[-1]
        prefs = refs[1:-1]

        x = x_ref[...].astype(jnp.float32)          # (tb, in_f) activation
        idx = 0
        for has_proj in meta:
            w1 = prefs[idx][...]
            b1 = prefs[idx + 1][...]
            w2 = prefs[idx + 2][...]
            if has_proj:
                ws = prefs[idx + 3][...]
                vec_ref = prefs[idx + 4]
                idx += 5
            else:
                ws = None
                vec_ref = prefs[idx + 3]
                idx += 4
            b2 = vec_ref[0:1, :]
            gamma = vec_ref[1:2, :]
            beta = vec_ref[2:3, :]

            xm = x.astype(compute_dtype)
            # fc1 -> ReLU
            h = jnp.dot(xm, w1, preferred_element_type=jnp.float32) + b1
            h = jnp.maximum(h, 0.0)
            # fc2
            out = jnp.dot(h.astype(compute_dtype), w2,
                          preferred_element_type=jnp.float32) + b2
            # dropout: eval-mode identity
            # shortcut
            if has_proj:
                bs = vec_ref[3:4, :]
                sc = jnp.dot(xm, ws, preferred_element_type=jnp.float32) + bs
            else:
                sc = x
            out = out + sc
            # LayerNorm (one-pass statistics, f32)
            mean = jnp.mean(out, axis=-1, keepdims=True)
            msq = jnp.mean(out * out, axis=-1, keepdims=True)
            var = jnp.maximum(msq - mean * mean, 0.0)
            x = (out - mean) * jax.lax.rsqrt(var + LN_EPS) * gamma + beta

        o_ref[...] = x.astype(o_ref.dtype)

    return kernel


def _flatten_block(p):
    arrs = [p["w1"], p["b1"], p["w2"]]
    if "ws" in p:
        arrs.append(p["ws"])
        vec = jnp.concatenate([p["b2"], p["gamma"], p["beta"], p["bs"]], axis=0)
    else:
        vec = jnp.concatenate([p["b2"], p["gamma"], p["beta"]], axis=0)
    arrs.append(vec)
    return arrs


def tide_encoder(x, block_params, *, batch_tile=256):
    """TiDEEncoder.forward: whole residual-block stack in one pallas_call."""
    B, in_f = x.shape
    out_f = block_params[-1]["w2"].shape[1]
    compute_dtype = block_params[0]["w1"].dtype
    meta = tuple(("ws" in p) for p in block_params)

    # Batch tile: multiple of 8 (sublane), padded batch divisible by the tile.
    batch_tile = max(8, _round_up(batch_tile, 8))
    tb = min(batch_tile, _round_up(B, 8))
    Bp = _round_up(B, tb)
    xp = jnp.pad(x, ((0, Bp - B), (0, 0))) if Bp != B else x

    flat = []
    for p in block_params:
        flat.extend(_flatten_block(p))

    in_specs = [pl.BlockSpec((tb, in_f), lambda i: (i, 0))]
    for a in flat:
        # Full-array, constant block index -> weights stay resident in VMEM.
        in_specs.append(pl.BlockSpec(tuple(a.shape), lambda i: (0, 0)))
    out_spec = pl.BlockSpec((tb, out_f), lambda i: (i, 0))

    # VMEM budget: double-buffered activation I/O tiles + resident params,
    # generous headroom, capped below v7x's 64 MiB physical VMEM per core.
    param_bytes = sum(int(a.size) * a.dtype.itemsize for a in flat)
    widest = max([in_f, out_f] + [p["w1"].shape[1] for p in block_params])
    act_bytes = 2 * 2 * tb * widest * 4
    vmem_limit = int(min(48 << 20, max(16 << 20, 4 * (param_bytes + act_bytes))))

    kernel = _make_fused_kernel(meta, compute_dtype)
    out = pl.pallas_call(
        kernel,
        out_shape=jax.ShapeDtypeStruct((Bp, out_f), jnp.float32),
        grid=(Bp // tb,),
        in_specs=in_specs,
        out_specs=out_spec,
        compiler_params=pltpu.CompilerParams(
            dimension_semantics=("parallel",),
            vmem_limit_bytes=vmem_limit),
    )(xp, *flat)
    return out[:B] if Bp != B else out


def init_block_params(key, in_features, hid_features, out_features,
                      compute_dtype=jnp.bfloat16):
    """Shapes mimic ResidualBlock; weights stored (in, out) (transposed vs
    PyTorch) in compute_dtype, biases / LN affine params in float32."""
    ks = jax.random.split(key, 6)
    s1 = 1.0 / jnp.sqrt(in_features)
    s2 = 1.0 / jnp.sqrt(hid_features)
    params = {
        "w1": jax.random.uniform(ks[0], (in_features, hid_features),
                                 jnp.float32, -s1, s1).astype(compute_dtype),
        "b1": jax.random.uniform(ks[1], (1, hid_features), jnp.float32, -s1, s1),
        "w2": jax.random.uniform(ks[2], (hid_features, out_features),
                                 jnp.float32, -s2, s2).astype(compute_dtype),
        "b2": jax.random.uniform(ks[3], (1, out_features), jnp.float32, -s2, s2),
        "gamma": jnp.ones((1, out_features), jnp.float32),
        "beta": jnp.zeros((1, out_features), jnp.float32),
    }
    if in_features != out_features:
        params["ws"] = jax.random.uniform(
            ks[4], (in_features, out_features), jnp.float32, -s1, s1
        ).astype(compute_dtype)
        params["bs"] = jax.random.uniform(ks[5], (1, out_features),
                                          jnp.float32, -s1, s1)
    return params


def init_encoder_params(key, in_features, hid_features, out_features,
                        num_blocks=1, compute_dtype=jnp.bfloat16):
    keys = jax.random.split(key, num_blocks)
    blocks = []
    feat = in_features
    for i in range(num_blocks):
        blocks.append(init_block_params(keys[i], feat, hid_features,
                                        out_features, compute_dtype))
        feat = out_features
    return blocks


def ref_encoder(x, block_params):
    """Pure-JAX reference with the same dtype policy (bf16 matmul operands,
    f32 accumulation, f32 LayerNorm; eval-mode dropout = identity)."""
    x = x.astype(jnp.float32)
    for p in block_params:
        cd = p["w1"].dtype
        xm = x.astype(cd)
        h = jnp.maximum(
            jnp.dot(xm, p["w1"], preferred_element_type=jnp.float32) + p["b1"],
            0.0)
        out = jnp.dot(h.astype(cd), p["w2"],
                      preferred_element_type=jnp.float32) + p["b2"]
        if "ws" in p:
            sc = jnp.dot(xm, p["ws"], preferred_element_type=jnp.float32) + p["bs"]
        else:
            sc = x
        out = out + sc
        mean = out.mean(-1, keepdims=True)
        var = ((out - mean) ** 2).mean(-1, keepdims=True)
        x = (out - mean) / jnp.sqrt(var + LN_EPS) * p["gamma"] + p["beta"]
    return x


if __name__ == "__main__":
    # x is the flattened concat of [projected covariates, past series,
    # static covariates] -> (B, in_features).
    B = 256
    in_features = 24
    hid_features = 32
    out_features = 16
    num_blocks = 3

    key = jax.random.PRNGKey(0)
    kx, kp = jax.random.split(key)
    x = jax.random.normal(kx, (B, in_features), jnp.float32)

    block_params = init_encoder_params(kp, in_features, hid_features,
                                       out_features, num_blocks,
                                       compute_dtype=jnp.bfloat16)

    # Batch-tiled fused forward (grid of 2 steps at tb=128).
    y = tide_encoder(x, block_params, batch_tile=128)
    jax.block_until_ready(y)
    assert y.shape == (B, out_features)

    ref = ref_encoder(x, block_params)
    err = float(jnp.max(jnp.abs(y - ref)))
    assert jnp.allclose(y, ref, atol=2e-4, rtol=2e-4), err

    # Ragged batch exercises the pad-to-tile path.
    y2 = tide_encoder(x[:50], block_params, batch_tile=128)
    jax.block_until_ready(y2)
    assert y2.shape == (50, out_features)
    assert jnp.allclose(y2, ref_encoder(x[:50], block_params),
                        atol=2e-4, rtol=2e-4)

    print("KERNEL_OK")
</pallas_src>

<mosaic_0001>
module attributes {stable_mosaic.version = 11 : i64} {
  func.func @kernel(%arg0: i32, %arg1: memref<128x24xf32, #tpu.memory_space<vmem>>, %arg2: memref<24x32xbf16, #tpu.memory_space<vmem>>, %arg3: memref<1x32xf32, #tpu.memory_space<vmem>>, %arg4: memref<32x16xbf16, #tpu.memory_space<vmem>>, %arg5: memref<24x16xbf16, #tpu.memory_space<vmem>>, %arg6: memref<4x16xf32, #tpu.memory_space<vmem>>, %arg7: memref<16x32xbf16, #tpu.memory_space<vmem>>, %arg8: memref<1x32xf32, #tpu.memory_space<vmem>>, %arg9: memref<32x16xbf16, #tpu.memory_space<vmem>>, %arg10: memref<3x16xf32, #tpu.memory_space<vmem>>, %arg11: memref<16x32xbf16, #tpu.memory_space<vmem>>, %arg12: memref<1x32xf32, #tpu.memory_space<vmem>>, %arg13: memref<32x16xbf16, #tpu.memory_space<vmem>>, %arg14: memref<3x16xf32, #tpu.memory_space<vmem>>, %arg15: memref<128x16xf32, #tpu.memory_space<vmem>>) attributes {dimension_semantics = [#tpu.dimension_semantics<parallel>], iteration_bounds = array<i64: 2>, scalar_prefetch = 0 : i64, scratch_operands = 0 : i64, tpu.core_type = #tpu.core_type<tc>, window_params = [{transform_indices = @transform_0, window_bounds = array<i64: 128, 24>}, {pipeline_mode = #tpu.pipeline_mode<synchronous>, transform_indices = @transform_1, window_bounds = array<i64: 24, 32>}, {pipeline_mode = #tpu.pipeline_mode<synchronous>, transform_indices = @transform_2, window_bounds = array<i64: 1, 32>}, {pipeline_mode = #tpu.pipeline_mode<synchronous>, transform_indices = @transform_3, window_bounds = array<i64: 32, 16>}, {pipeline_mode = #tpu.pipeline_mode<synchronous>, transform_indices = @transform_4, window_bounds = array<i64: 24, 16>}, {pipeline_mode = #tpu.pipeline_mode<synchronous>, transform_indices = @transform_5, window_bounds = array<i64: 4, 16>}, {pipeline_mode = #tpu.pipeline_mode<synchronous>, transform_indices = @transform_6, window_bounds = array<i64: 16, 32>}, {pipeline_mode = #tpu.pipeline_mode<synchronous>, transform_indices = @transform_7, window_bounds = array<i64: 1, 32>}, {pipeline_mode = #tpu.pipeline_mode<synchronous>, transform_indices = @transform_8, window_bounds = array<i64: 32, 16>}, {pipeline_mode = #tpu.pipeline_mode<synchronous>, transform_indices = @transform_9, window_bounds = array<i64: 3, 16>}, {pipeline_mode = #tpu.pipeline_mode<synchronous>, transform_indices = @transform_10, window_bounds = array<i64: 16, 32>}, {pipeline_mode = #tpu.pipeline_mode<synchronous>, transform_indices = @transform_11, window_bounds = array<i64: 1, 32>}, {pipeline_mode = #tpu.pipeline_mode<synchronous>, transform_indices = @transform_12, window_bounds = array<i64: 32, 16>}, {pipeline_mode = #tpu.pipeline_mode<synchronous>, transform_indices = @transform_13, window_bounds = array<i64: 3, 16>}, {transform_indices = @transform_14, window_bounds = array<i64: 128, 16>}]} {
    %c0 = arith.constant 0 : index
    %c0_0 = arith.constant 0 : index
    %0 = vector.load %arg1[%c0, %c0_0] : memref<128x24xf32, #tpu.memory_space<vmem>>, vector<128x24xf32>
    %c0_1 = arith.constant 0 : index
    %c0_2 = arith.constant 0 : index
    %1 = vector.load %arg2[%c0_1, %c0_2] : memref<24x32xbf16, #tpu.memory_space<vmem>>, vector<24x32xbf16>
    %c0_3 = arith.constant 0 : index
    %c0_4 = arith.constant 0 : index
    %2 = vector.load %arg3[%c0_3, %c0_4] : memref<1x32xf32, #tpu.memory_space<vmem>>, vector<1x32xf32>
    %c0_5 = arith.constant 0 : index
    %c0_6 = arith.constant 0 : index
    %3 = vector.load %arg4[%c0_5, %c0_6] : memref<32x16xbf16, #tpu.memory_space<vmem>>, vector<32x16xbf16>
    %c0_7 = arith.constant 0 : index
    %c0_8 = arith.constant 0 : index
    %4 = vector.load %arg5[%c0_7, %c0_8] : memref<24x16xbf16, #tpu.memory_space<vmem>>, vector<24x16xbf16>
    %c0_9 = arith.constant 0 : index
    %c0_10 = arith.constant 0 : index
    %5 = vector.load %arg6[%c0_9, %c0_10] : memref<4x16xf32, #tpu.memory_space<vmem>>, vector<1x16xf32>
    %c1 = arith.constant 1 : index
    %c0_11 = arith.constant 0 : index
    %6 = vector.load %arg6[%c1, %c0_11] : memref<4x16xf32, #tpu.memory_space<vmem>>, vector<1x16xf32>
    %c2 = arith.constant 2 : index
    %c0_12 = arith.constant 0 : index
    %7 = vector.load %arg6[%c2, %c0_12] : memref<4x16xf32, #tpu.memory_space<vmem>>, vector<1x16xf32>
    %8 = arith.truncf %0 : vector<128x24xf32> to vector<128x24xbf16>
    %cst = arith.constant dense<0.000000e+00> : vector<128x32xf32>
    %9 = tpu.matmul %8, %1, %cst {dimension_numbers = #tpu.dot_dimension_numbers<[1], [0], [0], [1], [0, 0, 1, 1], [], []>} : vector<128x24xbf16>, vector<24x32xbf16>, vector<128x32xf32> -> vector<128x32xf32>
    %10 = vector.broadcast %2 : vector<1x32xf32> to vector<128x32xf32>
    %11 = arith.addf %9, %10 : vector<128x32xf32>
    %cst_13 = arith.constant 0.000000e+00 : f32
    %12 = vector.broadcast %cst_13 : f32 to vector<128x32xf32>
    %13 = arith.maximumf %11, %12 : vector<128x32xf32>
    %14 = arith.truncf %13 : vector<128x32xf32> to vector<128x32xbf16>
    %cst_14 = arith.constant dense<0.000000e+00> : vector<128x16xf32>
    %15 = tpu.matmul %14, %3, %cst_14 {dimension_numbers = #tpu.dot_dimension_numbers<[1], [0], [0], [1], [0, 0, 1, 1], [], []>} : vector<128x32xbf16>, vector<32x16xbf16>, vector<128x16xf32> -> vector<128x16xf32>
    %16 = vector.broadcast %5 : vector<1x16xf32> to vector<128x16xf32>
    %17 = arith.addf %15, %16 : vector<128x16xf32>
    %c3 = arith.constant 3 : index
    %c0_15 = arith.constant 0 : index
    %18 = vector.load %arg6[%c3, %c0_15] : memref<4x16xf32, #tpu.memory_space<vmem>>, vector<1x16xf32>
    %cst_16 = arith.constant dense<0.000000e+00> : vector<128x16xf32>
    %19 = tpu.matmul %8, %4, %cst_16 {dimension_numbers = #tpu.dot_dimension_numbers<[1], [0], [0], [1], [0, 0, 1, 1], [], []>} : vector<128x24xbf16>, vector<24x16xbf16>, vector<128x16xf32> -> vector<128x16xf32>
    %20 = vector.broadcast %18 : vector<1x16xf32> to vector<128x16xf32>
    %21 = arith.addf %19, %20 : vector<128x16xf32>
    %22 = arith.addf %17, %21 : vector<128x16xf32>
    %cst_17 = arith.constant dense<0.000000e+00> : vector<128xf32>
    %23 = vector.multi_reduction <add>, %22, %cst_17 [1] : vector<128x16xf32> to vector<128xf32>
    %24 = vector.shape_cast %23 : vector<128xf32> to vector<128x1xf32>
    %cst_18 = arith.constant 1.600000e+01 : f32
    %25 = vector.broadcast %cst_18 : f32 to vector<128x1xf32>
    %26 = arith.divf %24, %25 : vector<128x1xf32>
    %27 = arith.mulf %22, %22 : vector<128x16xf32>
    %cst_19 = arith.constant dense<0.000000e+00> : vector<128xf32>
    %28 = vector.multi_reduction <add>, %27, %cst_19 [1] : vector<128x16xf32> to vector<128xf32>
    %29 = vector.shape_cast %28 : vector<128xf32> to vector<128x1xf32>
    %cst_20 = arith.constant 1.600000e+01 : f32
    %30 = vector.broadcast %cst_20 : f32 to vector<128x1xf32>
    %31 = arith.divf %29, %30 : vector<128x1xf32>
    %32 = arith.mulf %26, %26 : vector<128x1xf32>
    %33 = arith.subf %31, %32 : vector<128x1xf32>
    %cst_21 = arith.constant 0.000000e+00 : f32
    %34 = vector.broadcast %cst_21 : f32 to vector<128x1xf32>
    %35 = arith.maximumf %33, %34 : vector<128x1xf32>
    %36 = vector.broadcast %26 : vector<128x1xf32> to vector<128x16xf32>
    %37 = arith.subf %22, %36 : vector<128x16xf32>
    %cst_22 = arith.constant 9.99999974E-6 : f32
    %38 = vector.broadcast %cst_22 : f32 to vector<128x1xf32>
    %39 = arith.addf %35, %38 : vector<128x1xf32>
    %40 = math.rsqrt %39 : vector<128x1xf32>
    %41 = vector.broadcast %40 : vector<128x1xf32> to vector<128x16xf32>
    %42 = arith.mulf %37, %41 : vector<128x16xf32>
    %43 = vector.broadcast %6 : vector<1x16xf32> to vector<128x16xf32>
    %44 = arith.mulf %42, %43 : vector<128x16xf32>
    %45 = vector.broadcast %7 : vector<1x16xf32> to vector<128x16xf32>
    %46 = arith.addf %44, %45 : vector<128x16xf32>
    %c0_23 = arith.constant 0 : index
    %c0_24 = arith.constant 0 : index
    %47 = vector.load %arg7[%c0_23, %c0_24] : memref<16x32xbf16, #tpu.memory_space<vmem>>, vector<16x32xbf16>
    %c0_25 = arith.constant 0 : index
    %c0_26 = arith.constant 0 : index
    %48 = vector.load %arg8[%c0_25, %c0_26] : memref<1x32xf32, #tpu.memory_space<vmem>>, vector<1x32xf32>
    %c0_27 = arith.constant 0 : index
    %c0_28 = arith.constant 0 : index
    %49 = vector.load %arg9[%c0_27, %c0_28] : memref<32x16xbf16, #tpu.memory_space<vmem>>, vector<32x16xbf16>
    %c0_29 = arith.constant 0 : index
    %c0_30 = arith.constant 0 : index
    %50 = vector.load %arg10[%c0_29, %c0_30] : memref<3x16xf32, #tpu.memory_space<vmem>>, vector<1x16xf32>
    %c1_31 = arith.constant 1 : index
    %c0_32 = arith.constant 0 : index
    %51 = vector.load %arg10[%c1_31, %c0_32] : memref<3x16xf32, #tpu.memory_space<vmem>>, vector<1x16xf32>
    %c2_33 = arith.constant 2 : index
    %c0_34 = arith.constant 0 : index
    %52 = vector.load %arg10[%c2_33, %c0_34] : memref<3x16xf32, #tpu.memory_space<vmem>>, vector<1x16xf32>
    %53 = arith.truncf %46 : vector<128x16xf32> to vector<128x16xbf16>
    %cst_35 = arith.constant dense<0.000000e+00> : vector<128x32xf32>
    %54 = tpu.matmul %53, %47, %cst_35 {dimension_numbers = #tpu.dot_dimension_numbers<[1], [0], [0], [1], [0, 0, 1, 1], [], []>} : vector<128x16xbf16>, vector<16x32xbf16>, vector<128x32xf32> -> vector<128x32xf32>
    %55 = vector.broadcast %48 : vector<1x32xf32> to vector<128x32xf32>
    %56 = arith.addf %54, %55 : vector<128x32xf32>
    %cst_36 = arith.constant 0.000000e+00 : f32
    %57 = vector.broadcast %cst_36 : f32 to vector<128x32xf32>
    %58 = arith.maximumf %56, %57 : vector<128x32xf32>
    %59 = arith.truncf %58 : vector<128x32xf32> to vector<128x32xbf16>
    %cst_37 = arith.constant dense<0.000000e+00> : vector<128x16xf32>
    %60 = tpu.matmul %59, %49, %cst_37 {dimension_numbers = #tpu.dot_dimension_numbers<[1], [0], [0], [1], [0, 0, 1, 1], [], []>} : vector<128x32xbf16>, vector<32x16xbf16>, vector<128x16xf32> -> vector<128x16xf32>
    %61 = vector.broadcast %50 : vector<1x16xf32> to vector<128x16xf32>
    %62 = arith.addf %60, %61 : vector<128x16xf32>
    %63 = arith.addf %62, %46 : vector<128x16xf32>
    %cst_38 = arith.constant dense<0.000000e+00> : vector<128xf32>
    %64 = vector.multi_reduction <add>, %63, %cst_38 [1] : vector<128x16xf32> to vector<128xf32>
    %65 = vector.shape_cast %64 : vector<128xf32> to vector<128x1xf32>
    %cst_39 = arith.constant 1.600000e+01 : f32
    %66 = vector.broadcast %cst_39 : f32 to vector<128x1xf32>
    %67 = arith.divf %65, %66 : vector<128x1xf32>
    %68 = arith.mulf %63, %63 : vector<128x16xf32>
    %cst_40 = arith.constant dense<0.000000e+00> : vector<128xf32>
    %69 = vector.multi_reduction <add>, %68, %cst_40 [1] : vector<128x16xf32> to vector<128xf32>
    %70 = vector.shape_cast %69 : vector<128xf32> to vector<128x1xf32>
    %cst_41 = arith.constant 1.600000e+01 : f32
    %71 = vector.broadcast %cst_41 : f32 to vector<128x1xf32>
    %72 = arith.divf %70, %71 : vector<128x1xf32>
    %73 = arith.mulf %67, %67 : vector<128x1xf32>
    %74 = arith.subf %72, %73 : vector<128x1xf32>
    %cst_42 = arith.constant 0.000000e+00 : f32
    %75 = vector.broadcast %cst_42 : f32 to vector<128x1xf32>
    %76 = arith.maximumf %74, %75 : vector<128x1xf32>
    %77 = vector.broadcast %67 : vector<128x1xf32> to vector<128x16xf32>
    %78 = arith.subf %63, %77 : vector<128x16xf32>
    %cst_43 = arith.constant 9.99999974E-6 : f32
    %79 = vector.broadcast %cst_43 : f32 to vector<128x1xf32>
    %80 = arith.addf %76, %79 : vector<128x1xf32>
    %81 = math.rsqrt %80 : vector<128x1xf32>
    %82 = vector.broadcast %81 : vector<128x1xf32> to vector<128x16xf32>
    %83 = arith.mulf %78, %82 : vector<128x16xf32>
    %84 = vector.broadcast %51 : vector<1x16xf32> to vector<128x16xf32>
    %85 = arith.mulf %83, %84 : vector<128x16xf32>
    %86 = vector.broadcast %52 : vector<1x16xf32> to vector<128x16xf32>
    %87 = arith.addf %85, %86 : vector<128x16xf32>
    %c0_44 = arith.constant 0 : index
    %c0_45 = arith.constant 0 : index
    %88 = vector.load %arg11[%c0_44, %c0_45] : memref<16x32xbf16, #tpu.memory_space<vmem>>, vector<16x32xbf16>
    %c0_46 = arith.constant 0 : index
    %c0_47 = arith.constant 0 : index
    %89 = vector.load %arg12[%c0_46, %c0_47] : memref<1x32xf32, #tpu.memory_space<vmem>>, vector<1x32xf32>
    %c0_48 = arith.constant 0 : index
    %c0_49 = arith.constant 0 : index
    %90 = vector.load %arg13[%c0_48, %c0_49] : memref<32x16xbf16, #tpu.memory_space<vmem>>, vector<32x16xbf16>
    %c0_50 = arith.constant 0 : index
    %c0_51 = arith.constant 0 : index
    %91 = vector.load %arg14[%c0_50, %c0_51] : memref<3x16xf32, #tpu.memory_space<vmem>>, vector<1x16xf32>
    %c1_52 = arith.constant 1 : index
    %c0_53 = arith.constant 0 : index
    %92 = vector.load %arg14[%c1_52, %c0_53] : memref<3x16xf32, #tpu.memory_space<vmem>>, vector<1x16xf32>
    %c2_54 = arith.constant 2 : index
    %c0_55 = arith.constant 0 : index
    %93 = vector.load %arg14[%c2_54, %c0_55] : memref<3x16xf32, #tpu.memory_space<vmem>>, vector<1x16xf32>
    %94 = arith.truncf %87 : vector<128x16xf32> to vector<128x16xbf16>
    %cst_56 = arith.constant dense<0.000000e+00> : vector<128x32xf32>
    %95 = tpu.matmul %94, %88, %cst_56 {dimension_numbers = #tpu.dot_dimension_numbers<[1], [0], [0], [1], [0, 0, 1, 1], [], []>} : vector<128x16xbf16>, vector<16x32xbf16>, vector<128x32xf32> -> vector<128x32xf32>
    %96 = vector.broadcast %89 : vector<1x32xf32> to vector<128x32xf32>
    %97 = arith.addf %95, %96 : vector<128x32xf32>
    %cst_57 = arith.constant 0.000000e+00 : f32
    %98 = vector.broadcast %cst_57 : f32 to vector<128x32xf32>
    %99 = arith.maximumf %97, %98 : vector<128x32xf32>
    %100 = arith.truncf %99 : vector<128x32xf32> to vector<128x32xbf16>
    %cst_58 = arith.constant dense<0.000000e+00> : vector<128x16xf32>
    %101 = tpu.matmul %100, %90, %cst_58 {dimension_numbers = #tpu.dot_dimension_numbers<[1], [0], [0], [1], [0, 0, 1, 1], [], []>} : vector<128x32xbf16>, vector<32x16xbf16>, vector<128x16xf32> -> vector<128x16xf32>
    %102 = vector.broadcast %91 : vector<1x16xf32> to vector<128x16xf32>
    %103 = arith.addf %101, %102 : vector<128x16xf32>
    %104 = arith.addf %103, %87 : vector<128x16xf32>
    %cst_59 = arith.constant dense<0.000000e+00> : vector<128xf32>
    %105 = vector.multi_reduction <add>, %104, %cst_59 [1] : vector<128x16xf32> to vector<128xf32>
    %106 = vector.shape_cast %105 : vector<128xf32> to vector<128x1xf32>
    %cst_60 = arith.constant 1.600000e+01 : f32
    %107 = vector.broadcast %cst_60 : f32 to vector<128x1xf32>
    %108 = arith.divf %106, %107 : vector<128x1xf32>
    %109 = arith.mulf %104, %104 : vector<128x16xf32>
    %cst_61 = arith.constant dense<0.000000e+00> : vector<128xf32>
    %110 = vector.multi_reduction <add>, %109, %cst_61 [1] : vector<128x16xf32> to vector<128xf32>
    %111 = vector.shape_cast %110 : vector<128xf32> to vector<128x1xf32>
    %cst_62 = arith.constant 1.600000e+01 : f32
    %112 = vector.broadcast %cst_62 : f32 to vector<128x1xf32>
    %113 = arith.divf %111, %112 : vector<128x1xf32>
    %114 = arith.mulf %108, %108 : vector<128x1xf32>
    %115 = arith.subf %113, %114 : vector<128x1xf32>
    %cst_63 = arith.constant 0.000000e+00 : f32
    %116 = vector.broadcast %cst_63 : f32 to vector<128x1xf32>
    %117 = arith.maximumf %115, %116 : vector<128x1xf32>
    %118 = vector.broadcast %108 : vector<128x1xf32> to vector<128x16xf32>
    %119 = arith.subf %104, %118 : vector<128x16xf32>
    %cst_64 = arith.constant 9.99999974E-6 : f32
    %120 = vector.broadcast %cst_64 : f32 to vector<128x1xf32>
    %121 = arith.addf %117, %120 : vector<128x1xf32>
    %122 = math.rsqrt %121 : vector<128x1xf32>
    %123 = vector.broadcast %122 : vector<128x1xf32> to vector<128x16xf32>
    %124 = arith.mulf %119, %123 : vector<128x16xf32>
    %125 = vector.broadcast %92 : vector<1x16xf32> to vector<128x16xf32>
    %126 = arith.mulf %124, %125 : vector<128x16xf32>
    %127 = vector.broadcast %93 : vector<1x16xf32> to vector<128x16xf32>
    %128 = arith.addf %126, %127 : vector<128x16xf32>
    %c0_65 = arith.constant 0 : index
    %c0_66 = arith.constant 0 : index
    %129 = vector.load %arg15[%c0_65, %c0_66] : memref<128x16xf32, #tpu.memory_space<vmem>>, vector<128x16xf32>
    tpu.vector_store %arg15[%c0_65, %c0_66], %128 {strides = array<i32>} : memref<128x16xf32, #tpu.memory_space<vmem>>, vector<128x16xf32>,
    return
  }
  func.func @transform_0(%arg0: i32) -> (i32, i32) {
    %c0_i32 = arith.constant 0 : i32
    %c0_i32_0 = arith.constant 0 : i32
    return %arg0, %c0_i32 : i32, i32
  }
  func.func @transform_1(%arg0: i32) -> (i32, i32) {
    %c0_i32 = arith.constant 0 : i32
    %c0_i32_0 = arith.constant 0 : i32
    %c0_i32_1 = arith.constant 0 : i32
    return %c0_i32, %c0_i32_0 : i32, i32
  }
  func.func @transform_2(%arg0: i32) -> (i32, i32) {
    %c0_i32 = arith.constant 0 : i32
    %c0_i32_0 = arith.constant 0 : i32
    %c0_i32_1 = arith.constant 0 : i32
    return %c0_i32, %c0_i32_0 : i32, i32
  }
  func.func @transform_3(%arg0: i32) -> (i32, i32) {
    %c0_i32 = arith.constant 0 : i32
    %c0_i32_0 = arith.constant 0 : i32
    %c0_i32_1 = arith.constant 0 : i32
    return %c0_i32, %c0_i32_0 : i32, i32
  }
  func.func @transform_4(%arg0: i32) -> (i32, i32) {
    %c0_i32 = arith.constant 0 : i32
    %c0_i32_0 = arith.constant 0 : i32
    %c0_i32_1 = arith.constant 0 : i32
    return %c0_i32, %c0_i32_0 : i32, i32
  }
  func.func @transform_5(%arg0: i32) -> (i32, i32) {
    %c0_i32 = arith.constant 0 : i32
    %c0_i32_0 = arith.constant 0 : i32
    %c0_i32_1 = arith.constant 0 : i32
    return %c0_i32, %c0_i32_0 : i32, i32
  }
  func.func @transform_6(%arg0: i32) -> (i32, i32) {
    %c0_i32 = arith.constant 0 : i32
    %c0_i32_0 = arith.constant 0 : i32
    %c0_i32_1 = arith.constant 0 : i32
    return %c0_i32, %c0_i32_0 : i32, i32
  }
  func.func @transform_7(%arg0: i32) -> (i32, i32) {
    %c0_i32 = arith.constant 0 : i32
    %c0_i32_0 = arith.constant 0 : i32
    %c0_i32_1 = arith.constant 0 : i32
    return %c0_i32, %c0_i32_0 : i32, i32
  }
  func.func @transform_8(%arg0: i32) -> (i32, i32) {
    %c0_i32 = arith.constant 0 : i32
    %c0_i32_0 = arith.constant 0 : i32
    %c0_i32_1 = arith.constant 0 : i32
    return %c0_i32, %c0_i32_0 : i32, i32
  }
  func.func @transform_9(%arg0: i32) -> (i32, i32) {
    %c0_i32 = arith.constant 0 : i32
    %c0_i32_0 = arith.constant 0 : i32
    %c0_i32_1 = arith.constant 0 : i32
    return %c0_i32, %c0_i32_0 : i32, i32
  }
  func.func @transform_10(%arg0: i32) -> (i32, i32) {
    %c0_i32 = arith.constant 0 : i32
    %c0_i32_0 = arith.constant 0 : i32
    %c0_i32_1 = arith.constant 0 : i32
    return %c0_i32, %c0_i32_0 : i32, i32
  }
  func.func @transform_11(%arg0: i32) -> (i32, i32) {
    %c0_i32 = arith.constant 0 : i32
    %c0_i32_0 = arith.constant 0 : i32
    %c0_i32_1 = arith.constant 0 : i32
    return %c0_i32, %c0_i32_0 : i32, i32
  }
  func.func @transform_12(%arg0: i32) -> (i32, i32) {
    %c0_i32 = arith.constant 0 : i32
    %c0_i32_0 = arith.constant 0 : i32
    %c0_i32_1 = arith.constant 0 : i32
    return %c0_i32, %c0_i32_0 : i32, i32
  }
  func.func @transform_13(%arg0: i32) -> (i32, i32) {
    %c0_i32 = arith.constant 0 : i32
    %c0_i32_0 = arith.constant 0 : i32
    %c0_i32_1 = arith.constant 0 : i32
    return %c0_i32, %c0_i32_0 : i32, i32
  }
  func.func @transform_14(%arg0: i32) -> (i32, i32) {
    %c0_i32 = arith.constant 0 : i32
    %c0_i32_0 = arith.constant 0 : i32
    return %arg0, %c0_i32 : i32, i32
  }
}

</mosaic_0001>

<bundles_post_ra>
// kernel: tpu_custom_call.1
= control target key start
LH: loop header
LB: loop body
LE: loop exit
PB: predicated region body
PF: predicated region fallthrough
CT: control target
= control target key end

     0   :  { %s2950_s29 = smov 0   ;;  %s4272_s0 = inlined_call_operand.vmem [shape: f32[256,24], index: 0, kind: input, shape index: {}]   ;;  %s4273_s1 = inlined_call_operand.vmem [shape: bf16[24,32], index: 1, kind: input, shape index: {}]   ;;  %s4274_s2 = inlined_call_operand.vmem [shape: f32[1,32], index: 2, kind: input, shape index: {}]   ;;  %s4275_s3 = inlined_call_operand.vmem [shape: bf16[32,16], index: 3, kind: input, shape index: {}]   ;;  %s4276_s4 = inlined_call_operand.vmem [shape: bf16[24,16], index: 4, kind: input, shape index: {}]   ;;  %s4277_s5 = inlined_call_operand.vmem [shape: f32[4,16], index: 5, kind: input, shape index: {}]   ;;  %s4278_s6 = inlined_call_operand.vmem [shape: bf16[16,32], index: 6, kind: input, shape index: {}]   ;;  %s4279_s7 = inlined_call_operand.vmem [shape: f32[1,32], index: 7, kind: input, shape index: {}]   ;;  %s4280_s8 = inlined_call_operand.vmem [shape: bf16[32,16], index: 8, kind: input, shape index: {}]   ;;  %s4281_s9 = inlined_call_operand.vmem [shape: f32[3,16], index: 9, kind: input, shape index: {}]   ;;  %s4282_s10 = inlined_call_operand.vmem [shape: bf16[16,32], index: 10, kind: input, shape index: {}]   ;;  %s4283_s11 = inlined_call_operand.vmem [shape: f32[1,32], index: 11, kind: input, shape index: {}]   ;;  %s4284_s12 = inlined_call_operand.vmem [shape: bf16[32,16], index: 12, kind: input, shape index: {}]   ;;  %s4285_s13 = inlined_call_operand.vmem [shape: f32[3,16], index: 13, kind: input, shape index: {}]   ;;  %s4286_s14 = inlined_call_operand.vmem [shape: f32[256,16], index: 14, kind: output, shape index: {}]  }
   0x1 LB: > { %s2624_s30 = sadd.s32 4294967295, %s2872_s29   ;;  %p2628_p0 = scmp.ge.s32.totalorder %s2872_s29, 1  ;;  %s2872_s29 = sphi %s2950_s29, %s24_s29  }
   0x2   : > { %p413_p1 = scmp.lt.s32.totalorder %s2872_s29, 3 }
   0x4   : > { %p414_p2 = pnand %p2628_p0, %p413_p1 }
   0x5   : > { %s2629_s17 = sshll.u32 (!%p414_p2), %s2624_s30, 4 }
   0x6   : > { %417 = sbr.rel (%p414_p2) target bundleno = 1490 (0x5d2), region = 76  ;;  %p460_p3 = scmp.lt.s32.totalorder (!%p414_p2), %s2629_s17, 31 }
   0xb   : > { %v490_v0 = vld [vmem:[%s4273_s1 + $0x8] sm:$0xf]  ;;  %vm547_vm0 = vcmask 1043456   ;;  %s4290_s17 = smov (!%p460_p3, %s2629_s17), 31  ;;  %v2731_v4 = vld [vmem:[%s4273_s1] sm:$0xff]  ;;  %vm522_vm1 = vcmask 195584  }
   0xc   : > { %v518_v1 = vunpack.c.l.b16 %v490_v0  ;;  %s2630_s20 = sshll.u32 %s4290_s17, 3  ;;  %v498_v20 = vld [vmem:[%s4276_s4 + $0x8] sm:$0xf]  ;;  %v2732_v27 = vld [vmem:[%s4275_s3] sm:$0xff]  ;;  %vm637_vm2 = vcmask 261120   ;;  %vm790_vm3 = vcmask 130048  }
   0xd   : > { %s2973_s23 = scalar_lea.vmem %s4272_s0, %s2630_s20  ;;  %v718_v23 = vunpack.c.l.b16 %v498_v20  ;;  %v2733_v26 = vld [vmem:[%s4275_s3 + $0x8] sm:$0xff]  ;;  %v3036_v36 = vld [vmem:[%s4274_s2] ss:$0 sm:$0xff]  ;;  %s4107_s19 = scalar_lea.vmem %s4286_s14, %s2630_s20 }
   0xe   : > { %v520_v2 = vpack.c.b16 %v518_v1, %v518_v1  ;;  %v484_v5 = vld [vmem:[%s2973_s23 + $0x60] sm:$0xff]  ;;  %v485_v6 = vld [vmem:[%s2973_s23 + $0x68] sm:$0xff]  ;;  %v486_v11 = vld [vmem:[%s2973_s23 + $0x70] sm:$0xff]  ;;  %668 = vmatpush.bf16.msra.mxu1 %v2733_v26 }
   0xf   : > { %v2977_v7 = vpack.c.bf16 %v485_v6, %v484_v5  ;;  %v472_v8 = vld [vmem:[%s2973_s23] sm:$0xff]  ;;  %v473_v9 = vld [vmem:[%s2973_s23 + $0x8] sm:$0xff]  ;;  %v487_v12 = vld [vmem:[%s2973_s23 + $0x78] sm:$0xff]  ;;  %v720_v25 = vpack.c.b16 %v718_v23, %v718_v23 }
  0x10   : > { %v549_v3 = vsel %vm547_vm0, %v520_v2, 0  ;;  %v2981_v10 = vpack.c.bf16 %v473_v9, %v472_v8  ;;  %v474_v13 = vld [vmem:[%s2973_s23 + $0x10] sm:$0xff]  ;;  %v475_v14 = vld [vmem:[%s2973_s23 + $0x18] sm:$0xff]  ;;  %v2991_v15 = vpack.c.bf16 %v487_v12, %v486_v11  ;;  %v476_v17 = vld [vmem:[%s2973_s23 + $0x20] sm:$0xff] }
  0x11   : > { %2741 = vmatpush.bf16.msra.mxu2 %v549_v3  ;;  %557 = vmatpush.bf16.msra.mxu0 %v549_v3  ;;  %v2993_v16 = vpack.c.bf16 %v475_v14, %v474_v13  ;;  %v477_v18 = vld [vmem:[%s2973_s23 + $0x28] sm:$0xff]  ;;  %v478_v21 = vld [vmem:[%s2973_s23 + $0x30] sm:$0xff]  ;;  %v479_v22 = vld [vmem:[%s2973_s23 + $0x38] sm:$0xff]  ;;  %v723_v28 = vsel %vm547_vm0, %v720_v25, 0 }
  0x12   : > { %v3001_v19 = vpack.c.bf16 %v477_v18, %v476_v17  ;;  %v3010_v24 = vpack.c.bf16 %v479_v22, %v478_v21  ;;  %669 = vmatpush.bf16.msra.mxu1 %v2732_v27  ;;  %v480_v29 = vld [vmem:[%s2973_s23 + $0x40] sm:$0xff]  ;;  %v481_v30 = vld [vmem:[%s2973_s23 + $0x48] sm:$0xff]  ;;  %v482_v32 = vld [vmem:[%s2973_s23 + $0x50] sm:$0xff] }
  0x13   : > { %v3023_v31 = vpack.c.bf16 %v481_v30, %v480_v29  ;;  %v483_v33 = vld [vmem:[%s2973_s23 + $0x58] sm:$0xff]  ;;  %v2734_v38 = vld [vmem:[%s4276_s4] sm:$0xff] }
  0x14   : > { %v3029_v34 = vpack.c.bf16 %v483_v33, %v482_v32 }
  0x15   : > { %2742 = vmatpush.bf16.msra.mxu2 %v2731_v4  ;;  %558 = vmatpush.bf16.msra.mxu0 %v2731_v4 }
  0x18   : > { %2643 = vmatmul.msk.bf16.vlgmr.msra.gmra.mxu2 %vm522_vm1, %v2977_v7  ;;  %2637 = vmatmul.msk.bf16.vlgmr.msra.gmra.mxu0 %vm522_vm1, %v2981_v10 }
  0x19   : > { %2743 = vmatpush.bf16.msrb.mxu2 %v2733_v26 }
  0x1d   : > { %2744 = vmatpush.bf16.msrb.mxu2 %v2732_v27 }
  0x21   : > { %731 = vmatpush.bf16.msra.mxu2 %v723_v28 }
  0x25   : > { %732 = vmatpush.bf16.msra.mxu2 %v2734_v38 }
  0x28   : > { %2644 = vmatmul.msk.bf16.gmra.mxu2 %vm522_vm1, %v2991_v15  ;;  %2638 = vmatmul.msk.bf16.gmra.mxu0 %vm522_vm1, %v2993_v16 }
  0x38   : > { %2639 = vmatmul.msk.bf16.gmra.mxu0 %vm522_vm1, %v3001_v19 }
  0x48   : > { %2640 = vmatmul.msk.bf16.gmra.mxu0 %vm522_vm1, %v3010_v24 }
  0x58   : > { %2641 = vmatmul.msk.bf16.gmra.mxu0 %vm522_vm1, %v3023_v31 }
  0x68   : > { %2642 = vmatmul.msk.bf16.gmra.mxu0 %vm522_vm1, %v3029_v34 }
  0x95   : > { %v560_v35 = vpop.f32.mrf.mxu0 }
  0x96   : > { %v561_v37 = vadd.f32 %v3036_v36, %v560_v35 }
  0x98   : > { %v600_v41 = vmax.f32 %v561_v37, 0.0 }
  0x9b   : > { %v590_v39 = vpop.f32.mrf.mxu2 }
  0x9c   : > { %v591_v44 = vadd.f32 %v3036_v36, %v590_v39 }
  0x9d   : > { %v562_v40 = vpop.f32.mrf.mxu0 }
  0x9e   : > { %v563_v42 = vadd.f32 %v3036_v36, %v562_v40  ;;  %v612_v49 = vmax.f32 %v591_v44, 0.0 }
  0xa0   : > { %v601_v43 = vmax.f32 %v563_v42, 0.0  ;;  %v2735_v42 = vld [vmem:[%s4278_s6] sm:$0xff] }
  0xa1   : > { %2745 = vmatpush.bf16.msra.mxu3 %v2735_v42 }
  0xa2   : > { %v616_v45 = vpack.c.bf16 %v601_v43, %v600_v41 }
  0xa3   : > { %v592_v46 = vpop.f32.mrf.mxu2 }
  0xa4   : > { %v593_v47 = vadd.f32 %v3036_v36, %v592_v46  ;;  %2653 = vmatmul.msk.bf16.vlgmr.msra.gmra.mxu1 %vm637_vm2, %v616_v45 }
  0xa5   : > { %v565_v48 = vpop.f32.mrf.mxu0 }
  0xa6   : > { %v613_v50 = vmax.f32 %v593_v47, 0.0  ;;  %v566_v52 = vadd.f32 %v3036_v36, %v565_v48 }
  0xa8   : > { %v622_v51 = vpack.c.bf16 %v613_v50, %v612_v49  ;;  %v602_v55 = vmax.f32 %v566_v52, 0.0 }
  0xaa   : > { %2659 = vmatmul.msk.bf16.vlgmr.msrb.gmra.mxu2 %vm637_vm2, %v622_v51 }
  0xab   : > { %v595_v53 = vpop.f32.mrf.mxu2  ;;  %1290 = vmatpush.bf16.msrb.mxu2 %v2735_v42 }
  0xac   : > { %v596_v58 = vadd.f32 %v3036_v36, %v595_v53 }
  0xad   : > { %v567_v54 = vpop.f32.mrf.mxu0 }
  0xae   : > { %v568_v56 = vadd.f32 %v3036_v36, %v567_v54  ;;  %v614_v63 = vmax.f32 %v596_v58, 0.0 }
  0xb0   : > { %v603_v57 = vmax.f32 %v568_v56, 0.0 }
  0xb2   : > { %v617_v59 = vpack.c.bf16 %v603_v57, %v602_v55 }
  0xb3   : > { %v597_v60 = vpop.f32.mrf.mxu2 }
  0xb4   : > { %v598_v61 = vadd.f32 %v3036_v36, %v597_v60  ;;  %2654 = vmatmul.msk.bf16.gmra.mxu1 %vm637_vm2, %v617_v59 }
  0xb5   : > { %v570_v62 = vpop.f32.mrf.mxu0 }
  0xb6   : > { %v615_v0 = vmax.f32 %v598_v61, 0.0  ;;  %v571_v2 = vadd.f32 %v3036_v36, %v570_v62 }
  0xb8   : > { %v623_v1 = vpack.c.bf16 %v615_v0, %v614_v63  ;;  %v604_v4 = vmax.f32 %v571_v2, 0.0 }
  0xba   : > { %2660 = vmatmul.msk.bf16.gmra.mxu2 %vm637_vm2, %v623_v1 }
  0xbd   : > { %v572_v3 = vpop.f32.mrf.mxu0 }
  0xbe   : > { %v573_v5 = vadd.f32 %v3036_v36, %v572_v3 }
  0xc0   : > { %v605_v6 = vmax.f32 %v573_v5, 0.0 }
  0xc2   : > { %v618_v8 = vpack.c.bf16 %v605_v6, %v604_v4 }
  0xc4   : > { %2655 = vmatmul.msk.bf16.gmra.mxu1 %vm637_vm2, %v618_v8 }
  0xc5   : > { %v575_v9 = vpop.f32.mrf.mxu0 }
  0xc6   : > { %v576_v11 = vadd.f32 %v3036_v36, %v575_v9 }
  0xc8   : > { %v606_v13 = vmax.f32 %v576_v11, 0.0 }
  0xca   : > { %2665 = vmatmul.msk.bf16.vlgmr.msra.gmra.mxu2 %vm522_vm1, %v2981_v10 }
  0xcd   : > { %v577_v12 = vpop.f32.mrf.mxu0 }
  0xce   : > { %v578_v14 = vadd.f32 %v3036_v36, %v577_v12 }
  0xd0   : > { %v607_v17 = vmax.f32 %v578_v14, 0.0 }
  0xd2   : > { %v619_v18 = vpack.c.bf16 %v607_v17, %v606_v13 }
  0xd4   : > { %2656 = vmatmul.msk.bf16.gmra.mxu1 %vm637_vm2, %v619_v18 }
  0xd5   : > { %v580_v20 = vpop.f32.mrf.mxu0 }
  0xd6   : > { %v581_v21 = vadd.f32 %v3036_v36, %v580_v20 }
  0xd8   : > { %v608_v23 = vmax.f32 %v581_v21, 0.0 }
  0xda   : > { %2666 = vmatmul.msk.bf16.gmra.mxu2 %vm522_vm1, %v2993_v16 }
  0xdd   : > { %v582_v22 = vpop.f32.mrf.mxu0 }
  0xde   : > { %v583_v10 = vadd.f32 %v3036_v36, %v582_v22 }
  0xe0   : > { %v609_v25 = vmax.f32 %v583_v10, 0.0 }
  0xe2   : > { %v620_v26 = vpack.c.bf16 %v609_v25, %v608_v23 }
  0xe4   : > { %2657 = vmatmul.msk.bf16.gmra.mxu1 %vm637_vm2, %v620_v26 }
  0xe5   : > { %v585_v27 = vpop.f32.mrf.mxu0 }
  0xe6   : > { %v586_v28 = vadd.f32 %v3036_v36, %v585_v27 }
  0xe8   : > { %v610_v30 = vmax.f32 %v586_v28, 0.0 }
  0xea   : > { %2667 = vmatmul.msk.bf16.gmra.mxu2 %vm522_vm1, %v3001_v19 }
  0xed   : > { %v587_v29 = vpop.f32.mrf.mxu0 }
  0xee   : > { %v588_v16 = vadd.f32 %v3036_v36, %v587_v29 }
  0xf0   : > { %v611_v32 = vmax.f32 %v588_v16, 0.0 }
  0xf2   : > { %v621_v33 = vpack.c.bf16 %v611_v32, %v610_v30 }
  0xf4   : > { %2658 = vmatmul.msk.bf16.gmra.mxu1 %vm637_vm2, %v621_v33 }
  0xfa   : > { %2668 = vmatmul.msk.bf16.gmra.mxu2 %vm522_vm1, %v3010_v24 }
 0x10a   : > { %2669 = vmatmul.msk.bf16.gmra.mxu2 %vm522_vm1, %v3023_v31 }
 0x11a   : > { %2670 = vmatmul.msk.bf16.gmra.mxu2 %vm522_vm1, %v3029_v34  ;;  %v3092_v34 = vld [vmem:[%s4277_s5 + $0x3] ss:$0 sm:$0xff] }
 0x121   : > { %v671_v36 = vpop.f32.mrf.mxu1 }
 0x129   : > { %v673_v24 = vpop.f32.mrf.mxu1 }
 0x12a   : > { %2671 = vmatmul.msk.bf16.gmra.mxu2 %vm522_vm1, %v2977_v7  ;;  %v3097_v7 = vld [vmem:[%s4277_s5] ss:$0 sm:$0xff] }
 0x12b   : > { %v672_v40 = vadd.f32 %v3097_v7, %v671_v36  ;;  %v674_v48 = vadd.f32 %v3097_v7, %v673_v24 }
 0x12d   : > { %v3079_v19 = vpop.f32.mrf.mxu2 }
 0x131   : > { %v676_v31 = vpop.f32.mrf.mxu1 }
 0x132   : > { %v677_v56 = vadd.f32 %v3097_v7, %v676_v31 }
 0x135   : > { %v3081_v35 = vpop.f32.mrf.mxu2 }
 0x139   : > { %v678_v45 = vpop.f32.mrf.mxu1 }
 0x13a   : > { %2672 = vmatmul.msk.bf16.gmra.mxu2 %vm522_vm1, %v2991_v15  ;;  %v679_v63 = vadd.f32 %v3097_v7, %v678_v45 }
 0x13d   : > { %v3085_v37 = vpop.f32.mrf.mxu2 }
 0x141   : > { %v681_v54 = vpop.f32.mrf.mxu1 }
 0x142   : > { %v682_v8 = vadd.f32 %v3097_v7, %v681_v54 }
 0x145   : > { %v3087_v38 = vpop.f32.mrf.mxu2 }
 0x149   : > { %v683_v1 = vpop.f32.mrf.mxu1 }
 0x14a   : > { %v684_v20 = vadd.f32 %v3097_v7, %v683_v1 }
 0x14d   : > { %v734_v39 = vpop.f32.mrf.mxu2 }
 0x14e   : > { %v735_v15 = vadd.f32 %v3092_v34, %v734_v39 }
 0x150   : > { %v3101_v41 = vadd.f32 %v735_v15, %v672_v40 }
 0x151   : > { %v686_v12 = vpop.f32.mrf.mxu1 }
 0x152   : > { %v791_v43 = vsel %vm790_vm3, %v3101_v41, 0.0  ;;  %v862_v44 = vmul.f32 %v3101_v41, %v3101_v41  ;;  %v687_v28 = vadd.f32 %v3097_v7, %v686_v12 }
 0x153   : > { %792 = vadd.xlane.f32.xlu0 %v791_v43 }
 0x154   : > { %v878_v46 = vsel %vm790_vm3, %v862_v44, 0.0 }
 0x155   : > { %v736_v47 = vpop.f32.mrf.mxu2  ;;  %879 = vadd.xlane.f32.xlu1 %v878_v46 }
 0x156   : > { %v737_v49 = vadd.f32 %v3092_v34, %v736_v47 }
 0x158   : > { %v3113_v50 = vadd.f32 %v737_v49, %v674_v48 }
 0x159   : > { %v688_v25 = vpop.f32.mrf.mxu1 }
 0x15a   : > { %v794_v51 = vsel %vm790_vm3, %v3113_v50, 0.0  ;;  %v863_v52 = vmul.f32 %v3113_v50, %v3113_v50  ;;  %v689_v31 = vadd.f32 %v3097_v7, %v688_v25 }
 0x15b   : > { %795 = vadd.xlane.f32.xlu0 %v794_v51 }
 0x15c   : > { %v881_v53 = vsel %vm790_vm3, %v863_v52, 0.0 }
 0x15d   : > { %v739_v55 = vpop.f32.mrf.mxu2  ;;  %882 = vadd.xlane.f32.xlu1 %v881_v53 }
 0x15e   : > { %v740_v57 = vadd.f32 %v3092_v34, %v739_v55 }
 0x160   : > { %v3122_v58 = vadd.f32 %v740_v57, %v677_v56 }
 0x161   : > { %v691_v36 = vpop.f32.mrf.mxu1 }
 0x162   : > { %v797_v59 = vsel %vm790_vm3, %v3122_v58, 0.0  ;;  %v864_v60 = vmul.f32 %v3122_v58, %v3122_v58  ;;  %v692_v45 = vadd.f32 %v3097_v7, %v691_v36 }
 0x163   : > { %798 = vadd.xlane.f32.xlu2 %v797_v59 }
 0x164   : > { %v884_v61 = vsel %vm790_vm3, %v864_v60, 0.0 }
 0x165   : > { %v741_v62 = vpop.f32.mrf.mxu2  ;;  %885 = vadd.xlane.f32.xlu0 %v884_v61 }
 0x166   : > { %v742_v0 = vadd.f32 %v3092_v34, %v741_v62 }
 0x168   : > { %v3131_v2 = vadd.f32 %v742_v0, %v679_v63 }
 0x169   : > { %v693_v47 = vpop.f32.mrf.mxu1 }
 0x16a   : > { %v800_v3 = vsel %vm790_vm3, %v3131_v2, 0.0  ;;  %v865_v4 = vmul.f32 %v3131_v2, %v3131_v2  ;;  %v694_v54 = vadd.f32 %v3097_v7, %v693_v47 }
 0x16b   : > { %801 = vadd.xlane.f32.xlu2 %v800_v3 }
 0x16c   : > { %v887_v5 = vsel %vm790_vm3, %v865_v4, 0.0 }
 0x16d   : > { %v744_v6 = vpop.f32.mrf.mxu2  ;;  %888 = vadd.xlane.f32.xlu1 %v887_v5 }
 0x16e   : > { %v745_v9 = vadd.f32 %v3092_v34, %v744_v6 }
 0x170   : > { %v3140_v11 = vadd.f32 %v745_v9, %v682_v8 }
 0x171   : > { %v696_v57 = vpop.f32.mrf.mxu1 }
 0x172   : > { %v803_v13 = vsel %vm790_vm3, %v3140_v11, 0.0  ;;  %v866_v14 = vmul.f32 %v3140_v11, %v3140_v11  ;;  %v697_v63 = vadd.f32 %v3097_v7, %v696_v57 }
 0x173   : > { %804 = vadd.xlane.f32.xlu2 %v803_v13 }
 0x174   : > { %v890_v17 = vsel %vm790_vm3, %v866_v14, 0.0 }
 0x175   : > { %v746_v18 = vpop.f32.mrf.mxu2  ;;  %891 = vadd.xlane.f32.xlu1 %v890_v17 }
 0x176   : > { %v747_v21 = vadd.f32 %v3092_v34, %v746_v18  ;;  %v2874_v18 = vmov 16.0  }
 0x177   : > { %2768 = vrcp.f32 %v2874_v18 }
 0x178   : > { %v3149_v22 = vadd.f32 %v747_v21, %v684_v20 }
 0x179   : > { %v698_v5 = vpop.f32.mrf.mxu1 }
 0x17a   : > { %v806_v23 = vsel %vm790_vm3, %v3149_v22, 0.0  ;;  %v867_v10 = vmul.f32 %v3149_v22, %v3149_v22  ;;  %v699_v9 = vadd.f32 %v3097_v7, %v698_v5 }
 0x17b   : > { %807 = vadd.xlane.f32.xlu0 %v806_v23  ;;  %v702_v23 = vadd.f32 %v3097_v7, %v3079_v19  ;;  %v704_v19 = vadd.f32 %v3097_v7, %v3081_v35  ;;  %v707_v35 = vadd.f32 %v3097_v7, %v3085_v37  ;;  %v709_v37 = vadd.f32 %v3097_v7, %v3087_v38 }
 0x17c   : > { %v893_v26 = vsel %vm790_vm3, %v867_v10, 0.0 }
 0x17d   : > { %v749_v27 = vpop.f32.mrf.mxu2  ;;  %894 = vadd.xlane.f32.xlu2 %v893_v26  ;;  %v2769_v26 = vpop.eup %2768 }
 0x17e   : > { %v750_v29 = vadd.f32 %v3092_v34, %v749_v27  ;;  %vm844_vm4 = vweird.f32 %v2769_v26 }
 0x180   : > { %v3158_v30 = vadd.f32 %v750_v29, %v687_v28 }
 0x182   : > { %v809_v16 = vsel %vm790_vm3, %v3158_v30, 0.0  ;;  %v868_v32 = vmul.f32 %v3158_v30, %v3158_v30 }
 0x183   : > { %810 = vadd.xlane.f32.xlu0 %v809_v16  ;;  %v840_v16 = vmul.f32 16.0, %v2769_v26 }
 0x184   : > { %v896_v33 = vsel %vm790_vm3, %v868_v32, 0.0 }
 0x185   : > { %v751_v24 = vpop.f32.mrf.mxu2  ;;  %897 = vadd.xlane.f32.xlu2 %v896_v33 }
 0x186   : > { %v752_v39 = vadd.f32 %v3092_v34, %v751_v24  ;;  %v841_v24 = vsub.f32 1.0, %v840_v16 }
 0x188   : > { %v3167_v40 = vadd.f32 %v752_v39, %v689_v31 }
 0x18a   : > { %v812_v15 = vsel %vm790_vm3, %v3167_v40, 0.0  ;;  %v869_v42 = vmul.f32 %v3167_v40, %v3167_v40 }
 0x18b   : > { %813 = vadd.xlane.f32.xlu1 %v812_v15 }
 0x18c   : > { %v899_v43 = vsel %vm790_vm3, %v869_v42, 0.0  ;;  %v842_v42 = vmul.f32 %v2769_v26, %v841_v24 }
 0x18d   : > { %v754_v44 = vpop.f32.mrf.mxu2  ;;  %900 = vadd.xlane.f32.xlu0 %v899_v43 }
 0x18e   : > { %v755_v46 = vadd.f32 %v3092_v34, %v754_v44 }
 0x190   : > { %v3176_v48 = vadd.f32 %v755_v46, %v692_v45  ;;  %v843_v46 = vadd.f32 %v2769_v26, %v842_v42 }
 0x192   : > { %v815_v49 = vsel %vm790_vm3, %v3176_v48, 0.0  ;;  %v870_v51 = vmul.f32 %v3176_v48, %v3176_v48 }
 0x193   : > { %816 = vadd.xlane.f32.xlu1 %v815_v49 }
 0x194   : > { %v902_v52 = vsel %vm790_vm3, %v870_v51, 0.0 }
 0x195   : > { %v756_v53 = vpop.f32.mrf.mxu2  ;;  %903 = vadd.xlane.f32.xlu0 %v902_v52  ;;  %v3240_v52 = vsel %vm844_vm4, %v2769_v26, %v843_v46 }
 0x196   : > { %v757_v55 = vadd.f32 %v3092_v34, %v756_v53 }
 0x198   : > { %v3185_v56 = vadd.f32 %v757_v55, %v694_v54 }
 0x19a   : > { %v818_v59 = vsel %vm790_vm3, %v3185_v56, 0.0  ;;  %v871_v60 = vmul.f32 %v3185_v56, %v3185_v56 }
 0x19b   : > { %819 = vadd.xlane.f32.xlu2 %v818_v59 }
 0x19c   : > { %v905_v61 = vsel %vm790_vm3, %v871_v60, 0.0 }
 0x19d   : > { %v759_v62 = vpop.f32.mrf.mxu2  ;;  %906 = vadd.xlane.f32.xlu1 %v905_v61 }
 0x19e   : > { %v760_v0 = vadd.f32 %v3092_v34, %v759_v62 }
 0x1a0   : > { %v3194_v1 = vadd.f32 %v760_v0, %v697_v63 }
 0x1a2   : > { %v821_v3 = vsel %vm790_vm3, %v3194_v1, 0.0  ;;  %v872_v4 = vmul.f32 %v3194_v1, %v3194_v1 }
 0x1a3   : > { %822 = vadd.xlane.f32.xlu2 %v821_v3 }
 0x1a4   : > { %v908_v6 = vsel %vm790_vm3, %v872_v4, 0.0 }
 0x1a5   : > { %v761_v8 = vpop.f32.mrf.mxu2  ;;  %909 = vadd.xlane.f32.xlu1 %v908_v6 }
 0x1a6   : > { %v762_v12 = vadd.f32 %v3092_v34, %v761_v8 }
 0x1a8   : > { %v3203_v13 = vadd.f32 %v762_v12, %v699_v9 }
 0x1aa   : > { %v824_v14 = vsel %vm790_vm3, %v3203_v13, 0.0  ;;  %v873_v17 = vmul.f32 %v3203_v13, %v3203_v13 }
 0x1ab   : > { %825 = vadd.xlane.f32.xlu0 %v824_v14 }
 0x1ac   : > { %v911_v20 = vsel %vm790_vm3, %v873_v17, 0.0 }
 0x1ad   : > { %v764_v21 = vpop.f32.mrf.mxu2  ;;  %912 = vadd.xlane.f32.xlu2 %v911_v20 }
 0x1ae   : > { %v765_v10 = vadd.f32 %v3092_v34, %v764_v21 }
 0x1b0   : > { %v3213_v25 = vadd.f32 %v765_v10, %v702_v23 }
 0x1b2   : > { %v827_v27 = vsel %vm790_vm3, %v3213_v25, 0.0  ;;  %v874_v28 = vmul.f32 %v3213_v25, %v3213_v25 }
 0x1b3   : > { %828 = vadd.xlane.f32.xlu0 %v827_v27 }
 0x1b4   : > { %v914_v29 = vsel %vm790_vm3, %v874_v28, 0.0 }
 0x1b5   : > { %v766_v32 = vpop.f32.mrf.mxu2  ;;  %915 = vadd.xlane.f32.xlu2 %v914_v29 }
 0x1b6   : > { %v767_v33 = vadd.f32 %v3092_v34, %v766_v32 }
 0x1b8   : > { %v3223_v36 = vadd.f32 %v767_v33, %v704_v19 }
 0x1ba   : > { %v830_v31 = vsel %vm790_vm3, %v3223_v36, 0.0  ;;  %v875_v39 = vmul.f32 %v3223_v36, %v3223_v36 }
 0x1bb   : > { %831 = vadd.xlane.f32.xlu1 %v830_v31 }
 0x1bc   : > { %v917_v15 = vsel %vm790_vm3, %v875_v39, 0.0 }
 0x1bd   : > { %v769_v43 = vpop.f32.mrf.mxu2  ;;  %918 = vadd.xlane.f32.xlu0 %v917_v15 }
 0x1be   : > { %v770_v44 = vadd.f32 %v3092_v34, %v769_v43 }
 0x1c0   : > { %v3233_v45 = vadd.f32 %v770_v44, %v707_v35 }
 0x1c2   : > { %v833_v47 = vsel %vm790_vm3, %v3233_v45, 0.0  ;;  %v876_v49 = vmul.f32 %v3233_v45, %v3233_v45 }
 0x1c3   : > { %834 = vadd.xlane.f32.xlu1 %v833_v47 }
 0x1c4   : > { %v920_v51 = vsel %vm790_vm3, %v876_v49, 0.0 }
 0x1c5   : > { %v771_v53 = vpop.f32.mrf.mxu2  ;;  %921 = vadd.xlane.f32.xlu0 %v920_v51 }
 0x1c6   : > { %v772_v54 = vadd.f32 %v3092_v34, %v771_v53  ;;  %v793_v55 = vpop.xlane.xlu0 %792 }
 0x1c7   : > { %v846_v57 = vmul.f32 %v3240_v52, %v793_v55 }
 0x1c8   : > { %v3246_v59 = vadd.f32 %v772_v54, %v709_v37  ;;  %v880_v60 = vpop.xlane.xlu1 %879 }
 0x1c9   : > { %v942_v61 = vmul.f32 %v846_v57, %v846_v57  ;;  %v926_v62 = vmul.f32 %v880_v60, %v3240_v52  ;;  %v990_v53 = vsub.f32 %v3101_v41, %v846_v57 }
 0x1ca   : > { %v836_v63 = vsel %vm790_vm3, %v3246_v59, 0.0  ;;  %v877_v0 = vmul.f32 %v3246_v59, %v3246_v59 }
 0x1cb   : > { %v958_v3 = vsub.f32 %v926_v62, %v942_v61  ;;  %837 = vadd.xlane.f32.xlu2 %v836_v63  ;;  %v3279_v62 = vld [vmem:[%s4277_s5 + $0x1] ss:$0 sm:$0xff] }
 0x1cc   : > { %v923_v38 = vsel %vm790_vm3, %v877_v0, 0.0 }
 0x1cd   : > { %v974_v34 = vmax.f32 %v958_v3, 0.0  ;;  %924 = vadd.xlane.f32.xlu1 %v923_v38 }
 0x1ce   : > { %v796_v7 = vpop.xlane.xlu0 %795 }
 0x1cf   : > { %v1006_v4 = vadd.f32 1e-05, %v974_v34  ;;  %v3255_v5 = vmul.f32 %v3240_v52, %v796_v7 }
 0x1d0   : > { %v883_v6 = vpop.xlane.xlu1 %882 }
 0x1d1   : > { %2770 = vrsqrt.f32 %v1006_v4  ;;  %v943_v8 = vmul.f32 %v3255_v5, %v3255_v5  ;;  %v927_v9 = vmul.f32 %v883_v6, %v3240_v52  ;;  %vm1028_vm6 = vweird.f32 %v1006_v4 }
 0x1d2   : > { %v991_v7 = vsub.f32 %v3113_v50, %v3255_v5 }
 0x1d3   : > { %v959_v12 = vsub.f32 %v927_v9, %v943_v8  ;;  %v3289_v9 = vld [vmem:[%s4277_s5 + $0x2] ss:$0 sm:$0xff] }
 0x1d5   : > { %v975_v14 = vmax.f32 %v959_v12, 0.0 }
 0x1d6   : > { %v799_v17 = vpop.xlane.xlu2 %798 }
 0x1d7   : > { %v2771_v18 = vpop.eup %2770  ;;  %v3261_v20 = vmul.f32 %v3240_v52, %v799_v17  ;;  %v1007_v23 = vadd.f32 1e-05, %v975_v14 }
 0x1d8   : > { %v1023_v21 = vmul.f32 %v2771_v18, %v1006_v4  ;;  %v886_v10 = vpop.xlane.xlu0 %885  ;;  %vm1029_vm5 = vweird.f32 %v2771_v18 }
 0x1d9   : > { %v944_v26 = vmul.f32 %v3261_v20, %v3261_v20  ;;  %v928_v27 = vmul.f32 %v886_v10, %v3240_v52  ;;  %2772 = vrsqrt.f32 %v1007_v23  ;;  %vm1030_vm7 = vmor %vm1028_vm6, %vm1029_vm5  ;;  %vm1038_vm9 = vweird.f32 %v1007_v23 }
 0x1da   : > { %v1024_v28 = vmul.f32 %v2771_v18, %v1023_v21 }
 0x1db   : > { %v960_v29 = vsub.f32 %v928_v27, %v944_v26 }
 0x1dc   : > { %v1025_v16 = vmul.f32 0.5, %v1024_v28 }
 0x1dd   : > { %v976_v32 = vmax.f32 %v960_v29, 0.0 }
 0x1de   : > { %v1026_v19 = vsub.f32 1.5, %v1025_v16  ;;  %v802_v33 = vpop.xlane.xlu2 %801 }
 0x1df   : > { %v1008_v24 = vadd.f32 1e-05, %v976_v32  ;;  %v3267_v31 = vmul.f32 %v3240_v52, %v802_v33  ;;  %v2773_v39 = vpop.eup %2772 }
 0x1e0   : > { %v889_v15 = vpop.xlane.xlu1 %888  ;;  %v1027_v42 = vmul.f32 %v2771_v18, %v1026_v19  ;;  %v1033_v43 = vmul.f32 %v2773_v39, %v1007_v23  ;;  %vm1039_vm8 = vweird.f32 %v2773_v39 }
 0x1e1   : > { %2774 = vrsqrt.f32 %v1008_v24  ;;  %v945_v35 = vmul.f32 %v3267_v31, %v3267_v31  ;;  %v929_v44 = vmul.f32 %v889_v15, %v3240_v52  ;;  %vm1040_vm10 = vmor %vm1038_vm9, %vm1039_vm8  ;;  %vm1048_vm12 = vweird.f32 %v1008_v24 }
 0x1e2   : > { %v1034_v46 = vmul.f32 %v2773_v39, %v1033_v43  ;;  %v1031_v49 = vsel %vm1030_vm7, %v2771_v18, %v1027_v42 }
 0x1e3   : > { %v961_v47 = vsub.f32 %v929_v44, %v945_v35  ;;  %v1182_v63 = vmul.f32 %v1031_v49, %v990_v53  ;;  %v992_v44 = vsub.f32 %v3122_v58, %v3261_v20  ;;  %v993_v20 = vsub.f32 %v3131_v2, %v3267_v31 }
 0x1e4   : > { %v1035_v51 = vmul.f32 0.5, %v1034_v46 }
 0x1e5   : > { %v977_v37 = vmax.f32 %v961_v47, 0.0  ;;  %v1199_v12 = vmul.f32 %v3279_v62, %v1182_v63 }
 0x1e6   : > { %v805_v54 = vpop.xlane.xlu2 %804  ;;  %v1036_v60 = vsub.f32 1.5, %v1035_v51 }
 0x1e7   : > { %v2775_v55 = vpop.eup %2774  ;;  %v3274_v61 = vmul.f32 %v3240_v52, %v805_v54  ;;  %v1009_v3 = vadd.f32 1e-05, %v977_v37  ;;  %v3299_v27 = vadd.f32 %v3289_v9, %v1199_v12 }
 0x1e8   : > { %v1043_v0 = vmul.f32 %v2775_v55, %v1008_v24  ;;  %v892_v38 = vpop.xlane.xlu1 %891  ;;  %v1037_v34 = vmul.f32 %v2773_v39, %v1036_v60  ;;  %vm1049_vm11 = vweird.f32 %v2775_v55 }
 0x1e9   : > { %v946_v41 = vmul.f32 %v3274_v61, %v3274_v61  ;;  %v930_v57 = vmul.f32 %v892_v38, %v3240_v52  ;;  %2776 = vrsqrt.f32 %v1009_v3  ;;  %vm1050_vm13 = vmor %vm1048_vm12, %vm1049_vm11  ;;  %vm1058_vm15 = vweird.f32 %v1009_v3 }
 0x1ea   : > { %v1044_v4 = vmul.f32 %v2775_v55, %v1043_v0  ;;  %v1041_v6 = vsel %vm1040_vm10, %v2773_v39, %v1037_v34 }
 0x1eb   : > { %v962_v8 = vsub.f32 %v930_v57, %v946_v41  ;;  %v1183_v14 = vmul.f32 %v1041_v6, %v991_v7 }
 0x1ec   : > { %v1045_v17 = vmul.f32 0.5, %v1044_v4 }
 0x1ed   : > { %v978_v18 = vmax.f32 %v962_v8, 0.0  ;;  %v1200_v21 = vmul.f32 %v3279_v62, %v1183_v14 }
 0x1ee   : > { %v1046_v23 = vsub.f32 1.5, %v1045_v17  ;;  %v808_v10 = vpop.xlane.xlu0 %807 }
 0x1ef   : > { %v3293_v50 = vadd.f32 1e-05, %v978_v18  ;;  %v3296_v5 = vmul.f32 %v3240_v52, %v808_v10  ;;  %v2777_v26 = vpop.eup %2776  ;;  %v3302_v28 = vadd.f32 %v3289_v9, %v1200_v21 }
 0x1f0   : > { %v895_v29 = vpop.xlane.xlu2 %894  ;;  %v1047_v16 = vmul.f32 %v2775_v55, %v1046_v23  ;;  %v1053_v32 = vmul.f32 %v2777_v26, %v1009_v3  ;;  %vm1059_vm14 = vweird.f32 %v2777_v26 }
 0x1f1   : > { %2778 = vrsqrt.f32 %v3293_v50  ;;  %v947_v19 = vmul.f32 %v3296_v5, %v3296_v5  ;;  %v931_v33 = vmul.f32 %v895_v29, %v3240_v52  ;;  %v1242_v39 = vpack.c.bf16 %v3302_v28, %v3299_v27  ;;  %vm1060_vm0 = vmor %vm1058_vm15, %vm1059_vm14 }
 0x1f2   : > { %v1054_v15 = vmul.f32 %v2777_v26, %v1053_v32  ;;  %v1051_v35 = vsel %vm1050_vm13, %v2775_v55, %v1047_v16  ;;  %vm1068_vm4 = vweird.f32 %v3293_v50 }
 0x1f3   : > { %v963_v42 = vsub.f32 %v931_v33, %v947_v19  ;;  %2677 = vmatmul.msk.bf16.vlgmr.msrb.gmra.mxu2 %vm790_vm3, %v1242_v39  ;;  %v1184_v60 = vmul.f32 %v1051_v35, %v992_v44  ;;  %v994_v39 = vsub.f32 %v3140_v11, %v3274_v61  ;;  %v2737_v61 = vld [vmem:[%s4280_s8 + $0x8] sm:$0xff] }
 0x1f4   : > { %v1055_v43 = vmul.f32 0.5, %v1054_v15  ;;  %1399 = vmatpush.bf16.msrb.mxu3 %v2737_v61 }
 0x1f5   : > { %v979_v46 = vmax.f32 %v963_v42, 0.0  ;;  %v1201_v7 = vmul.f32 %v3279_v62, %v1184_v60 }
 0x1f6   : > { %v811_v47 = vpop.xlane.xlu0 %810  ;;  %v1056_v51 = vsub.f32 1.5, %v1055_v43 }
 0x1f7   : > { %v2779_v49 = vpop.eup %2778  ;;  %v3314_v53 = vmul.f32 %v3240_v52, %v811_v47  ;;  %v1011_v37 = vadd.f32 1e-05, %v979_v46  ;;  %v3330_v17 = vadd.f32 %v3289_v9, %v1201_v7 }
 0x1f8   : > { %v1063_v24 = vmul.f32 %v2779_v49, %v3293_v50  ;;  %v898_v54 = vpop.xlane.xlu2 %897  ;;  %v1057_v63 = vmul.f32 %v2777_v26, %v1056_v51  ;;  %vm1069_vm1 = vweird.f32 %v2779_v49 }
 0x1f9   : > { %v948_v55 = vmul.f32 %v3314_v53, %v3314_v53  ;;  %v932_v58 = vmul.f32 %v898_v54, %v3240_v52  ;;  %2780 = vrsqrt.f32 %v1011_v37  ;;  %vm1070_vm5 = vmor %vm1068_vm4, %vm1069_vm1  ;;  %vm1078_vm7 = vweird.f32 %v1011_v37 }
 0x1fa   : > { %v1064_v0 = vmul.f32 %v2779_v49, %v1063_v24  ;;  %v1061_v34 = vsel %vm1060_vm0, %v2777_v26, %v1057_v63  ;;  %v995_v54 = vsub.f32 %v3149_v22, %v3296_v5 }
 0x1fb   : > { %v964_v38 = vsub.f32 %v932_v58, %v948_v55  ;;  %v1185_v57 = vmul.f32 %v1061_v34, %v993_v20 }
 0x1fc   : > { %v1065_v41 = vmul.f32 0.5, %v1064_v0 }
 0x1fd   : > { %v980_v4 = vmax.f32 %v964_v38, 0.0  ;;  %v1202_v8 = vmul.f32 %v3279_v62, %v1185_v57 }
 0x1fe   : > { %v1066_v6 = vsub.f32 1.5, %v1065_v41  ;;  %v814_v3 = vpop.xlane.xlu1 %813 }
 0x1ff   : > { %v3324_v12 = vadd.f32 1e-05, %v980_v4  ;;  %v3327_v14 = vmul.f32 %v3240_v52, %v814_v3  ;;  %v2781_v2 = vpop.eup %2780  ;;  %v3333_v18 = vadd.f32 %v3289_v9, %v1202_v8 }
 0x200   : > { %v901_v31 = vpop.xlane.xlu0 %900  ;;  %v1067_v21 = vmul.f32 %v2779_v49, %v1066_v6  ;;  %v1073_v23 = vmul.f32 %v2781_v2, %v1011_v37  ;;  %vm1079_vm6 = vweird.f32 %v2781_v2 }
 0x201   : > { %2782 = vrsqrt.f32 %v3324_v12  ;;  %v949_v10 = vmul.f32 %v3327_v14, %v3327_v14  ;;  %v933_v26 = vmul.f32 %v901_v31, %v3240_v52  ;;  %v1243_v29 = vpack.c.bf16 %v3333_v18, %v3330_v17  ;;  %vm1080_vm8 = vmor %vm1078_vm7, %vm1079_vm6 }
 0x202   : > { %v1074_v16 = vmul.f32 %v2781_v2, %v1073_v23  ;;  %v1071_v33 = vsel %vm1070_vm5, %v2779_v49, %v1067_v21  ;;  %vm1088_vm10 = vweird.f32 %v3324_v12 }
 0x203   : > { %v965_v32 = vsub.f32 %v933_v26, %v949_v10  ;;  %2678 = vmatmul.msk.bf16.vlgmr.msra.gmra.mxu3 %vm790_vm3, %v1243_v29  ;;  %v1186_v51 = vmul.f32 %v1071_v33, %v994_v39 }
 0x204   : > { %v1075_v19 = vmul.f32 0.5, %v1074_v16  ;;  %v996_v16 = vsub.f32 %v3158_v30, %v3314_v53  ;;  %v997_v53 = vsub.f32 %v3167_v40, %v3327_v14 }
 0x205   : > { %v981_v15 = vmax.f32 %v965_v32, 0.0  ;;  %v1203_v20 = vmul.f32 %v3279_v62, %v1186_v51 }
 0x206   : > { %v817_v42 = vpop.xlane.xlu1 %816  ;;  %v1076_v35 = vsub.f32 1.5, %v1075_v19 }
 0x207   : > { %v2783_v43 = vpop.eup %2782  ;;  %v3346_v44 = vmul.f32 %v3240_v52, %v817_v42  ;;  %v1013_v46 = vadd.f32 1e-05, %v981_v15  ;;  %v3365_v4 = vadd.f32 %v3289_v9, %v1203_v20 }
 0x208   : > { %v1083_v50 = vmul.f32 %v2783_v43, %v3324_v12  ;;  %v904_v47 = vpop.xlane.xlu0 %903  ;;  %v1077_v24 = vmul.f32 %v2781_v2, %v1076_v35  ;;  %vm1089_vm9 = vweird.f32 %v2783_v43 }
 0x209   : > { %v950_v49 = vmul.f32 %v3346_v44, %v3346_v44  ;;  %v934_v11 = vmul.f32 %v904_v47, %v3240_v52  ;;  %2784 = vrsqrt.f32 %v1013_v46  ;;  %vm1090_vm11 = vmor %vm1088_vm10, %vm1089_vm9  ;;  %vm1098_vm13 = vweird.f32 %v1013_v46 }
 0x20a   : > { %v1084_v60 = vmul.f32 %v2783_v43, %v1083_v50  ;;  %v1081_v55 = vsel %vm1080_vm8, %v2781_v2, %v1077_v24 }
 0x20b   : > { %v966_v63 = vsub.f32 %v934_v11, %v950_v49  ;;  %v1187_v37 = vmul.f32 %v1081_v55, %v995_v54 }
 0x20c   : > { %v1085_v58 = vmul.f32 0.5, %v1084_v60 }
 0x20d   : > { %v982_v0 = vmax.f32 %v966_v63, 0.0  ;;  %v1204_v41 = vmul.f32 %v3279_v62, %v1187_v37 }
 0x20e   : > { %v1086_v38 = vsub.f32 1.5, %v1085_v58  ;;  %v820_v34 = vpop.xlane.xlu2 %819 }
 0x20f   : > { %v3359_v57 = vadd.f32 1e-05, %v982_v0  ;;  %v3362_v7 = vmul.f32 %v3240_v52, %v820_v34  ;;  %v2785_v22 = vpop.eup %2784  ;;  %v3368_v6 = vadd.f32 %v3289_v9, %v1204_v41 }
 0x210   : > { %v907_v5 = vpop.xlane.xlu1 %906  ;;  %v1087_v3 = vmul.f32 %v2783_v43, %v1086_v38  ;;  %v1093_v8 = vmul.f32 %v2785_v22, %v1013_v46  ;;  %vm1099_vm12 = vweird.f32 %v2785_v22 }
 0x211   : > { %2786 = vrsqrt.f32 %v3359_v57  ;;  %v951_v2 = vmul.f32 %v3362_v7, %v3362_v7  ;;  %v935_v31 = vmul.f32 %v907_v5, %v3240_v52  ;;  %v1244_v21 = vpack.c.bf16 %v3368_v6, %v3365_v4  ;;  %vm1100_vm14 = vmor %vm1098_vm13, %vm1099_vm12 }
 0x212   : > { %v1094_v23 = vmul.f32 %v2785_v22, %v1093_v8  ;;  %v1091_v29 = vsel %vm1090_vm11, %v2783_v43, %v1087_v3  ;;  %vm1108_vm0 = vweird.f32 %v3359_v57 }
 0x213   : > { %v967_v10 = vsub.f32 %v935_v31, %v951_v2  ;;  %2679 = vmatmul.msk.bf16.gmra.mxu3 %vm790_vm3, %v1244_v21  ;;  %v1188_v50 = vmul.f32 %v1091_v29, %v996_v16  ;;  %v998_v21 = vsub.f32 %v3176_v48, %v3346_v44  ;;  %v999_v44 = vsub.f32 %v3185_v56, %v3362_v7 }
 0x214   : > { %v1095_v26 = vmul.f32 0.5, %v1094_v23 }
 0x215   : > { %v983_v32 = vmax.f32 %v967_v10, 0.0  ;;  %v1205_v54 = vmul.f32 %v3279_v62, %v1188_v50 }
 0x216   : > { %v823_v19 = vpop.xlane.xlu2 %822  ;;  %v1096_v39 = vsub.f32 1.5, %v1095_v26 }
 0x217   : > { %v2787_v33 = vpop.eup %2786  ;;  %v3381_v15 = vmul.f32 %v3240_v52, %v823_v19  ;;  %v1015_v42 = vadd.f32 1e-05, %v983_v32  ;;  %v3397_v20 = vadd.f32 %v3289_v9, %v1205_v54 }
 0x218   : > { %v1103_v12 = vmul.f32 %v2787_v33, %v3359_v57  ;;  %v910_v35 = vpop.xlane.xlu1 %909  ;;  %v1097_v47 = vmul.f32 %v2785_v22, %v1096_v39  ;;  %vm1109_vm15 = vweird.f32 %v2787_v33 }
 0x219   : > { %v952_v43 = vmul.f32 %v3381_v15, %v3381_v15  ;;  %v936_v30 = vmul.f32 %v910_v35, %v3240_v52  ;;  %2788 = vrsqrt.f32 %v1015_v42  ;;  %vm1110_vm1 = vmor %vm1108_vm0, %vm1109_vm15  ;;  %vm1118_vm5 = vweird.f32 %v1015_v42 }
 0x21a   : > { %v1104_v51 = vmul.f32 %v2787_v33, %v1103_v12  ;;  %v1101_v49 = vsel %vm1100_vm14, %v2785_v22, %v1097_v47 }
 0x21b   : > { %v968_v24 = vsub.f32 %v936_v30, %v952_v43  ;;  %v1189_v61 = vmul.f32 %v1101_v49, %v997_v53 }
 0x21c   : > { %v1105_v11 = vmul.f32 0.5, %v1104_v51 }
 0x21d   : > { %v984_v60 = vmax.f32 %v968_v24, 0.0  ;;  %v1206_v55 = vmul.f32 %v3279_v62, %v1189_v61 }
 0x21e   : > { %v1106_v63 = vsub.f32 1.5, %v1105_v11  ;;  %v826_v46 = vpop.xlane.xlu0 %825 }
 0x21f   : > { %v3391_v58 = vadd.f32 1e-05, %v984_v60  ;;  %v3394_v37 = vmul.f32 %v3240_v52, %v826_v46  ;;  %v2789_v40 = vpop.eup %2788  ;;  %v3400_v0 = vadd.f32 %v3289_v9, %v1206_v55 }
 0x220   : > { %v913_v14 = vpop.xlane.xlu2 %912  ;;  %v1107_v38 = vmul.f32 %v2787_v33, %v1106_v63  ;;  %v1113_v34 = vmul.f32 %v2789_v40, %v1015_v42  ;;  %vm1119_vm4 = vweird.f32 %v2789_v40 }
 0x221   : > { %2790 = vrsqrt.f32 %v3391_v58  ;;  %v953_v41 = vmul.f32 %v3394_v37, %v3394_v37  ;;  %v937_v22 = vmul.f32 %v913_v14, %v3240_v52  ;;  %v1245_v5 = vpack.c.bf16 %v3400_v0, %v3397_v20  ;;  %vm1120_vm6 = vmor %vm1118_vm5, %vm1119_vm4 }
 0x222   : > { %v1114_v3 = vmul.f32 %v2789_v40, %v1113_v34  ;;  %v1111_v31 = vsel %vm1110_vm1, %v2787_v33, %v1107_v38  ;;  %vm1128_vm8 = vweird.f32 %v3391_v58 }
 0x223   : > { %v969_v8 = vsub.f32 %v937_v22, %v953_v41  ;;  %2680 = vmatmul.msk.bf16.gmra.mxu3 %vm790_vm3, %v1245_v5  ;;  %v1190_v39 = vmul.f32 %v1111_v31, %v998_v21  ;;  %v1000_v5 = vsub.f32 %v3194_v1, %v3381_v15  ;;  %v2736_v15 = vld [vmem:[%s4280_s8] sm:$0xff] }
 0x224   : > { %v1115_v2 = vmul.f32 0.5, %v1114_v3  ;;  %1400 = vmatpush.bf16.msrb.mxu3 %v2736_v15 }
 0x225   : > { %v985_v23 = vmax.f32 %v969_v8, 0.0  ;;  %v1207_v53 = vmul.f32 %v3279_v62, %v1190_v39 }
 0x226   : > { %v829_v10 = vpop.xlane.xlu0 %828  ;;  %v1116_v29 = vsub.f32 1.5, %v1115_v2 }
 0x227   : > { %v2791_v26 = vpop.eup %2790  ;;  %v3413_v16 = vmul.f32 %v3240_v52, %v829_v10  ;;  %v1017_v32 = vadd.f32 1e-05, %v985_v23  ;;  %v3429_v54 = vadd.f32 %v3289_v9, %v1207_v53 }
 0x228   : > { %v1123_v57 = vmul.f32 %v2791_v26, %v3391_v58  ;;  %v916_v19 = vpop.xlane.xlu2 %915  ;;  %v1117_v12 = vmul.f32 %v2789_v40, %v1116_v29  ;;  %vm1129_vm7 = vweird.f32 %v2791_v26 }
 0x229   : > { %v954_v33 = vmul.f32 %v3413_v16, %v3413_v16  ;;  %v938_v48 = vmul.f32 %v916_v19, %v3240_v52  ;;  %2792 = vrsqrt.f32 %v1017_v32  ;;  %vm1130_vm9 = vmor %vm1128_vm8, %vm1129_vm7  ;;  %vm1138_vm11 = vweird.f32 %v1017_v32 }
 0x22a   : > { %v1124_v35 = vmul.f32 %v2791_v26, %v1123_v57  ;;  %v1121_v47 = vsel %vm1120_vm6, %v2789_v40, %v1117_v12  ;;  %v1001_v19 = vsub.f32 %v3203_v13, %v3394_v37 }
 0x22b   : > { %v970_v50 = vsub.f32 %v938_v48, %v954_v33  ;;  %v1191_v30 = vmul.f32 %v1121_v47, %v999_v44 }
 0x22c   : > { %v1125_v43 = vmul.f32 0.5, %v1124_v35 }
 0x22d   : > { %v986_v51 = vmax.f32 %v970_v50, 0.0  ;;  %v1208_v49 = vmul.f32 %v3279_v62, %v1191_v30 }
 0x22e   : > { %v1126_v24 = vsub.f32 1.5, %v1125_v43  ;;  %v832_v42 = vpop.xlane.xlu1 %831 }
 0x22f   : > { %v3423_v11 = vadd.f32 1e-05, %v986_v51  ;;  %v3426_v61 = vmul.f32 %v3240_v52, %v832_v42  ;;  %v2793_v56 = vpop.eup %2792  ;;  %v3432_v60 = vadd.f32 %v3289_v9, %v1208_v49 }
 0x230   : > { %v919_v7 = vpop.xlane.xlu0 %918  ;;  %v1127_v63 = vmul.f32 %v2791_v26, %v1126_v24  ;;  %v1133_v46 = vmul.f32 %v2793_v56, %v1017_v32  ;;  %vm1139_vm10 = vweird.f32 %v2793_v56 }
 0x231   : > { %2794 = vrsqrt.f32 %v3423_v11  ;;  %v955_v55 = vmul.f32 %v3426_v61, %v3426_v61  ;;  %v939_v40 = vmul.f32 %v919_v7, %v3240_v52  ;;  %v1246_v14 = vpack.c.bf16 %v3432_v60, %v3429_v54  ;;  %vm1140_vm12 = vmor %vm1138_vm11, %vm1139_vm10 }
 0x232   : > { %v1134_v38 = vmul.f32 %v2793_v56, %v1133_v46  ;;  %v1131_v22 = vsel %vm1130_vm9, %v2791_v26, %v1127_v63  ;;  %vm1148_vm14 = vweird.f32 %v3423_v11 }
 0x233   : > { %v971_v34 = vsub.f32 %v939_v40, %v955_v55  ;;  %2681 = vmatmul.msk.bf16.gmra.mxu3 %vm790_vm3, %v1246_v14  ;;  %v1192_v29 = vmul.f32 %v1131_v22, %v1000_v5 }
 0x234   : > { %v1135_v41 = vmul.f32 0.5, %v1134_v38  ;;  %v1002_v38 = vsub.f32 %v3213_v25, %v3413_v16 }
 0x235   : > { %v987_v3 = vmax.f32 %v971_v34, 0.0  ;;  %v1209_v44 = vmul.f32 %v3279_v62, %v1192_v29 }
 0x236   : > { %v835_v8 = vpop.xlane.xlu1 %834  ;;  %v1136_v31 = vsub.f32 1.5, %v1135_v41 }
 0x237   : > { %v2795_v2 = vpop.eup %2794  ;;  %v3445_v21 = vmul.f32 %v3240_v52, %v835_v8  ;;  %v1019_v23 = vadd.f32 1e-05, %v987_v3  ;;  %v3460_v37 = vadd.f32 %v3289_v9, %v1209_v44 }
 0x238   : > { %v1143_v58 = vmul.f32 %v2795_v2, %v3423_v11  ;;  %v922_v10 = vpop.xlane.xlu0 %921  ;;  %v1137_v57 = vmul.f32 %v2793_v56, %v1136_v31  ;;  %vm1149_vm13 = vweird.f32 %v2795_v2  ;;  %v1003_v11 = vsub.f32 %v3223_v36, %v3426_v61 }
 0x239   : > { %v956_v26 = vmul.f32 %v3445_v21, %v3445_v21  ;;  %v940_v1 = vmul.f32 %v922_v10, %v3240_v52  ;;  %2796 = vrsqrt.f32 %v1019_v23  ;;  %vm1150_vm15 = vmor %vm1148_vm14, %vm1149_vm13  ;;  %vm1158_vm1 = vweird.f32 %v1019_v23 }
 0x23a   : > { %v1144_v39 = vmul.f32 %v2795_v2, %v1143_v58  ;;  %v1141_v33 = vsel %vm1140_vm12, %v2793_v56, %v1137_v57 }
 0x23b   : > { %v972_v12 = vsub.f32 %v940_v1, %v956_v26  ;;  %v1193_v32 = vmul.f32 %v1141_v33, %v1001_v19  ;;  %v1004_v33 = vsub.f32 %v3233_v45, %v3445_v21 }
 0x23c   : > { %v1145_v48 = vmul.f32 0.5, %v1144_v39 }
 0x23d   : > { %v988_v35 = vmax.f32 %v972_v12, 0.0  ;;  %v1210_v43 = vmul.f32 %v3279_v62, %v1193_v32 }
 0x23e   : > { %v1146_v50 = vsub.f32 1.5, %v1145_v48  ;;  %v838_v47 = vpop.xlane.xlu2 %837 }
 0x23f   : > { %v1020_v30 = vadd.f32 1e-05, %v988_v35  ;;  %v861_v53 = vmul.f32 %v3240_v52, %v838_v47  ;;  %v2797_v51 = vpop.eup %2796  ;;  %v3463_v24 = vadd.f32 %v3289_v9, %v1210_v43 }
 0x240   : > { %v925_v13 = vpop.xlane.xlu1 %924  ;;  %v1147_v42 = vmul.f32 %v2795_v2, %v1146_v50  ;;  %v1153_v49 = vmul.f32 %v2797_v51, %v1019_v23  ;;  %vm1159_vm0 = vweird.f32 %v2797_v51 }
 0x241   : > { %2798 = vrsqrt.f32 %v1020_v30  ;;  %v957_v56 = vmul.f32 %v861_v53, %v861_v53  ;;  %v941_v7 = vmul.f32 %v925_v13, %v3240_v52  ;;  %v1247_v63 = vpack.c.bf16 %v3463_v24, %v3460_v37  ;;  %vm1160_vm4 = vmor %vm1158_vm1, %vm1159_vm0 }
 0x242   : > { %v1154_v46 = vmul.f32 %v2797_v51, %v1153_v49  ;;  %v1151_v14 = vsel %vm1150_vm15, %v2795_v2, %v1147_v42  ;;  %vm1168_vm6 = vweird.f32 %v1020_v30  ;;  %v1005_v35 = vsub.f32 %v3246_v59, %v861_v53  ;;  %v2760_v59 = vld [vmem:[%s4279_s7] ss:$0 sm:$0xff] }
 0x243   : > { %v973_v55 = vsub.f32 %v941_v7, %v957_v56  ;;  %2682 = vmatmul.msk.bf16.gmra.mxu3 %vm790_vm3, %v1247_v63  ;;  %v1194_v8 = vmul.f32 %v1151_v14, %v1002_v38 }
 0x244   : > { %v1155_v40 = vmul.f32 0.5, %v1154_v46 }
 0x245   : > { %v989_v34 = vmax.f32 %v973_v55, 0.0  ;;  %v1211_v25 = vmul.f32 %v3279_v62, %v1194_v8 }
 0x246   : > { %v1156_v22 = vsub.f32 1.5, %v1155_v40 }
 0x247   : > { %v2799_v41 = vpop.eup %2798  ;;  %v1021_v3 = vadd.f32 1e-05, %v989_v34  ;;  %v3477_v1 = vadd.f32 %v3289_v9, %v1211_v25 }
 0x248   : > { %v1163_v5 = vmul.f32 %v2799_v41, %v1020_v30  ;;  %v1157_v31 = vmul.f32 %v2797_v51, %v1156_v22  ;;  %vm1169_vm5 = vweird.f32 %v2799_v41 }
 0x249   : > { %2800 = vrsqrt.f32 %v1021_v3  ;;  %vm1170_vm7 = vmor %vm1168_vm6, %vm1169_vm5  ;;  %vm1178_vm9 = vweird.f32 %v1021_v3 }
 0x24a   : > { %v1164_v58 = vmul.f32 %v2799_v41, %v1163_v5  ;;  %v1161_v10 = vsel %vm1160_vm4, %v2797_v51, %v1157_v31 }
 0x24b   : > { %v1195_v29 = vmul.f32 %v1161_v10, %v1003_v11 }
 0x24c   : > { %v1165_v2 = vmul.f32 0.5, %v1164_v58 }
 0x24d   : > { %v1212_v57 = vmul.f32 %v3279_v62, %v1195_v29 }
 0x24e   : > { %v1166_v16 = vsub.f32 1.5, %v1165_v2 }
 0x24f   : > { %v2801_v26 = vpop.eup %2800  ;;  %v3480_v23 = vadd.f32 %v3289_v9, %v1212_v57 }
 0x250   : > { %v1167_v15 = vmul.f32 %v2799_v41, %v1166_v16  ;;  %v1173_v36 = vmul.f32 %v2801_v26, %v1021_v3  ;;  %vm1179_vm8 = vweird.f32 %v2801_v26 }
 0x251   : > { %v1248_v61 = vpack.c.bf16 %v3480_v23, %v3477_v1  ;;  %vm1180_vm10 = vmor %vm1178_vm9, %vm1179_vm8 }
 0x252   : > { %v1174_v19 = vmul.f32 %v2801_v26, %v1173_v36  ;;  %v1171_v12 = vsel %vm1170_vm7, %v2799_v41, %v1167_v15 }
 0x253   : > { %2683 = vmatmul.msk.bf16.gmra.mxu3 %vm790_vm3, %v1248_v61  ;;  %v1196_v32 = vmul.f32 %v1171_v12, %v1004_v33 }
 0x254   : > { %v1175_v39 = vmul.f32 0.5, %v1174_v19 }
 0x255   : > { %v1213_v43 = vmul.f32 %v3279_v62, %v1196_v32 }
 0x256   : > { %v1176_v48 = vsub.f32 1.5, %v1175_v39 }
 0x257   : > { %v3491_v51 = vadd.f32 %v3289_v9, %v1213_v43 }
 0x258   : > { %v1177_v44 = vmul.f32 %v2801_v26, %v1176_v48 }
 0x25a   : > { %v1181_v50 = vsel %vm1180_vm10, %v2801_v26, %v1177_v44 }
 0x25b   : > { %v1197_v47 = vmul.f32 %v1181_v50, %v1005_v35 }
 0x25d   : > { %v1214_v30 = vmul.f32 %v3279_v62, %v1197_v47 }
 0x25f   : > { %v3494_v13 = vadd.f32 %v3289_v9, %v1214_v30 }
 0x261   : > { %v1249_v45 = vpack.c.bf16 %v3494_v13, %v3491_v51 }
 0x263   : > { %2684 = vmatmul.msk.bf16.gmra.mxu3 %vm790_vm3, %v1249_v45 }
 0x276   : > { %v1292_v21 = vpop.f32.mrf.mxu2 }
 0x277   : > { %v1293_v53 = vadd.f32 %v2760_v59, %v1292_v21 }
 0x279   : > { %v1332_v62 = vmax.f32 %v1293_v53, 0.0 }
 0x27e   : > { %v1294_v42 = vpop.f32.mrf.mxu2 }
 0x27f   : > { %v1295_v49 = vadd.f32 %v2760_v59, %v1294_v42 }
 0x281   : > { %v1333_v56 = vmax.f32 %v1295_v49, 0.0 }
 0x283   : > { %v1348_v7 = vpack.c.bf16 %v1333_v56, %v1332_v62 }
 0x285   : > { %2693 = vmatmul.msk.bf16.vlgmr.msrb.gmra.mxu3 %vm637_vm2, %v1348_v7 }
 0x286   : > { %v1297_v9 = vpop.f32.mrf.mxu3 }
 0x287   : > { %v1298_v63 = vadd.f32 %v2760_v59, %v1297_v9 }
 0x289   : > { %v1334_v40 = vmax.f32 %v1298_v63, 0.0 }
 0x28e   : > { %v1299_v46 = vpop.f32.mrf.mxu3 }
 0x28f   : > { %v1300_v55 = vadd.f32 %v2760_v59, %v1299_v46 }
 0x291   : > { %v1335_v14 = vmax.f32 %v1300_v55, 0.0  ;;  %v3513_v55 = vld [vmem:[%s4281_s9] ss:$0 sm:$0xff] }
 0x293   : > { %v1349_v38 = vpack.c.bf16 %v1335_v14, %v1334_v40 }
 0x295   : > { %2694 = vmatmul.msk.bf16.gmra.mxu3 %vm637_vm2, %v1349_v38 }
 0x296   : > { %v1302_v34 = vpop.f32.mrf.mxu3 }
 0x297   : > { %v1303_v41 = vadd.f32 %v2760_v59, %v1302_v34 }
 0x299   : > { %v1336_v3 = vmax.f32 %v1303_v41, 0.0 }
 0x29e   : > { %v1304_v22 = vpop.f32.mrf.mxu3 }
 0x29f   : > { %v1305_v5 = vadd.f32 %v2760_v59, %v1304_v22 }
 0x2a1   : > { %v1337_v8 = vmax.f32 %v1305_v5, 0.0 }
 0x2a3   : > { %v1350_v31 = vpack.c.bf16 %v1337_v8, %v1336_v3 }
 0x2a5   : > { %2695 = vmatmul.msk.bf16.gmra.mxu3 %vm637_vm2, %v1350_v31 }
 0x2a6   : > { %v1307_v11 = vpop.f32.mrf.mxu3 }
 0x2a7   : > { %v1308_v58 = vadd.f32 %v2760_v59, %v1307_v11 }
 0x2a9   : > { %v1338_v29 = vmax.f32 %v1308_v58, 0.0 }
 0x2ae   : > { %v1309_v10 = vpop.f32.mrf.mxu3 }
 0x2af   : > { %v1310_v2 = vadd.f32 %v2760_v59, %v1309_v10 }
 0x2b1   : > { %v1339_v25 = vmax.f32 %v1310_v2, 0.0 }
 0x2b3   : > { %v1351_v16 = vpack.c.bf16 %v1339_v25, %v1338_v29 }
 0x2b5   : > { %2696 = vmatmul.msk.bf16.gmra.mxu3 %vm637_vm2, %v1351_v16 }
 0x2b6   : > { %v1312_v57 = vpop.f32.mrf.mxu3 }
 0x2b7   : > { %v1313_v26 = vadd.f32 %v2760_v59, %v1312_v57 }
 0x2b9   : > { %v1340_v61 = vmax.f32 %v1313_v26, 0.0 }
 0x2be   : > { %v1314_v15 = vpop.f32.mrf.mxu3 }
 0x2bf   : > { %v1315_v36 = vadd.f32 %v2760_v59, %v1314_v15 }
 0x2c1   : > { %v1341_v19 = vmax.f32 %v1315_v36, 0.0 }
 0x2c3   : > { %v1352_v39 = vpack.c.bf16 %v1341_v19, %v1340_v61 }
 0x2c5   : > { %2697 = vmatmul.msk.bf16.gmra.mxu3 %vm637_vm2, %v1352_v39 }
 0x2c6   : > { %v1317_v12 = vpop.f32.mrf.mxu3 }
 0x2c7   : > { %v1318_v33 = vadd.f32 %v2760_v59, %v1317_v12 }
 0x2c9   : > { %v1342_v44 = vmax.f32 %v1318_v33, 0.0 }
 0x2ce   : > { %v1319_v48 = vpop.f32.mrf.mxu3 }
 0x2cf   : > { %v1320_v32 = vadd.f32 %v2760_v59, %v1319_v48 }
 0x2d1   : > { %v1343_v35 = vmax.f32 %v1320_v32, 0.0 }
 0x2d3   : > { %v1353_v50 = vpack.c.bf16 %v1343_v35, %v1342_v44 }
 0x2d5   : > { %2698 = vmatmul.msk.bf16.gmra.mxu3 %vm637_vm2, %v1353_v50 }
 0x2d6   : > { %v1322_v47 = vpop.f32.mrf.mxu3 }
 0x2d7   : > { %v1323_v43 = vadd.f32 %v2760_v59, %v1322_v47 }
 0x2d9   : > { %v1344_v21 = vmax.f32 %v1323_v43, 0.0 }
 0x2de   : > { %v1324_v30 = vpop.f32.mrf.mxu3 }
 0x2df   : > { %v1325_v45 = vadd.f32 %v2760_v59, %v1324_v30 }
 0x2e1   : > { %v1345_v53 = vmax.f32 %v1325_v45, 0.0 }
 0x2e3   : > { %v1354_v42 = vpack.c.bf16 %v1345_v53, %v1344_v21 }
 0x2e5   : > { %2699 = vmatmul.msk.bf16.gmra.mxu3 %vm637_vm2, %v1354_v42 }
 0x2e6   : > { %v1327_v49 = vpop.f32.mrf.mxu3 }
 0x2e7   : > { %v1328_v62 = vadd.f32 %v2760_v59, %v1327_v49 }
 0x2e9   : > { %v1346_v9 = vmax.f32 %v1328_v62, 0.0 }
 0x2ee   : > { %v1329_v56 = vpop.f32.mrf.mxu3 }
 0x2ef   : > { %v1330_v7 = vadd.f32 %v2760_v59, %v1329_v56 }
 0x2f1   : > { %v1347_v63 = vmax.f32 %v1330_v7, 0.0 }
 0x2f3   : > { %v1355_v46 = vpack.c.bf16 %v1347_v63, %v1346_v9 }
 0x2f5   : > { %2700 = vmatmul.msk.bf16.gmra.mxu3 %vm637_vm2, %v1355_v46 }
 0x308   : > { %v1402_v40 = vpop.f32.mrf.mxu3 }
 0x309   : > { %v1403_v14 = vadd.f32 %v3513_v55, %v1402_v40 }
 0x30b   : > { %v3517_v38 = vadd.f32 %v1403_v14, %v3299_v27 }
 0x30d   : > { %v1458_v34 = vsel %vm790_vm3, %v3517_v38, 0.0  ;;  %v1522_v59 = vmul.f32 %v3517_v38, %v3517_v38 }
 0x30e   : > { %1459 = vadd.xlane.f32.xlu2 %v1458_v34 }
 0x30f   : > { %v1538_v41 = vsel %vm790_vm3, %v1522_v59, 0.0 }
 0x310   : > { %v1404_v22 = vpop.f32.mrf.mxu3  ;;  %1539 = vadd.xlane.f32.xlu1 %v1538_v41 }
 0x311   : > { %v1405_v5 = vadd.f32 %v3513_v55, %v1404_v22 }
 0x313   : > { %v3526_v3 = vadd.f32 %v1405_v5, %v3302_v28 }
 0x315   : > { %v1461_v27 = vsel %vm790_vm3, %v3526_v3, 0.0  ;;  %v1523_v8 = vmul.f32 %v3526_v3, %v3526_v3 }
 0x316   : > { %1462 = vadd.xlane.f32.xlu0 %v1461_v27 }
 0x317   : > { %v1541_v31 = vsel %vm790_vm3, %v1523_v8, 0.0 }
 0x318   : > { %v1407_v11 = vpop.f32.mrf.mxu3  ;;  %1542 = vadd.xlane.f32.xlu2 %v1541_v31 }
 0x319   : > { %v1408_v58 = vadd.f32 %v3513_v55, %v1407_v11 }
 0x31b   : > { %v3535_v10 = vadd.f32 %v1408_v58, %v3330_v17 }
 0x31d   : > { %v1464_v28 = vsel %vm790_vm3, %v3535_v10, 0.0  ;;  %v1524_v2 = vmul.f32 %v3535_v10, %v3535_v10 }
 0x31e   : > { %1465 = vadd.xlane.f32.xlu0 %v1464_v28 }
 0x31f   : > { %v1544_v29 = vsel %vm790_vm3, %v1524_v2, 0.0 }
 0x320   : > { %v1409_v25 = vpop.f32.mrf.mxu3  ;;  %1545 = vadd.xlane.f32.xlu2 %v1544_v29 }
 0x321   : > { %v1410_v16 = vadd.f32 %v3513_v55, %v1409_v25 }
 0x323   : > { %v3544_v57 = vadd.f32 %v1410_v16, %v3333_v18  ;;  %v2738_v18 = vld [vmem:[%s4282_s10] sm:$0xff] }
 0x324   : > { %1950 = vmatpush.bf16.msrb.mxu0 %v2738_v18 }
 0x325   : > { %v1467_v17 = vsel %vm790_vm3, %v3544_v57, 0.0  ;;  %v1525_v26 = vmul.f32 %v3544_v57, %v3544_v57 }
 0x326   : > { %1468 = vadd.xlane.f32.xlu1 %v1467_v17 }
 0x327   : > { %v1547_v15 = vsel %vm790_vm3, %v1525_v26, 0.0 }
 0x328   : > { %v1412_v36 = vpop.f32.mrf.mxu3  ;;  %1548 = vadd.xlane.f32.xlu0 %v1547_v15 }
 0x329   : > { %v1413_v61 = vadd.f32 %v3513_v55, %v1412_v36 }
 0x32b   : > { %v3553_v19 = vadd.f32 %v1413_v61, %v3365_v4 }
 0x32d   : > { %v1470_v39 = vsel %vm790_vm3, %v3553_v19, 0.0  ;;  %v1526_v12 = vmul.f32 %v3553_v19, %v3553_v19 }
 0x32e   : > { %1471 = vadd.xlane.f32.xlu1 %v1470_v39 }
 0x32f   : > { %v1550_v33 = vsel %vm790_vm3, %v1526_v12, 0.0 }
 0x330   : > { %v1414_v48 = vpop.f32.mrf.mxu3  ;;  %1551 = vadd.xlane.f32.xlu0 %v1550_v33 }
 0x331   : > { %v1415_v32 = vadd.f32 %v3513_v55, %v1414_v48 }
 0x333   : > { %v3565_v4 = vadd.f32 %v1415_v32, %v3368_v6 }
 0x335   : > { %v1473_v44 = vsel %vm790_vm3, %v3565_v4, 0.0  ;;  %v1527_v35 = vmul.f32 %v3565_v4, %v3565_v4 }
 0x336   : > { %1474 = vadd.xlane.f32.xlu2 %v1473_v44 }
 0x337   : > { %v1553_v50 = vsel %vm790_vm3, %v1527_v35, 0.0 }
 0x338   : > { %v1417_v47 = vpop.f32.mrf.mxu3  ;;  %1554 = vadd.xlane.f32.xlu1 %v1553_v50 }
 0x339   : > { %v1418_v43 = vadd.f32 %v3513_v55, %v1417_v47 }
 0x33b   : > { %v3574_v30 = vadd.f32 %v1418_v43, %v3397_v20 }
 0x33d   : > { %v1476_v6 = vsel %vm790_vm3, %v3574_v30, 0.0  ;;  %v1528_v45 = vmul.f32 %v3574_v30, %v3574_v30 }
 0x33e   : > { %1477 = vadd.xlane.f32.xlu2 %v1476_v6 }
 0x33f   : > { %v1556_v21 = vsel %vm790_vm3, %v1528_v45, 0.0 }
 0x340   : > { %v1419_v53 = vpop.f32.mrf.mxu3  ;;  %1557 = vadd.xlane.f32.xlu1 %v1556_v21 }
 0x341   : > { %v1420_v42 = vadd.f32 %v3513_v55, %v1419_v53 }
 0x343   : > { %v3583_v49 = vadd.f32 %v1420_v42, %v3400_v0 }
 0x345   : > { %v1479_v20 = vsel %vm790_vm3, %v3583_v49, 0.0  ;;  %v1529_v62 = vmul.f32 %v3583_v49, %v3583_v49 }
 0x346   : > { %1480 = vadd.xlane.f32.xlu0 %v1479_v20 }
 0x347   : > { %v1559_v56 = vsel %vm790_vm3, %v1529_v62, 0.0 }
 0x348   : > { %v1422_v7 = vpop.f32.mrf.mxu3  ;;  %1560 = vadd.xlane.f32.xlu2 %v1559_v56 }
 0x349   : > { %v1423_v9 = vadd.f32 %v3513_v55, %v1422_v7 }
 0x34b   : > { %v3592_v63 = vadd.f32 %v1423_v9, %v3429_v54 }
 0x34d   : > { %v1482_v0 = vsel %vm790_vm3, %v3592_v63, 0.0  ;;  %v1530_v46 = vmul.f32 %v3592_v63, %v3592_v63 }
 0x34e   : > { %1483 = vadd.xlane.f32.xlu0 %v1482_v0 }
 0x34f   : > { %v1562_v40 = vsel %vm790_vm3, %v1530_v46, 0.0 }
 0x350   : > { %v1424_v14 = vpop.f32.mrf.mxu3  ;;  %1563 = vadd.xlane.f32.xlu2 %v1562_v40 }
 0x351   : > { %v1425_v34 = vadd.f32 %v3513_v55, %v1424_v14 }
 0x353   : > { %v3601_v59 = vadd.f32 %v1425_v34, %v3432_v60 }
 0x355   : > { %v1485_v54 = vsel %vm790_vm3, %v3601_v59, 0.0  ;;  %v1531_v41 = vmul.f32 %v3601_v59, %v3601_v59 }
 0x356   : > { %1486 = vadd.xlane.f32.xlu1 %v1485_v54 }
 0x357   : > { %v1565_v22 = vsel %vm790_vm3, %v1531_v41, 0.0 }
 0x358   : > { %v1427_v5 = vpop.f32.mrf.mxu3  ;;  %1566 = vadd.xlane.f32.xlu0 %v1565_v22 }
 0x359   : > { %v1428_v27 = vadd.f32 %v3513_v55, %v1427_v5 }
 0x35b   : > { %v3610_v8 = vadd.f32 %v1428_v27, %v3460_v37 }
 0x35d   : > { %v1488_v60 = vsel %vm790_vm3, %v3610_v8, 0.0  ;;  %v1532_v31 = vmul.f32 %v3610_v8, %v3610_v8 }
 0x35e   : > { %1489 = vadd.xlane.f32.xlu1 %v1488_v60 }
 0x35f   : > { %v1568_v11 = vsel %vm790_vm3, %v1532_v31, 0.0 }
 0x360   : > { %v1429_v58 = vpop.f32.mrf.mxu3  ;;  %1569 = vadd.xlane.f32.xlu0 %v1568_v11 }
 0x361   : > { %v1430_v28 = vadd.f32 %v3513_v55, %v1429_v58 }
 0x363   : > { %v3619_v2 = vadd.f32 %v1430_v28, %v3463_v24 }
 0x365   : > { %v1491_v37 = vsel %vm790_vm3, %v3619_v2, 0.0  ;;  %v1533_v29 = vmul.f32 %v3619_v2, %v3619_v2 }
 0x366   : > { %1492 = vadd.xlane.f32.xlu2 %v1491_v37 }
 0x367   : > { %v1571_v25 = vsel %vm790_vm3, %v1533_v29, 0.0 }
 0x368   : > { %v1432_v16 = vpop.f32.mrf.mxu3  ;;  %1572 = vadd.xlane.f32.xlu1 %v1571_v25 }
 0x369   : > { %v1433_v17 = vadd.f32 %v3513_v55, %v1432_v16 }
 0x36b   : > { %v3628_v26 = vadd.f32 %v1433_v17, %v3477_v1 }
 0x36d   : > { %v1494_v24 = vsel %vm790_vm3, %v3628_v26, 0.0  ;;  %v1534_v15 = vmul.f32 %v3628_v26, %v3628_v26 }
 0x36e   : > { %1495 = vadd.xlane.f32.xlu2 %v1494_v24 }
 0x36f   : > { %v1574_v36 = vsel %vm790_vm3, %v1534_v15, 0.0 }
 0x370   : > { %v1434_v61 = vpop.f32.mrf.mxu3  ;;  %1575 = vadd.xlane.f32.xlu1 %v1574_v36 }
 0x371   : > { %v1435_v18 = vadd.f32 %v3513_v55, %v1434_v61 }
 0x373   : > { %v3637_v39 = vadd.f32 %v1435_v18, %v3480_v23 }
 0x375   : > { %v1497_v1 = vsel %vm790_vm3, %v3637_v39, 0.0  ;;  %v1535_v12 = vmul.f32 %v3637_v39, %v3637_v39 }
 0x376   : > { %1498 = vadd.xlane.f32.xlu0 %v1497_v1 }
 0x377   : > { %v1577_v33 = vsel %vm790_vm3, %v1535_v12, 0.0 }
 0x378   : > { %1578 = vadd.xlane.f32.xlu2 %v1577_v33  ;;  %v1437_v48 = vpop.f32.mrf.mxu3 }
 0x379   : > { %v1438_v32 = vadd.f32 %v3513_v55, %v1437_v48 }
 0x37b   : > { %v3646_v44 = vadd.f32 %v1438_v32, %v3491_v51 }
 0x37d   : > { %v1500_v23 = vsel %vm790_vm3, %v3646_v44, 0.0  ;;  %v1536_v35 = vmul.f32 %v3646_v44, %v3646_v44 }
 0x37e   : > { %1501 = vadd.xlane.f32.xlu0 %v1500_v23 }
 0x37f   : > { %v1580_v50 = vsel %vm790_vm3, %v1536_v35, 0.0 }
 0x380   : > { %v1439_v47 = vpop.f32.mrf.mxu3  ;;  %1581 = vadd.xlane.f32.xlu2 %v1580_v50 }
 0x381   : > { %v1440_v43 = vadd.f32 %v3513_v55, %v1439_v47  ;;  %v1460_v6 = vpop.xlane.xlu2 %1459 }
 0x382   : > { %v1506_v45 = vmul.f32 %v1460_v6, %v3240_v52 }
 0x383   : > { %v3656_v21 = vadd.f32 %v1440_v43, %v3494_v13  ;;  %v1540_v51 = vpop.xlane.xlu1 %1539 }
 0x384   : > { %v1602_v53 = vmul.f32 %v1506_v45, %v1506_v45  ;;  %v1586_v42 = vmul.f32 %v1540_v51, %v3240_v52  ;;  %v1650_v50 = vsub.f32 %v3517_v38, %v1506_v45 }
 0x385   : > { %v1503_v20 = vsel %vm790_vm3, %v3656_v21, 0.0  ;;  %v1537_v62 = vmul.f32 %v3656_v21, %v3656_v21 }
 0x386   : > { %v1618_v56 = vsub.f32 %v1586_v42, %v1602_v53  ;;  %1504 = vadd.xlane.f32.xlu1 %v1503_v20 }
 0x387   : > { %v1583_v55 = vsel %vm790_vm3, %v1537_v62, 0.0 }
 0x388   : > { %v1634_v7 = vmax.f32 %v1618_v56, 0.0  ;;  %1584 = vadd.xlane.f32.xlu0 %v1583_v55  ;;  %v3685_v55 = vld [vmem:[%s4281_s9 + $0x1] ss:$0 sm:$0xff] }
 0x389   : > { %v1463_v9 = vpop.xlane.xlu0 %1462 }
 0x38a   : > { %v1666_v0 = vadd.f32 1e-05, %v1634_v7  ;;  %v1507_v13 = vmul.f32 %v1463_v9, %v3240_v52 }
 0x38b   : > { %v1543_v46 = vpop.xlane.xlu2 %1542 }
 0x38c   : > { %2802 = vrsqrt.f32 %v1666_v0  ;;  %v1603_v40 = vmul.f32 %v1507_v13, %v1507_v13  ;;  %v1587_v14 = vmul.f32 %v1543_v46, %v3240_v52  ;;  %vm1688_vm12 = vweird.f32 %v1666_v0 }
 0x38d   : > { %v1651_v9 = vsub.f32 %v3526_v3, %v1507_v13 }
 0x38e   : > { %v1619_v34 = vsub.f32 %v1587_v14, %v1603_v40 }
 0x390   : > { %v1635_v54 = vmax.f32 %v1619_v34, 0.0 }
 0x391   : > { %v1466_v41 = vpop.xlane.xlu0 %1465 }
 0x392   : > { %v2803_v22 = vpop.eup %2802  ;;  %v3667_v5 = vmul.f32 %v1466_v41, %v3240_v52  ;;  %v1667_v60 = vadd.f32 1e-05, %v1635_v54  ;;  %v3695_v41 = vld [vmem:[%s4281_s9 + $0x2] ss:$0 sm:$0xff] }
 0x393   : > { %v1683_v27 = vmul.f32 %v2803_v22, %v1666_v0  ;;  %v1546_v31 = vpop.xlane.xlu2 %1545  ;;  %vm1689_vm11 = vweird.f32 %v2803_v22 }
 0x394   : > { %v1604_v11 = vmul.f32 %v3667_v5, %v3667_v5  ;;  %v1588_v58 = vmul.f32 %v1546_v31, %v3240_v52  ;;  %2804 = vrsqrt.f32 %v1667_v60  ;;  %vm1690_vm13 = vmor %vm1688_vm12, %vm1689_vm11  ;;  %vm1698_vm15 = vweird.f32 %v1667_v60 }
 0x395   : > { %v1684_v28 = vmul.f32 %v2803_v22, %v1683_v27 }
 0x396   : > { %v1620_v37 = vsub.f32 %v1588_v58, %v1604_v11 }
 0x397   : > { %v1685_v29 = vmul.f32 0.5, %v1684_v28 }
 0x398   : > { %v1636_v25 = vmax.f32 %v1620_v37, 0.0 }
 0x399   : > { %v1686_v16 = vsub.f32 1.5, %v1685_v29  ;;  %v1469_v17 = vpop.xlane.xlu1 %1468 }
 0x39a   : > { %v1668_v24 = vadd.f32 1e-05, %v1636_v25  ;;  %v3673_v15 = vmul.f32 %v1469_v17, %v3240_v52  ;;  %v2805_v36 = vpop.eup %2804 }
 0x39b   : > { %v1549_v61 = vpop.xlane.xlu0 %1548  ;;  %v1687_v18 = vmul.f32 %v2803_v22, %v1686_v16  ;;  %v1693_v1 = vmul.f32 %v2805_v36, %v1667_v60  ;;  %vm1699_vm14 = vweird.f32 %v2805_v36 }
 0x39c   : > { %2806 = vrsqrt.f32 %v1668_v24  ;;  %v1605_v12 = vmul.f32 %v3673_v15, %v3673_v15  ;;  %v1589_v33 = vmul.f32 %v1549_v61, %v3240_v52  ;;  %vm1700_vm0 = vmor %vm1698_vm15, %vm1699_vm14  ;;  %vm1708_vm4 = vweird.f32 %v1668_v24 }
 0x39d   : > { %v1694_v48 = vmul.f32 %v2805_v36, %v1693_v1  ;;  %v1691_v23 = vsel %vm1690_vm13, %v2803_v22, %v1687_v18 }
 0x39e   : > { %v1621_v32 = vsub.f32 %v1589_v33, %v1605_v12  ;;  %v1842_v42 = vmul.f32 %v1691_v23, %v1650_v50  ;;  %v1652_v33 = vsub.f32 %v3535_v10, %v3667_v5  ;;  %v1653_v5 = vsub.f32 %v3544_v57, %v3673_v15 }
 0x39f   : > { %v1695_v35 = vmul.f32 0.5, %v1694_v48 }
 0x3a0   : > { %v1637_v47 = vmax.f32 %v1621_v32, 0.0  ;;  %v1859_v54 = vmul.f32 %v3685_v55, %v1842_v42 }
 0x3a1   : > { %v1472_v43 = vpop.xlane.xlu1 %1471  ;;  %v1696_v51 = vsub.f32 1.5, %v1695_v35 }
 0x3a2   : > { %v2807_v6 = vpop.eup %2806  ;;  %v3680_v53 = vmul.f32 %v1472_v43, %v3240_v52  ;;  %v1669_v62 = vadd.f32 1e-05, %v1637_v47  ;;  %v3704_v28 = vadd.f32 %v3695_v41, %v1859_v54 }
 0x3a3   : > { %v1703_v20 = vmul.f32 %v2807_v6, %v1668_v24  ;;  %v1552_v56 = vpop.xlane.xlu0 %1551  ;;  %v1697_v7 = vmul.f32 %v2805_v36, %v1696_v51  ;;  %vm1709_vm1 = vweird.f32 %v2807_v6 }
 0x3a4   : > { %v1606_v38 = vmul.f32 %v3680_v53, %v3680_v53  ;;  %v1590_v45 = vmul.f32 %v1552_v56, %v3240_v52  ;;  %2808 = vrsqrt.f32 %v1669_v62  ;;  %vm1710_vm5 = vmor %vm1708_vm4, %vm1709_vm1  ;;  %vm1718_vm7 = vweird.f32 %v1669_v62 }
 0x3a5   : > { %v1704_v0 = vmul.f32 %v2807_v6, %v1703_v20  ;;  %v1701_v46 = vsel %vm1700_vm0, %v2805_v36, %v1697_v7 }
 0x3a6   : > { %v1622_v40 = vsub.f32 %v1590_v45, %v1606_v38  ;;  %v1843_v14 = vmul.f32 %v1701_v46, %v1651_v9 }
 0x3a7   : > { %v1705_v34 = vmul.f32 0.5, %v1704_v0 }
 0x3a8   : > { %v1638_v22 = vmax.f32 %v1622_v40, 0.0  ;;  %v1860_v31 = vmul.f32 %v3685_v55, %v1843_v14 }
 0x3a9   : > { %v1706_v27 = vsub.f32 1.5, %v1705_v34  ;;  %v1475_v60 = vpop.xlane.xlu2 %1474 }
 0x3aa   : > { %v3698_v3 = vadd.f32 1e-05, %v1638_v22  ;;  %v3701_v13 = vmul.f32 %v1475_v60, %v3240_v52  ;;  %v2809_v11 = vpop.eup %2808  ;;  %v3707_v37 = vadd.f32 %v3695_v41, %v1860_v31 }
 0x3ab   : > { %v1555_v58 = vpop.xlane.xlu1 %1554  ;;  %v1707_v29 = vmul.f32 %v2807_v6, %v1706_v27  ;;  %v1713_v25 = vmul.f32 %v2809_v11, %v1669_v62  ;;  %vm1719_vm6 = vweird.f32 %v2809_v11 }
 0x3ac   : > { %2810 = vrsqrt.f32 %v3698_v3  ;;  %v1607_v16 = vmul.f32 %v3701_v13, %v3701_v13  ;;  %v1591_v17 = vmul.f32 %v1555_v58, %v3240_v52  ;;  %v1902_v36 = vpack.c.bf16 %v3707_v37, %v3704_v28  ;;  %vm1720_vm8 = vmor %vm1718_vm7, %vm1719_vm6 }
 0x3ad   : > { %v1714_v61 = vmul.f32 %v2809_v11, %v1713_v25  ;;  %v1711_v12 = vsel %vm1710_vm5, %v2807_v6, %v1707_v29  ;;  %vm1728_vm10 = vweird.f32 %v3698_v3 }
 0x3ae   : > { %v1623_v18 = vsub.f32 %v1591_v17, %v1607_v16  ;;  %2705 = vmatmul.msk.bf16.vlgmr.msrb.gmra.mxu0 %vm790_vm3, %v1902_v36  ;;  %v1844_v51 = vmul.f32 %v1711_v12, %v1652_v33  ;;  %v1654_v36 = vsub.f32 %v3553_v19, %v3680_v53  ;;  %v1655_v53 = vsub.f32 %v3565_v4, %v3701_v13 }
 0x3af   : > { %v1715_v1 = vmul.f32 0.5, %v1714_v61 }
 0x3b0   : > { %v1639_v48 = vmax.f32 %v1623_v18, 0.0  ;;  %v1861_v9 = vmul.f32 %v3685_v55, %v1844_v51 }
 0x3b1   : > { %v1478_v32 = vpop.xlane.xlu2 %1477  ;;  %v1716_v35 = vsub.f32 1.5, %v1715_v1 }
 0x3b2   : > { %v2811_v23 = vpop.eup %2810  ;;  %v3719_v50 = vmul.f32 %v1478_v32, %v3240_v52  ;;  %v1671_v47 = vadd.f32 1e-05, %v1639_v48  ;;  %v3735_v54 = vadd.f32 %v3695_v41, %v1861_v9 }
 0x3b3   : > { %v1723_v24 = vmul.f32 %v2811_v23, %v3698_v3  ;;  %v1558_v43 = vpop.xlane.xlu1 %1557  ;;  %v1717_v42 = vmul.f32 %v2809_v11, %v1716_v35  ;;  %vm1729_vm9 = vweird.f32 %v2811_v23 }
 0x3b4   : > { %v1608_v6 = vmul.f32 %v3719_v50, %v3719_v50  ;;  %v1592_v10 = vmul.f32 %v1558_v43, %v3240_v52  ;;  %2812 = vrsqrt.f32 %v1671_v47  ;;  %vm1730_vm11 = vmor %vm1728_vm10, %vm1729_vm9  ;;  %vm1738_vm13 = vweird.f32 %v1671_v47 }
 0x3b5   : > { %v1724_v20 = vmul.f32 %v2811_v23, %v1723_v24  ;;  %v1721_v7 = vsel %vm1720_vm8, %v2809_v11, %v1717_v42 }
 0x3b6   : > { %v1624_v56 = vsub.f32 %v1592_v10, %v1608_v6  ;;  %v1845_v45 = vmul.f32 %v1721_v7, %v1653_v5 }
 0x3b7   : > { %v1725_v38 = vmul.f32 0.5, %v1724_v20 }
 0x3b8   : > { %v1640_v0 = vmax.f32 %v1624_v56, 0.0  ;;  %v1862_v40 = vmul.f32 %v3685_v55, %v1845_v45 }
 0x3b9   : > { %v1726_v46 = vsub.f32 1.5, %v1725_v38  ;;  %v1481_v62 = vpop.xlane.xlu0 %1480 }
 0x3ba   : > { %v3729_v14 = vadd.f32 1e-05, %v1640_v0  ;;  %v3732_v34 = vmul.f32 %v1481_v62, %v3240_v52  ;;  %v2813_v57 = vpop.eup %2812  ;;  %v3738_v22 = vadd.f32 %v3695_v41, %v1862_v40 }
 0x3bb   : > { %v1561_v15 = vpop.xlane.xlu2 %1560  ;;  %v1727_v27 = vmul.f32 %v2811_v23, %v1726_v46  ;;  %v1733_v60 = vmul.f32 %v2813_v57, %v1671_v47  ;;  %vm1739_vm12 = vweird.f32 %v2813_v57  ;;  %v2740_v46 = vld [vmem:[%s4284_s12 + $0x8] sm:$0xff] }
 0x3bc   : > { %2814 = vrsqrt.f32 %v3729_v14  ;;  %v1609_v31 = vmul.f32 %v3732_v34, %v3732_v34  ;;  %v1593_v11 = vmul.f32 %v1561_v15, %v3240_v52  ;;  %v1903_v58 = vpack.c.bf16 %v3738_v22, %v3735_v54  ;;  %vm1740_vm14 = vmor %vm1738_vm13, %vm1739_vm12  ;;  %2059 = vmatpush.bf16.msrb.mxu1 %v2740_v46 }
 0x3bd   : > { %v1734_v29 = vmul.f32 %v2813_v57, %v1733_v60  ;;  %v1731_v17 = vsel %vm1730_vm11, %v2811_v23, %v1727_v27  ;;  %vm1748_vm0 = vweird.f32 %v3729_v14 }
 0x3be   : > { %v1625_v25 = vsub.f32 %v1593_v11, %v1609_v31  ;;  %2706 = vmatmul.msk.bf16.gmra.mxu0 %vm790_vm3, %v1903_v58  ;;  %v1846_v35 = vmul.f32 %v1731_v17, %v1654_v36 }
 0x3bf   : > { %v1735_v16 = vmul.f32 0.5, %v1734_v29  ;;  %v1656_v29 = vsub.f32 %v3574_v30, %v3719_v50  ;;  %v1657_v50 = vsub.f32 %v3583_v49, %v3732_v34 }
 0x3c0   : > { %v1641_v61 = vmax.f32 %v1625_v25, 0.0  ;;  %v1863_v5 = vmul.f32 %v3685_v55, %v1846_v35 }
 0x3c1   : > { %v1484_v18 = vpop.xlane.xlu0 %1483  ;;  %v1736_v12 = vsub.f32 1.5, %v1735_v16 }
 0x3c2   : > { %v2815_v1 = vpop.eup %2814  ;;  %v3751_v33 = vmul.f32 %v1484_v18, %v3240_v52  ;;  %v1673_v48 = vadd.f32 1e-05, %v1641_v61  ;;  %v3767_v9 = vadd.f32 %v3695_v41, %v1863_v5 }
 0x3c3   : > { %v1743_v3 = vmul.f32 %v2815_v1, %v3729_v14  ;;  %v1564_v32 = vpop.xlane.xlu2 %1563  ;;  %v1737_v24 = vmul.f32 %v2813_v57, %v1736_v12  ;;  %vm1749_vm15 = vweird.f32 %v2815_v1 }
 0x3c4   : > { %v1610_v23 = vmul.f32 %v3751_v33, %v3751_v33  ;;  %v1594_v19 = vmul.f32 %v1564_v32, %v3240_v52  ;;  %2816 = vrsqrt.f32 %v1673_v48  ;;  %vm1750_vm1 = vmor %vm1748_vm0, %vm1749_vm15  ;;  %vm1758_vm5 = vweird.f32 %v1673_v48 }
 0x3c5   : > { %v1744_v43 = vmul.f32 %v2815_v1, %v1743_v3  ;;  %v1741_v42 = vsel %vm1740_vm14, %v2813_v57, %v1737_v24 }
 0x3c6   : > { %v1626_v51 = vsub.f32 %v1594_v19, %v1610_v23  ;;  %v1847_v10 = vmul.f32 %v1741_v42, %v1655_v53 }
 0x3c7   : > { %v1745_v6 = vmul.f32 0.5, %v1744_v43 }
 0x3c8   : > { %v1642_v20 = vmax.f32 %v1626_v51, 0.0  ;;  %v1864_v7 = vmul.f32 %v3685_v55, %v1847_v10 }
 0x3c9   : > { %v1746_v56 = vsub.f32 1.5, %v1745_v6  ;;  %v1487_v47 = vpop.xlane.xlu1 %1486 }
 0x3ca   : > { %v3761_v38 = vadd.f32 1e-05, %v1642_v20  ;;  %v3764_v45 = vmul.f32 %v1487_v47, %v3240_v52  ;;  %v2817_v4 = vpop.eup %2816  ;;  %v3770_v0 = vadd.f32 %v3695_v41, %v1864_v7 }
 0x3cb   : > { %v1567_v13 = vpop.xlane.xlu0 %1566  ;;  %v1747_v62 = vmul.f32 %v2815_v1, %v1746_v56  ;;  %v1753_v40 = vmul.f32 %v2817_v4, %v1673_v48  ;;  %vm1759_vm4 = vweird.f32 %v2817_v4 }
 0x3cc   : > { %2818 = vrsqrt.f32 %v3761_v38  ;;  %v1611_v57 = vmul.f32 %v3764_v45, %v3764_v45  ;;  %v1595_v15 = vmul.f32 %v1567_v13, %v3240_v52  ;;  %v1904_v27 = vpack.c.bf16 %v3770_v0, %v3767_v9  ;;  %vm1760_vm6 = vmor %vm1758_vm5, %vm1759_vm4 }
 0x3cd   : > { %v1754_v60 = vmul.f32 %v2817_v4, %v1753_v40  ;;  %v1751_v58 = vsel %vm1750_vm1, %v2815_v1, %v1747_v62  ;;  %vm1768_vm8 = vweird.f32 %v3761_v38 }
 0x3ce   : > { %v1627_v31 = vsub.f32 %v1595_v15, %v1611_v57  ;;  %2707 = vmatmul.msk.bf16.gmra.mxu0 %vm790_vm3, %v1904_v27  ;;  %v1848_v3 = vmul.f32 %v1751_v58, %v1656_v29  ;;  %v1658_v27 = vsub.f32 %v3592_v63, %v3751_v33  ;;  %v1659_v33 = vsub.f32 %v3601_v59, %v3764_v45 }
 0x3cf   : > { %v1755_v11 = vmul.f32 0.5, %v1754_v60 }
 0x3d0   : > { %v1643_v25 = vmax.f32 %v1627_v31, 0.0  ;;  %v1865_v43 = vmul.f32 %v3685_v55, %v1848_v3 }
 0x3d1   : > { %v1490_v16 = vpop.xlane.xlu1 %1489  ;;  %v1756_v36 = vsub.f32 1.5, %v1755_v11 }
 0x3d2   : > { %v2819_v17 = vpop.eup %2818  ;;  %v3786_v61 = vmul.f32 %v1490_v16, %v3240_v52  ;;  %v1675_v18 = vadd.f32 1e-05, %v1643_v25  ;;  %v3802_v20 = vadd.f32 %v3695_v41, %v1865_v43 }
 0x3d3   : > { %v1763_v14 = vmul.f32 %v2819_v17, %v3761_v38  ;;  %v1570_v12 = vpop.xlane.xlu0 %1569  ;;  %v1757_v32 = vmul.f32 %v2817_v4, %v1756_v36  ;;  %vm1769_vm7 = vweird.f32 %v2819_v17 }
 0x3d4   : > { %v1612_v1 = vmul.f32 %v3786_v61, %v3786_v61  ;;  %v1596_v30 = vmul.f32 %v1570_v12, %v3240_v52  ;;  %2820 = vrsqrt.f32 %v1675_v18  ;;  %vm1770_vm9 = vmor %vm1768_vm8, %vm1769_vm7  ;;  %vm1778_vm11 = vweird.f32 %v1675_v18 }
 0x3d5   : > { %v1764_v35 = vmul.f32 %v2819_v17, %v1763_v14  ;;  %v1761_v23 = vsel %vm1760_vm6, %v2817_v4, %v1757_v32 }
 0x3d6   : > { %v1628_v24 = vsub.f32 %v1596_v30, %v1612_v1  ;;  %v1849_v53 = vmul.f32 %v1761_v23, %v1657_v50 }
 0x3d7   : > { %v1765_v19 = vmul.f32 0.5, %v1764_v35 }
 0x3d8   : > { %v1644_v51 = vmax.f32 %v1628_v24, 0.0  ;;  %v1866_v6 = vmul.f32 %v3685_v55, %v1849_v53 }
 0x3d9   : > { %v1766_v42 = vsub.f32 1.5, %v1765_v19  ;;  %v1493_v48 = vpop.xlane.xlu2 %1492 }
 0x3da   : > { %v3796_v10 = vadd.f32 1e-05, %v1644_v51  ;;  %v3799_v5 = vmul.f32 %v1493_v48, %v3240_v52  ;;  %v2821_v49 = vpop.eup %2820  ;;  %v3805_v56 = vadd.f32 %v3695_v41, %v1866_v6 }
 0x3db   : > { %v1573_v34 = vpop.xlane.xlu1 %1572  ;;  %v1767_v47 = vmul.f32 %v2819_v17, %v1766_v42  ;;  %v1773_v7 = vmul.f32 %v2821_v49, %v1675_v18  ;;  %vm1779_vm10 = vweird.f32 %v2821_v49 }
 0x3dc   : > { %2822 = vrsqrt.f32 %v3796_v10  ;;  %v1613_v4 = vmul.f32 %v3799_v5, %v3799_v5  ;;  %v1597_v13 = vmul.f32 %v1573_v34, %v3240_v52  ;;  %v1905_v46 = vpack.c.bf16 %v3805_v56, %v3802_v20  ;;  %vm1780_vm12 = vmor %vm1778_vm11, %vm1779_vm10 }
 0x3dd   : > { %v1774_v62 = vmul.f32 %v2821_v49, %v1773_v7  ;;  %v1771_v15 = vsel %vm1770_vm9, %v2819_v17, %v1767_v47  ;;  %vm1788_vm14 = vweird.f32 %v3796_v10 }
 0x3de   : > { %v1629_v40 = vsub.f32 %v1597_v13, %v1613_v4  ;;  %2708 = vmatmul.msk.bf16.gmra.mxu0 %vm790_vm3, %v1905_v46  ;;  %v1850_v36 = vmul.f32 %v1771_v15, %v1658_v27  ;;  %v1660_v15 = vsub.f32 %v3610_v8, %v3786_v61  ;;  %v1661_v8 = vsub.f32 %v3619_v2, %v3799_v5 }
 0x3df   : > { %v1775_v57 = vmul.f32 0.5, %v1774_v62 }
 0x3e0   : > { %v1645_v60 = vmax.f32 %v1629_v40, 0.0  ;;  %v1867_v50 = vmul.f32 %v3685_v55, %v1850_v36 }
 0x3e1   : > { %v1496_v31 = vpop.xlane.xlu2 %1495  ;;  %v1776_v58 = vsub.f32 1.5, %v1775_v57 }
 0x3e2   : > { %v2823_v11 = vpop.eup %2822  ;;  %v3818_v29 = vmul.f32 %v1496_v31, %v3240_v52  ;;  %v1677_v25 = vadd.f32 1e-05, %v1645_v60  ;;  %v3834_v43 = vadd.f32 %v3695_v41, %v1867_v50 }
 0x3e3   : > { %v1783_v38 = vmul.f32 %v2823_v11, %v3796_v10  ;;  %v1576_v16 = vpop.xlane.xlu1 %1575  ;;  %v1777_v14 = vmul.f32 %v2821_v49, %v1776_v58  ;;  %vm1789_vm13 = vweird.f32 %v2823_v11 }
 0x3e4   : > { %v1614_v17 = vmul.f32 %v3818_v29, %v3818_v29  ;;  %v1598_v63 = vmul.f32 %v1576_v16, %v3240_v52  ;;  %2824 = vrsqrt.f32 %v1677_v25  ;;  %vm3847_vm15 = vmor %vm1788_vm14, %vm1789_vm13  ;;  %vm1798_vm1 = vweird.f32 %v1677_v25 }
 0x3e5   : > { %v1784_v12 = vmul.f32 %v2823_v11, %v1783_v38  ;;  %v1781_v32 = vsel %vm1780_vm12, %v2821_v49, %v1777_v14 }
 0x3e6   : > { %v1630_v3 = vsub.f32 %v1598_v63, %v1614_v17  ;;  %v1851_v30 = vmul.f32 %v1781_v32, %v1659_v33  ;;  %v2739_v33 = vld [vmem:[%s4284_s12] sm:$0xff] }
 0x3e7   : > { %v1785_v1 = vmul.f32 0.5, %v1784_v12  ;;  %2060 = vmatpush.bf16.msrb.mxu1 %v2739_v33 }
 0x3e8   : > { %v1646_v35 = vmax.f32 %v1630_v3, 0.0  ;;  %v1868_v23 = vmul.f32 %v3685_v55, %v1851_v30 }
 0x3e9   : > { %v1786_v24 = vsub.f32 1.5, %v1785_v1  ;;  %v1499_v18 = vpop.xlane.xlu0 %1498 }
 0x3ea   : > { %v3828_v19 = vadd.f32 1e-05, %v1646_v35  ;;  %v3831_v53 = vmul.f32 %v1499_v18, %v3240_v52  ;;  %v2825_v59 = vpop.eup %2824  ;;  %v3837_v51 = vadd.f32 %v3695_v41, %v1868_v23 }
 0x3eb   : > { %v1579_v45 = vpop.xlane.xlu2 %1578  ;;  %v1793_v42 = vmul.f32 %v2825_v59, %v1677_v25  ;;  %v1787_v48 = vmul.f32 %v2823_v11, %v1786_v24  ;;  %vm1799_vm0 = vweird.f32 %v2825_v59 }
 0x3ec   : > { %2826 = vrsqrt.f32 %v3828_v19  ;;  %v1615_v6 = vmul.f32 %v3831_v53, %v3831_v53  ;;  %v1599_v49 = vmul.f32 %v1579_v45, %v3240_v52  ;;  %v1906_v34 = vpack.c.bf16 %v3837_v51, %v3834_v43  ;;  %vm1800_vm4 = vmor %vm1798_vm1, %vm1799_vm0 }
 0x3ed   : > { %v1794_v47 = vmul.f32 %v2825_v59, %v1793_v42  ;;  %v1791_v40 = vsel %vm3847_vm15, %v2823_v11, %v1787_v48  ;;  %vm1808_vm6 = vweird.f32 %v3828_v19 }
 0x3ee   : > { %v1631_v7 = vsub.f32 %v1599_v49, %v1615_v6  ;;  %2709 = vmatmul.msk.bf16.gmra.mxu0 %vm790_vm3, %v1906_v34  ;;  %v1852_v36 = vmul.f32 %v1791_v40, %v1660_v15 }
 0x3ef   : > { %v1795_v13 = vmul.f32 0.5, %v1794_v47 }
 0x3f0   : > { %v1647_v46 = vmax.f32 %v1631_v7, 0.0  ;;  %v1869_v3 = vmul.f32 %v3685_v55, %v1852_v36  ;;  %v1662_v7 = vsub.f32 %v3628_v26, %v3818_v29 }
 0x3f1   : > { %v1502_v62 = vpop.xlane.xlu0 %1501  ;;  %v1796_v27 = vsub.f32 1.5, %v1795_v13 }
 0x3f2   : > { %v2827_v57 = vpop.eup %2826  ;;  %v3856_v10 = vmul.f32 %v1502_v62, %v3240_v52  ;;  %v1679_v31 = vadd.f32 1e-05, %v1647_v46 }
 0x3f3   : > { %v1803_v60 = vmul.f32 %v2827_v57, %v3828_v19  ;;  %v1582_v58 = vpop.xlane.xlu2 %1581  ;;  %v1797_v38 = vmul.f32 %v2825_v59, %v1796_v27  ;;  %vm1809_vm5 = vweird.f32 %v2827_v57  ;;  %v1663_v27 = vsub.f32 %v3637_v39, %v3831_v53 }
 0x3f4   : > { %v1616_v16 = vmul.f32 %v3856_v10, %v3856_v10  ;;  %v1600_v11 = vmul.f32 %v1582_v58, %v3240_v52  ;;  %2828 = vrsqrt.f32 %v1679_v31  ;;  %vm1810_vm7 = vmor %vm1808_vm6, %vm1809_vm5  ;;  %vm1818_vm9 = vweird.f32 %v1679_v31 }
 0x3f5   : > { %v1804_v61 = vmul.f32 %v2827_v57, %v1803_v60  ;;  %v1801_v17 = vsel %vm1800_vm4, %v2825_v59, %v1797_v38  ;;  %v3874_v59 = vadd.f32 %v3695_v41, %v1869_v3 }
 0x3f6   : > { %v1632_v14 = vsub.f32 %v1600_v11, %v1616_v16  ;;  %v1853_v63 = vmul.f32 %v1801_v17, %v1661_v8 }
 0x3f7   : > { %v1805_v25 = vmul.f32 0.5, %v1804_v61 }
 0x3f8   : > { %v1648_v12 = vmax.f32 %v1632_v14, 0.0  ;;  %v1870_v30 = vmul.f32 %v3685_v55, %v1853_v63 }
 0x3f9   : > { %v1806_v32 = vsub.f32 1.5, %v1805_v25  ;;  %v1505_v1 = vpop.xlane.xlu1 %1504  ;;  %v1664_v25 = vsub.f32 %v3646_v44, %v3856_v10 }
 0x3fa   : > { %v1680_v2 = vadd.f32 1e-05, %v1648_v12  ;;  %v1521_v5 = vmul.f32 %v1505_v1, %v3240_v52  ;;  %v2829_v50 = vpop.eup %2828  ;;  %v3871_v24 = vadd.f32 %v3695_v41, %v1870_v30 }
 0x3fb   : > { %v1585_v35 = vpop.xlane.xlu0 %1584  ;;  %v1807_v18 = vmul.f32 %v2827_v57, %v1806_v32  ;;  %v1813_v23 = vmul.f32 %v2829_v50, %v1679_v31  ;;  %vm1819_vm8 = vweird.f32 %v2829_v50 }
 0x3fc   : > { %2830 = vrsqrt.f32 %v1680_v2  ;;  %v1617_v45 = vmul.f32 %v1521_v5, %v1521_v5  ;;  %v1601_v42 = vmul.f32 %v1585_v35, %v3240_v52  ;;  %v1907_v6 = vpack.c.bf16 %v3871_v24, %v3874_v59  ;;  %vm1820_vm10 = vmor %vm1818_vm9, %vm1819_vm8 }
 0x3fd   : > { %v1814_v48 = vmul.f32 %v2829_v50, %v1813_v23  ;;  %v1811_v34 = vsel %vm1810_vm7, %v2827_v57, %v1807_v18  ;;  %vm1828_vm12 = vweird.f32 %v1680_v2  ;;  %v1665_v3 = vsub.f32 %v3656_v21, %v1521_v5  ;;  %v2764_v21 = vld [vmem:[%s4283_s11] ss:$0 sm:$0xff] }
 0x3fe   : > { %v1633_v49 = vsub.f32 %v1601_v42, %v1617_v45  ;;  %2710 = vmatmul.msk.bf16.gmra.mxu0 %vm790_vm3, %v1907_v6  ;;  %v1854_v62 = vmul.f32 %v1811_v34, %v1662_v7 }
 0x3ff   : > { %v1815_v47 = vmul.f32 0.5, %v1814_v48 }
 0x400   : > { %v1649_v4 = vmax.f32 %v1633_v49, 0.0  ;;  %v1871_v26 = vmul.f32 %v3685_v55, %v1854_v62 }
 0x401   : > { %v1816_v46 = vsub.f32 1.5, %v1815_v47 }
 0x402   : > { %v2831_v13 = vpop.eup %2830  ;;  %v1681_v19 = vadd.f32 1e-05, %v1649_v4  ;;  %v3888_v36 = vadd.f32 %v3695_v41, %v1871_v26 }
 0x403   : > { %v1823_v40 = vmul.f32 %v2831_v13, %v1680_v2  ;;  %v1817_v15 = vmul.f32 %v2829_v50, %v1816_v46  ;;  %vm1829_vm11 = vweird.f32 %v2831_v13 }
 0x404   : > { %2832 = vrsqrt.f32 %v1681_v19  ;;  %vm1830_vm13 = vmor %vm1828_vm12, %vm1829_vm11  ;;  %vm1838_vm15 = vweird.f32 %v1681_v19 }
 0x405   : > { %v1824_v57 = vmul.f32 %v2831_v13, %v1823_v40  ;;  %v1821_v60 = vsel %vm1820_vm10, %v2829_v50, %v1817_v15 }
 0x406   : > { %v1855_v58 = vmul.f32 %v1821_v60, %v1663_v27 }
 0x407   : > { %v1825_v38 = vmul.f32 0.5, %v1824_v57 }
 0x408   : > { %v1872_v16 = vmul.f32 %v3685_v55, %v1855_v58 }
 0x409   : > { %v1826_v29 = vsub.f32 1.5, %v1825_v38 }
 0x40a   : > { %v2833_v11 = vpop.eup %2832  ;;  %v3891_v31 = vadd.f32 %v3695_v41, %v1872_v16 }
 0x40b   : > { %v1827_v8 = vmul.f32 %v2831_v13, %v1826_v29  ;;  %v1833_v39 = vmul.f32 %v2833_v11, %v1681_v19  ;;  %vm1839_vm14 = vweird.f32 %v2833_v11 }
 0x40c   : > { %v1908_v53 = vpack.c.bf16 %v3891_v31, %v3888_v36  ;;  %vm1840_vm0 = vmor %vm1838_vm15, %vm1839_vm14 }
 0x40d   : > { %v1834_v61 = vmul.f32 %v2833_v11, %v1833_v39  ;;  %v1831_v14 = vsel %vm1830_vm13, %v2831_v13, %v1827_v8 }
 0x40e   : > { %2711 = vmatmul.msk.bf16.gmra.mxu0 %vm790_vm3, %v1908_v53  ;;  %v1856_v33 = vmul.f32 %v1831_v14, %v1664_v25 }
 0x40f   : > { %v1835_v17 = vmul.f32 0.5, %v1834_v61 }
 0x410   : > { %v1873_v30 = vmul.f32 %v3685_v55, %v1856_v33 }
 0x411   : > { %v1836_v63 = vsub.f32 1.5, %v1835_v17 }
 0x412   : > { %v3902_v50 = vadd.f32 %v3695_v41, %v1873_v30 }
 0x413   : > { %v1837_v12 = vmul.f32 %v2833_v11, %v1836_v63 }
 0x415   : > { %v1841_v32 = vsel %vm1840_vm0, %v2833_v11, %v1837_v12 }
 0x416   : > { %v1857_v1 = vmul.f32 %v1841_v32, %v1665_v3 }
 0x418   : > { %v1874_v2 = vmul.f32 %v3685_v55, %v1857_v1 }
 0x41a   : > { %v3905_v35 = vadd.f32 %v3695_v41, %v1874_v2 }
 0x41c   : > { %v1909_v44 = vpack.c.bf16 %v3905_v35, %v3902_v50 }
 0x41e   : > { %2712 = vmatmul.msk.bf16.gmra.mxu0 %vm790_vm3, %v1909_v44 }
 0x42b   : > { %v1952_v10 = vpop.f32.mrf.mxu0 }
 0x42c   : > { %v1953_v5 = vadd.f32 %v2764_v21, %v1952_v10 }
 0x42e   : > { %v1992_v55 = vmax.f32 %v1953_v5, 0.0 }
 0x433   : > { %v1954_v18 = vpop.f32.mrf.mxu0 }
 0x434   : > { %v1955_v23 = vadd.f32 %v2764_v21, %v1954_v18 }
 0x436   : > { %v1993_v45 = vmax.f32 %v1955_v23, 0.0 }
 0x438   : > { %v2008_v42 = vpack.c.bf16 %v1993_v45, %v1992_v55 }
 0x43a   : > { %2721 = vmatmul.msk.bf16.vlgmr.msrb.gmra.mxu1 %vm637_vm2, %v2008_v42 }
 0x43b   : > { %v1957_v41 = vpop.f32.mrf.mxu0 }
 0x43c   : > { %v1958_v48 = vadd.f32 %v2764_v21, %v1957_v41 }
 0x43e   : > { %v1994_v34 = vmax.f32 %v1958_v48, 0.0 }
 0x443   : > { %v1959_v6 = vpop.f32.mrf.mxu0 }
 0x444   : > { %v1960_v49 = vadd.f32 %v2764_v21, %v1959_v6 }
 0x446   : > { %v1995_v47 = vmax.f32 %v1960_v49, 0.0  ;;  %v3924_v49 = vld [vmem:[%s4285_s13] ss:$0 sm:$0xff] }
 0x448   : > { %v2009_v7 = vpack.c.bf16 %v1995_v47, %v1994_v34 }
 0x44a   : > { %2722 = vmatmul.msk.bf16.gmra.mxu1 %vm637_vm2, %v2009_v7 }
 0x44b   : > { %v1962_v4 = vpop.f32.mrf.mxu0 }
 0x44c   : > { %v1963_v13 = vadd.f32 %v2764_v21, %v1962_v4 }
 0x44e   : > { %v1996_v40 = vmax.f32 %v1963_v13, 0.0 }
 0x453   : > { %v1964_v46 = vpop.f32.mrf.mxu0 }
 0x454   : > { %v1965_v62 = vadd.f32 %v2764_v21, %v1964_v46 }
 0x456   : > { %v1997_v19 = vmax.f32 %v1965_v62, 0.0 }
 0x458   : > { %v2010_v15 = vpack.c.bf16 %v1997_v19, %v1996_v40 }
 0x45a   : > { %2723 = vmatmul.msk.bf16.gmra.mxu1 %vm637_vm2, %v2010_v15 }
 0x45b   : > { %v1967_v27 = vpop.f32.mrf.mxu0 }
 0x45c   : > { %v1968_v57 = vadd.f32 %v2764_v21, %v1967_v27 }
 0x45e   : > { %v1998_v38 = vmax.f32 %v1968_v57, 0.0 }
 0x463   : > { %v1969_v60 = vpop.f32.mrf.mxu0 }
 0x464   : > { %v1970_v58 = vadd.f32 %v2764_v21, %v1969_v60 }
 0x466   : > { %v1999_v26 = vmax.f32 %v1970_v58, 0.0 }
 0x468   : > { %v2011_v29 = vpack.c.bf16 %v1999_v26, %v1998_v38 }
 0x46a   : > { %2724 = vmatmul.msk.bf16.gmra.mxu1 %vm637_vm2, %v2011_v29 }
 0x46b   : > { %v1972_v16 = vpop.f32.mrf.mxu0 }
 0x46c   : > { %v1973_v11 = vadd.f32 %v2764_v21, %v1972_v16 }
 0x46e   : > { %v2000_v53 = vmax.f32 %v1973_v11, 0.0 }
 0x473   : > { %v1974_v8 = vpop.f32.mrf.mxu0 }
 0x474   : > { %v1975_v39 = vadd.f32 %v2764_v21, %v1974_v8 }
 0x476   : > { %v2001_v61 = vmax.f32 %v1975_v39, 0.0 }
 0x478   : > { %v2012_v14 = vpack.c.bf16 %v2001_v61, %v2000_v53 }
 0x47a   : > { %2725 = vmatmul.msk.bf16.gmra.mxu1 %vm637_vm2, %v2012_v14 }
 0x47b   : > { %v1977_v17 = vpop.f32.mrf.mxu0 }
 0x47c   : > { %v1978_v25 = vadd.f32 %v2764_v21, %v1977_v17 }
 0x47e   : > { %v2002_v12 = vmax.f32 %v1978_v25, 0.0 }
 0x483   : > { %v1979_v63 = vpop.f32.mrf.mxu0 }
 0x484   : > { %v1980_v33 = vadd.f32 %v2764_v21, %v1979_v63 }
 0x486   : > { %v2003_v3 = vmax.f32 %v1980_v33, 0.0 }
 0x488   : > { %v2013_v32 = vpack.c.bf16 %v2003_v3, %v2002_v12 }
 0x48a   : > { %2726 = vmatmul.msk.bf16.gmra.mxu1 %vm637_vm2, %v2013_v32 }
 0x48b   : > { %v1982_v1 = vpop.f32.mrf.mxu0 }
 0x48c   : > { %v1983_v30 = vadd.f32 %v2764_v21, %v1982_v1 }
 0x48e   : > { %v2004_v10 = vmax.f32 %v1983_v30, 0.0 }
 0x493   : > { %v1984_v2 = vpop.f32.mrf.mxu0 }
 0x494   : > { %v1985_v44 = vadd.f32 %v2764_v21, %v1984_v2 }
 0x496   : > { %v2005_v5 = vmax.f32 %v1985_v44, 0.0 }
 0x498   : > { %v2014_v18 = vpack.c.bf16 %v2005_v5, %v2004_v10 }
 0x49a   : > { %2727 = vmatmul.msk.bf16.gmra.mxu1 %vm637_vm2, %v2014_v18 }
 0x49b   : > { %v1987_v23 = vpop.f32.mrf.mxu0 }
 0x49c   : > { %v1988_v55 = vadd.f32 %v2764_v21, %v1987_v23 }
 0x49e   : > { %v2006_v41 = vmax.f32 %v1988_v55, 0.0 }
 0x4a3   : > { %v1989_v45 = vpop.f32.mrf.mxu0 }
 0x4a4   : > { %v1990_v42 = vadd.f32 %v2764_v21, %v1989_v45 }
 0x4a6   : > { %v2007_v48 = vmax.f32 %v1990_v42, 0.0 }
 0x4a8   : > { %v2015_v6 = vpack.c.bf16 %v2007_v48, %v2006_v41 }
 0x4aa   : > { %2728 = vmatmul.msk.bf16.gmra.mxu1 %vm637_vm2, %v2015_v6 }
 0x4b7   : > { %v2062_v34 = vpop.f32.mrf.mxu1 }
 0x4b8   : > { %v2063_v47 = vadd.f32 %v3924_v49, %v2062_v34 }
 0x4ba   : > { %v3928_v7 = vadd.f32 %v2063_v47, %v3704_v28 }
 0x4bc   : > { %v2118_v4 = vsel %vm790_vm3, %v3928_v7, 0.0  ;;  %v2182_v21 = vmul.f32 %v3928_v7, %v3928_v7 }
 0x4bd   : > { %2119 = vadd.xlane.f32.xlu1 %v2118_v4 }
 0x4be   : > { %v2198_v13 = vsel %vm790_vm3, %v2182_v21, 0.0 }
 0x4bf   : > { %v2064_v46 = vpop.f32.mrf.mxu1  ;;  %2199 = vadd.xlane.f32.xlu2 %v2198_v13 }
 0x4c0   : > { %v2065_v62 = vadd.f32 %v3924_v49, %v2064_v46 }
 0x4c2   : > { %v3937_v40 = vadd.f32 %v2065_v62, %v3707_v37 }
 0x4c4   : > { %v2183_v28 = vmul.f32 %v3937_v40, %v3937_v40  ;;  %v2121_v19 = vsel %vm790_vm3, %v3937_v40, 0.0 }
 0x4c6   : > { %v2201_v15 = vsel %vm790_vm3, %v2183_v28, 0.0 }
 0x4c7   : > { %v2067_v27 = vpop.f32.mrf.mxu1  ;;  %2122 = vadd.xlane.f32.xlu2 %v2121_v19  ;;  %2202 = vadd.xlane.f32.xlu0 %v2201_v15 }
 0x4c8   : > { %v2068_v57 = vadd.f32 %v3924_v49, %v2067_v27 }
 0x4ca   : > { %v3946_v60 = vadd.f32 %v2068_v57, %v3735_v54 }
 0x4cc   : > { %v2184_v37 = vmul.f32 %v3946_v60, %v3946_v60  ;;  %v2124_v38 = vsel %vm790_vm3, %v3946_v60, 0.0 }
 0x4ce   : > { %v2204_v58 = vsel %vm790_vm3, %v2184_v37, 0.0 }
 0x4cf   : > { %v2069_v26 = vpop.f32.mrf.mxu1  ;;  %2205 = vadd.xlane.f32.xlu1 %v2204_v58  ;;  %2125 = vadd.xlane.f32.xlu0 %v2124_v38 }
 0x4d0   : > { %v2070_v29 = vadd.f32 %v3924_v49, %v2069_v26 }
 0x4d2   : > { %v3955_v16 = vadd.f32 %v2070_v29, %v3738_v22 }
 0x4d4   : > { %v2185_v54 = vmul.f32 %v3955_v16, %v3955_v16  ;;  %v2127_v11 = vsel %vm790_vm3, %v3955_v16, 0.0 }
 0x4d6   : > { %v2207_v8 = vsel %vm790_vm3, %v2185_v54, 0.0 }
 0x4d7   : > { %v2072_v39 = vpop.f32.mrf.mxu1  ;;  %2128 = vadd.xlane.f32.xlu1 %v2127_v11  ;;  %2208 = vadd.xlane.f32.xlu2 %v2207_v8 }
 0x4d8   : > { %v2073_v53 = vadd.f32 %v3924_v49, %v2072_v39 }
 0x4da   : > { %v3964_v61 = vadd.f32 %v2073_v53, %v3767_v9 }
 0x4dc   : > { %v2186_v22 = vmul.f32 %v3964_v61, %v3964_v61  ;;  %v2130_v14 = vsel %vm790_vm3, %v3964_v61, 0.0 }
 0x4de   : > { %v2210_v17 = vsel %vm790_vm3, %v2186_v22, 0.0 }
 0x4df   : > { %v2074_v25 = vpop.f32.mrf.mxu1  ;;  %2131 = vadd.xlane.f32.xlu2 %v2130_v14  ;;  %2211 = vadd.xlane.f32.xlu0 %v2210_v17 }
 0x4e0   : > { %v2075_v63 = vadd.f32 %v3924_v49, %v2074_v25 }
 0x4e2   : > { %v3973_v33 = vadd.f32 %v2075_v63, %v3770_v0 }
 0x4e4   : > { %v2187_v9 = vmul.f32 %v3973_v33, %v3973_v33  ;;  %v2133_v3 = vsel %vm790_vm3, %v3973_v33, 0.0 }
 0x4e6   : > { %v2213_v12 = vsel %vm790_vm3, %v2187_v9, 0.0 }
 0x4e7   : > { %v2077_v32 = vpop.f32.mrf.mxu1  ;;  %2214 = vadd.xlane.f32.xlu1 %v2213_v12  ;;  %2134 = vadd.xlane.f32.xlu0 %v2133_v3 }
 0x4e8   : > { %v2078_v1 = vadd.f32 %v3924_v49, %v2077_v32 }
 0x4ea   : > { %v3982_v30 = vadd.f32 %v2078_v1, %v3802_v20 }
 0x4ec   : > { %v2188_v0 = vmul.f32 %v3982_v30, %v3982_v30  ;;  %v2136_v2 = vsel %vm790_vm3, %v3982_v30, 0.0 }
 0x4ee   : > { %v2216_v44 = vsel %vm790_vm3, %v2188_v0, 0.0 }
 0x4ef   : > { %v2079_v10 = vpop.f32.mrf.mxu1  ;;  %2137 = vadd.xlane.f32.xlu1 %v2136_v2  ;;  %2217 = vadd.xlane.f32.xlu2 %v2216_v44 }
 0x4f0   : > { %v2080_v5 = vadd.f32 %v3924_v49, %v2079_v10 }
 0x4f2   : > { %v3991_v18 = vadd.f32 %v2080_v5, %v3805_v56 }
 0x4f4   : > { %v2189_v20 = vmul.f32 %v3991_v18, %v3991_v18  ;;  %v2139_v23 = vsel %vm790_vm3, %v3991_v18, 0.0 }
 0x4f6   : > { %v2219_v55 = vsel %vm790_vm3, %v2189_v20, 0.0 }
 0x4f7   : > { %v2082_v45 = vpop.f32.mrf.mxu1  ;;  %2140 = vadd.xlane.f32.xlu2 %v2139_v23  ;;  %2220 = vadd.xlane.f32.xlu0 %v2219_v55 }
 0x4f8   : > { %v2083_v42 = vadd.f32 %v3924_v49, %v2082_v45 }
 0x4fa   : > { %v4000_v41 = vadd.f32 %v2083_v42, %v3834_v43 }
 0x4fc   : > { %v2190_v56 = vmul.f32 %v4000_v41, %v4000_v41  ;;  %v2142_v6 = vsel %vm790_vm3, %v4000_v41, 0.0 }
 0x4fe   : > { %v2222_v48 = vsel %vm790_vm3, %v2190_v56, 0.0 }
 0x4ff   : > { %v2084_v34 = vpop.f32.mrf.mxu1  ;;  %2223 = vadd.xlane.f32.xlu1 %v2222_v48  ;;  %2143 = vadd.xlane.f32.xlu0 %v2142_v6 }
 0x500   : > { %v2085_v47 = vadd.f32 %v3924_v49, %v2084_v34 }
 0x502   : > { %v4009_v4 = vadd.f32 %v2085_v47, %v3837_v51 }
 0x504   : > { %v2191_v43 = vmul.f32 %v4009_v4, %v4009_v4  ;;  %v2145_v21 = vsel %vm790_vm3, %v4009_v4, 0.0 }
 0x506   : > { %v2225_v13 = vsel %vm790_vm3, %v2191_v43, 0.0 }
 0x507   : > { %2146 = vadd.xlane.f32.xlu1 %v2145_v21  ;;  %2226 = vadd.xlane.f32.xlu2 %v2225_v13  ;;  %v2087_v46 = vpop.f32.mrf.mxu1 }
 0x508   : > { %v2088_v62 = vadd.f32 %v3924_v49, %v2087_v46 }
 0x50a   : > { %v4018_v28 = vadd.f32 %v2088_v62, %v3874_v59 }
 0x50c   : > { %v2192_v51 = vmul.f32 %v4018_v28, %v4018_v28  ;;  %v2148_v19 = vsel %vm790_vm3, %v4018_v28, 0.0 }
 0x50e   : > { %v2228_v15 = vsel %vm790_vm3, %v2192_v51, 0.0 }
 0x50f   : > { %2149 = vadd.xlane.f32.xlu2 %v2148_v19  ;;  %v2089_v27 = vpop.f32.mrf.mxu1  ;;  %2229 = vadd.xlane.f32.xlu0 %v2228_v15 }
 0x510   : > { %v2090_v57 = vadd.f32 %v3924_v49, %v2089_v27 }
 0x512   : > { %v4027_v37 = vadd.f32 %v2090_v57, %v3871_v24 }
 0x514   : > { %v2193_v59 = vmul.f32 %v4027_v37, %v4027_v37  ;;  %v2151_v38 = vsel %vm790_vm3, %v4027_v37, 0.0 }
 0x516   : > { %v2231_v58 = vsel %vm790_vm3, %v2193_v59, 0.0 }
 0x517   : > { %v2092_v26 = vpop.f32.mrf.mxu1  ;;  %2232 = vadd.xlane.f32.xlu1 %v2231_v58  ;;  %2152 = vadd.xlane.f32.xlu0 %v2151_v38 }
 0x518   : > { %v2093_v29 = vadd.f32 %v3924_v49, %v2092_v26 }
 0x51a   : > { %v4036_v54 = vadd.f32 %v2093_v29, %v3888_v36 }
 0x51c   : > { %v2194_v24 = vmul.f32 %v4036_v54, %v4036_v54  ;;  %v2154_v11 = vsel %vm790_vm3, %v4036_v54, 0.0 }
 0x51e   : > { %v2234_v8 = vsel %vm790_vm3, %v2194_v24, 0.0 }
 0x51f   : > { %v2094_v39 = vpop.f32.mrf.mxu1  ;;  %2155 = vadd.xlane.f32.xlu1 %v2154_v11  ;;  %2235 = vadd.xlane.f32.xlu2 %v2234_v8 }
 0x520   : > { %v2095_v53 = vadd.f32 %v3924_v49, %v2094_v39 }
 0x522   : > { %v4045_v22 = vadd.f32 %v2095_v53, %v3891_v31  ;;  %v4088_v53 = vld [vmem:[%s4285_s13 + $0x1] ss:$0 sm:$0xff] }
 0x524   : > { %v2157_v36 = vsel %vm790_vm3, %v4045_v22, 0.0  ;;  %v2195_v32 = vmul.f32 %v4045_v22, %v4045_v22 }
 0x526   : > { %v2237_v5 = vsel %vm790_vm3, %v2195_v32, 0.0 }
 0x527   : > { %2158 = vadd.xlane.f32.xlu2 %v2157_v36  ;;  %v2097_v14 = vpop.f32.mrf.mxu1 }
 0x528   : > { %v2098_v17 = vadd.f32 %v3924_v49, %v2097_v14 }
 0x52a   : > { %v4051_v25 = vadd.f32 %v2098_v17, %v3902_v50 }
 0x52c   : > { %v2160_v63 = vsel %vm790_vm3, %v4051_v25, 0.0  ;;  %v2196_v55 = vmul.f32 %v4051_v25, %v4051_v25 }
 0x52d   : > { %2161 = vadd.xlane.f32.xlu0 %v2160_v63 }
 0x52e   : > { %v2240_v34 = vsel %vm790_vm3, %v2196_v55, 0.0 }
 0x52f   : > { %v2099_v9 = vpop.f32.mrf.mxu1 }
 0x530   : > { %v2120_v12 = vpop.xlane.xlu1 %2119  ;;  %v2100_v3 = vadd.f32 %v3924_v49, %v2099_v9  ;;  %v4096_v9 = vld [vmem:[%s4285_s13 + $0x2] ss:$0 sm:$0xff] }
 0x531   : > { %v2166_v31 = vmul.f32 %v2120_v12, %v3240_v52 }
 0x532   : > { %v2200_v1 = vpop.xlane.xlu2 %2199  ;;  %v4060_v0 = vadd.f32 %v2100_v3, %v3905_v35 }
 0x533   : > { %v2262_v2 = vmul.f32 %v2166_v31, %v2166_v31  ;;  %v2246_v50 = vmul.f32 %v2200_v1, %v3240_v52  ;;  %v2310_v39 = vsub.f32 %v3928_v7, %v2166_v31 }
 0x534   : > { %v2163_v10 = vsel %vm790_vm3, %v4060_v0, 0.0  ;;  %v2197_v49 = vmul.f32 %v4060_v0, %v4060_v0 }
 0x535   : > { %v2278_v44 = vsub.f32 %v2246_v50, %v2262_v2  ;;  %2164 = vadd.xlane.f32.xlu1 %v2163_v10  ;;  %2238 = vadd.xlane.f32.xlu0 %v2237_v5 }
 0x536   : > { %v2243_v23 = vsel %vm790_vm3, %v2197_v49, 0.0 }
 0x537   : > { %v2294_v20 = vmax.f32 %v2278_v44, 0.0  ;;  %2244 = vadd.xlane.f32.xlu2 %v2243_v23 }
 0x539   : > { %v2326_v35 = vadd.f32 1e-05, %v2294_v20 }
 0x53a   : > { %v2123_v45 = vpop.xlane.xlu2 %2122  ;;  %v2203_v42 = vpop.xlane.xlu0 %2202 }
 0x53b   : > { %2834 = vrsqrt.f32 %v2326_v35  ;;  %v4072_v56 = vmul.f32 %v2123_v45, %v3240_v52  ;;  %v2247_v6 = vmul.f32 %v2203_v42, %v3240_v52  ;;  %vm2348_vm1 = vweird.f32 %v2326_v35 }
 0x53d   : > { %v2263_v48 = vmul.f32 %v4072_v56, %v4072_v56  ;;  %2241 = vadd.xlane.f32.xlu1 %v2240_v34  ;;  %v2311_v42 = vsub.f32 %v3937_v40, %v4072_v56 }
 0x53f   : > { %v2279_v47 = vsub.f32 %v2247_v6, %v2263_v48 }
 0x541   : > { %v2835_v43 = vpop.eup %2834  ;;  %v2295_v21 = vmax.f32 %v2279_v47, 0.0 }
 0x542   : > { %v2343_v13 = vmul.f32 %v2835_v43, %v2326_v35  ;;  %v2206_v46 = vpop.xlane.xlu1 %2205  ;;  %v2126_v62 = vpop.xlane.xlu0 %2125  ;;  %vm2349_vm2 = vweird.f32 %v2835_v43 }
 0x543   : > { %v2327_v51 = vadd.f32 1e-05, %v2295_v21  ;;  %v4079_v19 = vmul.f32 %v2126_v62, %v3240_v52  ;;  %v2248_v27 = vmul.f32 %v2206_v46, %v3240_v52  ;;  %vm2350_vm4 = vmor %vm2348_vm1, %vm2349_vm2 }
 0x544   : > { %v2344_v15 = vmul.f32 %v2835_v43, %v2343_v13 }
 0x545   : > { %2836 = vrsqrt.f32 %v2327_v51  ;;  %v2264_v57 = vmul.f32 %v4079_v19, %v4079_v19  ;;  %vm2358_vm6 = vweird.f32 %v2327_v51 }
 0x546   : > { %v2345_v59 = vmul.f32 0.5, %v2344_v15 }
 0x547   : > { %v2280_v58 = vsub.f32 %v2248_v27, %v2264_v57 }
 0x548   : > { %v2346_v38 = vsub.f32 1.5, %v2345_v59 }
 0x549   : > { %v2296_v26 = vmax.f32 %v2280_v58, 0.0 }
 0x54a   : > { %v2347_v29 = vmul.f32 %v2835_v43, %v2346_v38  ;;  %v2129_v24 = vpop.xlane.xlu1 %2128  ;;  %v2209_v11 = vpop.xlane.xlu2 %2208 }
 0x54b   : > { %v2837_v8 = vpop.eup %2836  ;;  %v2328_v36 = vadd.f32 1e-05, %v2296_v26  ;;  %v4091_v14 = vmul.f32 %v2129_v24, %v3240_v52  ;;  %v2249_v3 = vmul.f32 %v2209_v11, %v3240_v52  ;;  %v2312_v26 = vsub.f32 %v3946_v60, %v4079_v19 }
 0x54c   : > { %v2351_v17 = vsel %vm2350_vm4, %v2835_v43, %v2347_v29  ;;  %v2353_v63 = vmul.f32 %v2837_v8, %v2327_v51  ;;  %vm2359_vm5 = vweird.f32 %v2837_v8 }
 0x54d   : > { %v2502_v12 = vmul.f32 %v2351_v17, %v2310_v39  ;;  %2838 = vrsqrt.f32 %v2328_v36  ;;  %v2265_v7 = vmul.f32 %v4091_v14, %v4091_v14  ;;  %vm2360_vm7 = vmor %vm2358_vm6, %vm2359_vm5  ;;  %vm2368_vm9 = vweird.f32 %v2328_v36 }
 0x54e   : > { %v2354_v31 = vmul.f32 %v2837_v8, %v2353_v63 }
 0x54f   : > { %v2519_v32 = vmul.f32 %v4088_v53, %v2502_v12  ;;  %v2281_v1 = vsub.f32 %v2249_v3, %v2265_v7 }
 0x550   : > { %v2355_v2 = vmul.f32 0.5, %v2354_v31 }
 0x551   : > { %v2536_v50 = vadd.f32 %v4096_v9, %v2519_v32  ;;  %v2297_v44 = vmax.f32 %v2281_v1, 0.0 }
 0x552   : > { %v2356_v10 = vsub.f32 1.5, %v2355_v2  ;;  %v2132_v5 = vpop.xlane.xlu2 %2131  ;;  %v2212_v49 = vpop.xlane.xlu0 %2211 }
 0x553   : > { %v2839_v20 = vpop.eup %2838  ;;  %2552 = vst.msk [vmem:[%s4107_s19] sm:$0xff] %vm790_vm3, %v2536_v50  ;;  %v2329_v23 = vadd.f32 1e-05, %v2297_v44  ;;  %v4113_v35 = vmul.f32 %v2132_v5, %v3240_v52  ;;  %v2250_v6 = vmul.f32 %v2212_v49, %v3240_v52  ;;  %v2313_v44 = vsub.f32 %v3955_v16, %v4091_v14 }
 0x554   : > { %v2357_v55 = vmul.f32 %v2837_v8, %v2356_v10  ;;  %v2363_v45 = vmul.f32 %v2839_v20, %v2328_v36  ;;  %vm2369_vm8 = vweird.f32 %v2839_v20 }
 0x555   : > { %2840 = vrsqrt.f32 %v2329_v23  ;;  %v2266_v48 = vmul.f32 %v4113_v35, %v4113_v35  ;;  %vm2370_vm10 = vmor %vm2368_vm9, %vm2369_vm8  ;;  %vm2378_vm12 = vweird.f32 %v2329_v23 }
 0x556   : > { %v2361_v34 = vsel %vm2360_vm7, %v2837_v8, %v2357_v55  ;;  %v2364_v47 = vmul.f32 %v2839_v20, %v2363_v45 }
 0x557   : > { %v2503_v43 = vmul.f32 %v2361_v34, %v2311_v42  ;;  %v2282_v21 = vsub.f32 %v2250_v6, %v2266_v48 }
 0x558   : > { %v2365_v13 = vmul.f32 0.5, %v2364_v47 }
 0x559   : > { %v2520_v46 = vmul.f32 %v4088_v53, %v2503_v43  ;;  %v2298_v62 = vmax.f32 %v2282_v21, 0.0 }
 0x55a   : > { %v2366_v51 = vsub.f32 1.5, %v2365_v13  ;;  %v2215_v15 = vpop.xlane.xlu1 %2214  ;;  %v2135_v40 = vpop.xlane.xlu0 %2134 }
 0x55b   : > { %v2841_v56 = vpop.eup %2840  ;;  %v2537_v27 = vadd.f32 %v4096_v9, %v2520_v46  ;;  %v2330_v57 = vadd.f32 1e-05, %v2298_v62  ;;  %v4123_v59 = vmul.f32 %v2135_v40, %v3240_v52  ;;  %v2251_v29 = vmul.f32 %v2215_v15, %v3240_v52 }
 0x55c   : > { %v2367_v58 = vmul.f32 %v2839_v20, %v2366_v51  ;;  %v2373_v38 = vmul.f32 %v2841_v56, %v2329_v23  ;;  %vm2379_vm11 = vweird.f32 %v2841_v56  ;;  %v2314_v62 = vsub.f32 %v3964_v61, %v4113_v35 }
 0x55d   : > { %2553 = vst.msk [vmem:[%s4107_s19 + $0x8] sm:$0xff] %vm790_vm3, %v2537_v27  ;;  %2842 = vrsqrt.f32 %v2330_v57  ;;  %v2267_v24 = vmul.f32 %v4123_v59, %v4123_v59  ;;  %vm2380_vm13 = vmor %vm2378_vm12, %vm2379_vm11  ;;  %vm2388_vm15 = vweird.f32 %v2330_v57 }
 0x55e   : > { %v2371_v11 = vsel %vm2370_vm10, %v2839_v20, %v2367_v58  ;;  %v2374_v8 = vmul.f32 %v2841_v56, %v2373_v38 }
 0x55f   : > { %v2504_v39 = vmul.f32 %v2371_v11, %v2312_v26  ;;  %v2283_v17 = vsub.f32 %v2251_v29, %v2267_v24 }
 0x560   : > { %v2375_v63 = vmul.f32 0.5, %v2374_v8 }
 0x561   : > { %v2521_v36 = vmul.f32 %v4088_v53, %v2504_v39  ;;  %v2299_v12 = vmax.f32 %v2283_v17, 0.0 }
 0x562   : > { %v2376_v7 = vsub.f32 1.5, %v2375_v63  ;;  %v2138_v3 = vpop.xlane.xlu1 %2137  ;;  %v2218_v60 = vpop.xlane.xlu2 %2217 }
 0x563   : > { %v2843_v19 = vpop.eup %2842  ;;  %v2538_v31 = vadd.f32 %v4096_v9, %v2521_v36  ;;  %v2331_v32 = vadd.f32 1e-05, %v2299_v12  ;;  %v4135_v1 = vmul.f32 %v2138_v3, %v3240_v52  ;;  %v2252_v5 = vmul.f32 %v2218_v60, %v3240_v52 }
 0x564   : > { %v2377_v2 = vmul.f32 %v2841_v56, %v2376_v7  ;;  %v2383_v50 = vmul.f32 %v2843_v19, %v2330_v57  ;;  %vm2389_vm14 = vweird.f32 %v2843_v19  ;;  %v2315_v36 = vsub.f32 %v3973_v33, %v4123_v59 }
 0x565   : > { %2554 = vst.msk [vmem:[%s4107_s19 + $0x10] sm:$0xff] %vm790_vm3, %v2538_v31  ;;  %2844 = vrsqrt.f32 %v2331_v32  ;;  %v2268_v10 = vmul.f32 %v4135_v1, %v4135_v1  ;;  %vm2390_vm0 = vmor %vm2388_vm15, %vm2389_vm14  ;;  %vm2398_vm1 = vweird.f32 %v2331_v32 }
 0x566   : > { %v2381_v49 = vsel %vm2380_vm13, %v2841_v56, %v2377_v2  ;;  %v2384_v20 = vmul.f32 %v2843_v19, %v2383_v50 }
 0x567   : > { %v2505_v55 = vmul.f32 %v2381_v49, %v2313_v44  ;;  %v2284_v45 = vsub.f32 %v2252_v5, %v2268_v10 }
 0x568   : > { %v2385_v42 = vmul.f32 0.5, %v2384_v20 }
 0x569   : > { %v2522_v23 = vmul.f32 %v4088_v53, %v2505_v55  ;;  %v2300_v48 = vmax.f32 %v2284_v45, 0.0 }
 0x56a   : > { %v2386_v6 = vsub.f32 1.5, %v2385_v42  ;;  %v2141_v34 = vpop.xlane.xlu2 %2140  ;;  %v2221_v16 = vpop.xlane.xlu0 %2220  ;;  %v2316_v42 = vsub.f32 %v3982_v30, %v4135_v1 }
 0x56b   : > { %v2845_v14 = vpop.eup %2844  ;;  %v2539_v47 = vadd.f32 %v4096_v9, %v2522_v23  ;;  %v2332_v43 = vadd.f32 1e-05, %v2300_v48  ;;  %v4147_v21 = vmul.f32 %v2141_v34, %v3240_v52  ;;  %v2253_v15 = vmul.f32 %v2221_v16, %v3240_v52 }
 0x56c   : > { %v2387_v13 = vmul.f32 %v2843_v19, %v2386_v6  ;;  %v2393_v46 = vmul.f32 %v2845_v14, %v2331_v32  ;;  %vm2399_vm2 = vweird.f32 %v2845_v14 }
 0x56d   : > { %2555 = vst.msk [vmem:[%s4107_s19 + $0x18] sm:$0xff] %vm790_vm3, %v2539_v47  ;;  %2846 = vrsqrt.f32 %v2332_v43  ;;  %v2269_v51 = vmul.f32 %v4147_v21, %v4147_v21  ;;  %vm2400_vm4 = vmor %vm2398_vm1, %vm2399_vm2  ;;  %vm2408_vm6 = vweird.f32 %v2332_v43 }
 0x56e   : > { %v2391_v40 = vsel %vm2390_vm0, %v2843_v19, %v2387_v13  ;;  %v2394_v56 = vmul.f32 %v2845_v14, %v2393_v46 }
 0x56f   : > { %v2506_v27 = vmul.f32 %v2391_v40, %v2314_v62  ;;  %v2285_v58 = vsub.f32 %v2253_v15, %v2269_v51 }
 0x570   : > { %v2395_v38 = vmul.f32 0.5, %v2394_v56 }
 0x571   : > { %v2523_v57 = vmul.f32 %v4088_v53, %v2506_v27  ;;  %v2301_v26 = vmax.f32 %v2285_v58, 0.0  ;;  %v2317_v58 = vsub.f32 %v3991_v18, %v4147_v21 }
 0x572   : > { %v2396_v29 = vsub.f32 1.5, %v2395_v38  ;;  %v2224_v24 = vpop.xlane.xlu1 %2223  ;;  %v2144_v61 = vpop.xlane.xlu0 %2143 }
 0x573   : > { %v2847_v35 = vpop.eup %2846  ;;  %v2540_v11 = vadd.f32 %v4096_v9, %v2523_v57  ;;  %v2333_v8 = vadd.f32 1e-05, %v2301_v26  ;;  %v4159_v39 = vmul.f32 %v2144_v61, %v3240_v52  ;;  %v2254_v12 = vmul.f32 %v2224_v24, %v3240_v52 }
 0x574   : > { %v2397_v17 = vmul.f32 %v2845_v14, %v2396_v29  ;;  %v2403_v63 = vmul.f32 %v2847_v35, %v2332_v43  ;;  %vm2409_vm5 = vweird.f32 %v2847_v35 }
 0x575   : > { %2556 = vst.msk [vmem:[%s4107_s19 + $0x20] sm:$0xff] %vm790_vm3, %v2540_v11  ;;  %2848 = vrsqrt.f32 %v2333_v8  ;;  %v2270_v7 = vmul.f32 %v4159_v39, %v4159_v39  ;;  %vm2410_vm7 = vmor %vm2408_vm6, %vm2409_vm5  ;;  %vm2418_vm9 = vweird.f32 %v2333_v8 }
 0x576   : > { %v2401_v3 = vsel %vm2400_vm4, %v2845_v14, %v2397_v17  ;;  %v2404_v60 = vmul.f32 %v2847_v35, %v2403_v63 }
 0x577   : > { %v2507_v19 = vmul.f32 %v2401_v3, %v2315_v36  ;;  %v2286_v31 = vsub.f32 %v2254_v12, %v2270_v7 }
 0x578   : > { %v2405_v2 = vmul.f32 0.5, %v2404_v60  ;;  %v2318_v60 = vsub.f32 %v4000_v41, %v4159_v39 }
 0x579   : > { %v2524_v32 = vmul.f32 %v4088_v53, %v2507_v19  ;;  %v2302_v50 = vmax.f32 %v2286_v31, 0.0 }
 0x57a   : > { %v2406_v44 = vsub.f32 1.5, %v2405_v2  ;;  %v2147_v10 = vpop.xlane.xlu1 %2146  ;;  %v2227_v33 = vpop.xlane.xlu2 %2226 }
 0x57b   : > { %v2849_v59 = vpop.eup %2848  ;;  %v2541_v5 = vadd.f32 %v4096_v9, %v2524_v32  ;;  %v2334_v49 = vadd.f32 1e-05, %v2302_v50  ;;  %v4171_v20 = vmul.f32 %v2147_v10, %v3240_v52  ;;  %v2255_v48 = vmul.f32 %v2227_v33, %v3240_v52 }
 0x57c   : > { %v2407_v55 = vmul.f32 %v2847_v35, %v2406_v44  ;;  %v2413_v45 = vmul.f32 %v2849_v59, %v2333_v8  ;;  %vm2419_vm8 = vweird.f32 %v2849_v59 }
 0x57d   : > { %2557 = vst.msk [vmem:[%s4107_s19 + $0x28] sm:$0xff] %vm790_vm3, %v2541_v5  ;;  %2850 = vrsqrt.f32 %v2334_v49  ;;  %v2271_v23 = vmul.f32 %v4171_v20, %v4171_v20  ;;  %vm2420_vm10 = vmor %vm2418_vm9, %vm2419_vm8  ;;  %vm2428_vm12 = vweird.f32 %v2334_v49 }
 0x57e   : > { %v2411_v6 = vsel %vm2410_vm7, %v2847_v35, %v2407_v55  ;;  %v2414_v34 = vmul.f32 %v2849_v59, %v2413_v45 }
 0x57f   : > { %v2508_v16 = vmul.f32 %v2411_v6, %v2316_v42  ;;  %v2287_v14 = vsub.f32 %v2255_v48, %v2271_v23  ;;  %v2319_v6 = vsub.f32 %v4009_v4, %v4171_v20 }
 0x580   : > { %v2415_v47 = vmul.f32 0.5, %v2414_v34 }
 0x581   : > { %v2525_v43 = vmul.f32 %v4088_v53, %v2508_v16  ;;  %v2303_v13 = vmax.f32 %v2287_v14, 0.0 }
 0x582   : > { %v2416_v46 = vsub.f32 1.5, %v2415_v47  ;;  %v2150_v62 = vpop.xlane.xlu2 %2149  ;;  %v2230_v40 = vpop.xlane.xlu0 %2229 }
 0x583   : > { %v2851_v30 = vpop.eup %2850  ;;  %v2542_v1 = vadd.f32 %v4096_v9, %v2525_v43  ;;  %v2335_v51 = vadd.f32 1e-05, %v2303_v13  ;;  %v4183_v15 = vmul.f32 %v2150_v62, %v3240_v52  ;;  %v2256_v57 = vmul.f32 %v2230_v40, %v3240_v52 }
 0x584   : > { %v2417_v56 = vmul.f32 %v2849_v59, %v2416_v46  ;;  %v2423_v27 = vmul.f32 %v2851_v30, %v2334_v49  ;;  %vm2429_vm11 = vweird.f32 %v2851_v30 }
 0x585   : > { %2558 = vst.msk [vmem:[%s4107_s19 + $0x30] sm:$0xff] %vm790_vm3, %v2542_v1  ;;  %2852 = vrsqrt.f32 %v2335_v51  ;;  %v2272_v38 = vmul.f32 %v4183_v15, %v4183_v15  ;;  %vm2430_vm13 = vmor %vm2428_vm12, %vm2429_vm11  ;;  %vm2438_vm15 = vweird.f32 %v2335_v51 }
 0x586   : > { %v2421_v26 = vsel %vm2420_vm10, %v2849_v59, %v2417_v56  ;;  %v2424_v29 = vmul.f32 %v2851_v30, %v2423_v27  ;;  %v2320_v27 = vsub.f32 %v4018_v28, %v4183_v15 }
 0x587   : > { %v2509_v24 = vmul.f32 %v2421_v26, %v2317_v58  ;;  %v2288_v61 = vsub.f32 %v2256_v57, %v2272_v38 }
 0x588   : > { %v2425_v35 = vmul.f32 0.5, %v2424_v29 }
 0x589   : > { %v2526_v11 = vmul.f32 %v4088_v53, %v2509_v24  ;;  %v2304_v8 = vmax.f32 %v2288_v61, 0.0 }
 0x58a   : > { %v2426_v17 = vsub.f32 1.5, %v2425_v35  ;;  %v2233_v36 = vpop.xlane.xlu1 %2232  ;;  %v2153_v12 = vpop.xlane.xlu0 %2152 }
 0x58b   : > { %v2853_v63 = vpop.eup %2852  ;;  %v2543_v18 = vadd.f32 %v4096_v9, %v2526_v11  ;;  %v2336_v21 = vadd.f32 1e-05, %v2304_v8  ;;  %v4199_v19 = vmul.f32 %v2153_v12, %v3240_v52  ;;  %v2257_v50 = vmul.f32 %v2233_v36, %v3240_v52 }
 0x58c   : > { %v2427_v7 = vmul.f32 %v2851_v30, %v2426_v17  ;;  %v2433_v3 = vmul.f32 %v2853_v63, %v2335_v51  ;;  %vm2439_vm14 = vweird.f32 %v2853_v63 }
 0x58d   : > { %2559 = vst.msk [vmem:[%s4107_s19 + $0x38] sm:$0xff] %vm790_vm3, %v2543_v18  ;;  %2854 = vrsqrt.f32 %v2336_v21  ;;  %v2273_v44 = vmul.f32 %v4199_v19, %v4199_v19  ;;  %vm2440_vm0 = vmor %vm2438_vm15, %vm2439_vm14  ;;  %vm2448_vm1 = vweird.f32 %v2336_v21  ;;  %v2321_v18 = vsub.f32 %v4027_v37, %v4199_v19 }
 0x58e   : > { %v2431_v31 = vsel %vm2430_vm13, %v2851_v30, %v2427_v7  ;;  %v2434_v2 = vmul.f32 %v2853_v63, %v2433_v3 }
 0x58f   : > { %v2510_v32 = vmul.f32 %v2431_v31, %v2318_v60  ;;  %v2289_v59 = vsub.f32 %v2257_v50, %v2273_v44 }
 0x590   : > { %v2435_v10 = vmul.f32 0.5, %v2434_v2 }
 0x591   : > { %v2527_v33 = vmul.f32 %v4088_v53, %v2510_v32  ;;  %v2305_v49 = vmax.f32 %v2289_v59, 0.0 }
 0x592   : > { %v2436_v5 = vsub.f32 1.5, %v2435_v10  ;;  %v2156_v55 = vpop.xlane.xlu1 %2155  ;;  %v2236_v45 = vpop.xlane.xlu2 %2235 }
 0x593   : > { %v2855_v41 = vpop.eup %2854  ;;  %v2544_v39 = vadd.f32 %v4096_v9, %v2527_v33  ;;  %v4207_v48 = vmul.f32 %v2156_v55, %v3240_v52  ;;  %v2337_v34 = vadd.f32 1e-05, %v2305_v49  ;;  %v2258_v43 = vmul.f32 %v2236_v45, %v3240_v52 }
 0x594   : > { %v2437_v42 = vmul.f32 %v2853_v63, %v2436_v5  ;;  %v2443_v23 = vmul.f32 %v2855_v41, %v2336_v21  ;;  %vm2449_vm2 = vweird.f32 %v2855_v41 }
 0x595   : > { %2560 = vst.msk [vmem:[%s4107_s19 + $0x40] sm:$0xff] %vm790_vm3, %v2544_v39  ;;  %v2274_v47 = vmul.f32 %v4207_v48, %v4207_v48  ;;  %2856 = vrsqrt.f32 %v2337_v34  ;;  %vm2450_vm4 = vmor %vm2448_vm1, %vm2449_vm2  ;;  %vm2458_vm6 = vweird.f32 %v2337_v34 }
 0x596   : > { %v2441_v16 = vsel %vm2440_vm0, %v2853_v63, %v2437_v42  ;;  %v2444_v14 = vmul.f32 %v2855_v41, %v2443_v23 }
 0x597   : > { %v2511_v13 = vmul.f32 %v2441_v16, %v2319_v6  ;;  %v2290_v62 = vsub.f32 %v2258_v43, %v2274_v47 }
 0x598   : > { %v2445_v46 = vmul.f32 0.5, %v2444_v14 }
 0x599   : > { %v2528_v30 = vmul.f32 %v4088_v53, %v2511_v13  ;;  %v2306_v51 = vmax.f32 %v2290_v62, 0.0 }
 0x59a   : > { %v2446_v1 = vsub.f32 1.5, %v2445_v46  ;;  %v2159_v11 = vpop.xlane.xlu2 %2158 }
 0x59b   : > { %v2545_v4 = vadd.f32 %v4096_v9, %v2528_v30  ;;  %v2338_v40 = vadd.f32 1e-05, %v2306_v51  ;;  %v2857_v56 = vpop.eup %2856  ;;  %v4227_v15 = vmul.f32 %v2159_v11, %v3240_v52 }
 0x59c   : > { %v2447_v20 = vmul.f32 %v2855_v41, %v2446_v1  ;;  %v2453_v38 = vmul.f32 %v2857_v56, %v2337_v34  ;;  %vm2459_vm5 = vweird.f32 %v2857_v56 }
 0x59d   : > { %2561 = vst.msk [vmem:[%s4107_s19 + $0x48] sm:$0xff] %vm790_vm3, %v2545_v4  ;;  %2858 = vrsqrt.f32 %v2338_v40  ;;  %vm2460_vm7 = vmor %vm2458_vm6, %vm2459_vm5  ;;  %v2275_v31 = vmul.f32 %v4227_v15, %v4227_v15  ;;  %vm2468_vm9 = vweird.f32 %v2338_v40 }
 0x59e   : > { %v2451_v58 = vsel %vm2450_vm4, %v2855_v41, %v2447_v20  ;;  %v2454_v26 = vmul.f32 %v2857_v56, %v2453_v38  ;;  %v2322_v41 = vsub.f32 %v4036_v54, %v4207_v48 }
 0x59f   : > { %v2512_v57 = vmul.f32 %v2451_v58, %v2320_v27 }
 0x5a0   : > { %v2162_v24 = vpop.xlane.xlu0 %2161  ;;  %v2455_v61 = vmul.f32 0.5, %v2454_v26 }
 0x5a1   : > { %v2529_v29 = vmul.f32 %v4088_v53, %v2512_v57  ;;  %v2180_v45 = vmul.f32 %v2162_v24, %v3240_v52  ;;  %v2323_v57 = vsub.f32 %v4045_v22, %v4227_v15 }
 0x5a2   : > { %v2456_v17 = vsub.f32 1.5, %v2455_v61 }
 0x5a3   : > { %v2546_v35 = vadd.f32 %v4096_v9, %v2529_v29  ;;  %v2859_v8 = vpop.eup %2858  ;;  %v2276_v47 = vmul.f32 %v2180_v45, %v2180_v45 }
 0x5a4   : > { %v2463_v63 = vmul.f32 %v2859_v8, %v2338_v40  ;;  %v2457_v28 = vmul.f32 %v2857_v56, %v2456_v17  ;;  %vm2469_vm8 = vweird.f32 %v2859_v8 }
 0x5a5   : > { %2562 = vst.msk [vmem:[%s4107_s19 + $0x50] sm:$0xff] %vm790_vm3, %v2546_v35  ;;  %vm2470_vm10 = vmor %vm2468_vm9, %vm2469_vm8 }
 0x5a6   : > { %v2464_v21 = vmul.f32 %v2859_v8, %v2463_v63  ;;  %v2461_v36 = vsel %vm2460_vm7, %v2857_v56, %v2457_v28 }
 0x5a7   : > { %v2513_v12 = vmul.f32 %v2461_v36, %v2321_v18  ;;  %v2324_v36 = vsub.f32 %v4051_v25, %v2180_v45 }
 0x5a8   : > { %v2465_v7 = vmul.f32 0.5, %v2464_v21  ;;  %v2165_v3 = vpop.xlane.xlu1 %2164  ;;  %v2239_v60 = vpop.xlane.xlu0 %2238 }
 0x5a9   : > { %v4234_v2 = vmul.f32 %v2165_v3, %v3240_v52  ;;  %v2259_v32 = vmul.f32 %v2239_v60, %v3240_v52  ;;  %v2530_v50 = vmul.f32 %v4088_v53, %v2513_v12 }
 0x5aa   : > { %v2466_v44 = vsub.f32 1.5, %v2465_v7  ;;  %v2245_v37 = vpop.xlane.xlu2 %2244 }
 0x5ab   : > { %v2277_v19 = vmul.f32 %v4234_v2, %v4234_v2  ;;  %v2291_v10 = vsub.f32 %v2259_v32, %v2275_v31  ;;  %v2261_v33 = vmul.f32 %v2245_v37, %v3240_v52  ;;  %v2547_v59 = vadd.f32 %v4096_v9, %v2530_v50 }
 0x5ac   : > { %v2467_v5 = vmul.f32 %v2859_v8, %v2466_v44  ;;  %v2325_v61 = vsub.f32 %v4060_v0, %v4234_v2 }
 0x5ad   : > { %v2307_v39 = vmax.f32 %v2291_v10, 0.0  ;;  %v2293_v49 = vsub.f32 %v2261_v33, %v2277_v19  ;;  %2563 = vst.msk [vmem:[%s4107_s19 + $0x58] sm:$0xff] %vm790_vm3, %v2547_v59 }
 0x5ae   : > { %v2471_v55 = vsel %vm2470_vm10, %v2859_v8, %v2467_v5 }
 0x5af   : > { %v2514_v42 = vmul.f32 %v2471_v55, %v2322_v41  ;;  %v2339_v23 = vadd.f32 1e-05, %v2307_v39  ;;  %v2309_v6 = vmax.f32 %v2293_v49, 0.0 }
 0x5b0   : > { %v2242_v34 = vpop.xlane.xlu1 %2241 }
 0x5b1   : > { %v2531_v16 = vmul.f32 %v4088_v53, %v2514_v42  ;;  %2860 = vrsqrt.f32 %v2339_v23  ;;  %v2341_v14 = vadd.f32 1e-05, %v2309_v6  ;;  %v2260_v54 = vmul.f32 %v2242_v34, %v3240_v52 }
 0x5b2   : > { %vm2478_vm12 = vweird.f32 %v2339_v23 }
 0x5b3   : > { %v2548_v48 = vadd.f32 %v4096_v9, %v2531_v16  ;;  %2862 = vrsqrt.f32 %v2341_v14  ;;  %v2292_v43 = vsub.f32 %v2260_v54, %v2276_v47  ;;  %vm2498_vm15 = vweird.f32 %v2341_v14 }
 0x5b5   : > { %2564 = vst.msk [vmem:[%s4107_s19 + $0x60] sm:$0xff] %vm790_vm3, %v2548_v48  ;;  %v2308_v13 = vmax.f32 %v2292_v43, 0.0 }
 0x5b7   : > { %v2861_v46 = vpop.eup %2860  ;;  %v2340_v30 = vadd.f32 1e-05, %v2308_v13 }
 0x5b8   : > { %v2473_v62 = vmul.f32 %v2861_v46, %v2339_v23  ;;  %vm2479_vm11 = vweird.f32 %v2861_v46 }
 0x5b9   : > { %v2863_v1 = vpop.eup %2862  ;;  %2864 = vrsqrt.f32 %v2340_v30  ;;  %vm2480_vm14 = vmor %vm2478_vm12, %vm2479_vm11  ;;  %vm2488_vm1 = vweird.f32 %v2340_v30 }
 0x5ba   : > { %v2474_v51 = vmul.f32 %v2861_v46, %v2473_v62  ;;  %v2493_v4 = vmul.f32 %v2863_v1, %v2341_v14  ;;  %vm2499_vm13 = vweird.f32 %v2863_v1 }
 0x5bb   : > { %vm2500_vm0 = vmor %vm2498_vm15, %vm2499_vm13 }
 0x5bc   : > { %v2475_v20 = vmul.f32 0.5, %v2474_v51  ;;  %v2494_v40 = vmul.f32 %v2863_v1, %v2493_v4 }
 0x5be   : > { %v2476_v56 = vsub.f32 1.5, %v2475_v20  ;;  %v2495_v27 = vmul.f32 0.5, %v2494_v40 }
 0x5bf   : > { %v2865_v52 = vpop.eup %2864 }
 0x5c0   : > { %v2477_v58 = vmul.f32 %v2861_v46, %v2476_v56  ;;  %v2496_v38 = vsub.f32 1.5, %v2495_v27  ;;  %v2483_v26 = vmul.f32 %v2865_v52, %v2340_v30  ;;  %vm2489_vm2 = vweird.f32 %v2865_v52 }
 0x5c1   : > { %vm2490_vm4 = vmor %vm2488_vm1, %vm2489_vm2 }
 0x5c2   : > { %v2481_v29 = vsel %vm2480_vm14, %v2861_v46, %v2477_v58  ;;  %v2497_v24 = vmul.f32 %v2863_v1, %v2496_v38  ;;  %v2484_v11 = vmul.f32 %v2865_v52, %v2483_v26 }
 0x5c3   : > { %v2515_v35 = vmul.f32 %v2481_v29, %v2323_v57 }
 0x5c4   : > { %v2501_v8 = vsel %vm2500_vm0, %v2863_v1, %v2497_v24  ;;  %v2485_v28 = vmul.f32 0.5, %v2484_v11 }
 0x5c5   : > { %v2532_v17 = vmul.f32 %v4088_v53, %v2515_v35  ;;  %v2517_v63 = vmul.f32 %v2501_v8, %v2325_v61 }
 0x5c6   : > { %v2486_v18 = vsub.f32 1.5, %v2485_v28 }
 0x5c7   : > { %v2549_v22 = vadd.f32 %v4096_v9, %v2532_v17  ;;  %v2534_v15 = vmul.f32 %v4088_v53, %v2517_v63 }
 0x5c8   : > { %v2487_v21 = vmul.f32 %v2865_v52, %v2486_v18 }
 0x5c9   : > { %2565 = vst.msk [vmem:[%s4107_s19 + $0x68] sm:$0xff] %vm790_vm3, %v2549_v22  ;;  %v2551_v0 = vadd.f32 %v4096_v9, %v2534_v15 }
 0x5ca   : > { %v2491_v12 = vsel %vm2490_vm4, %v2865_v52, %v2487_v21 }
 0x5cb   : > { %2567 = vst.msk [vmem:[%s4107_s19 + $0x78] sm:$0xff] %vm790_vm3, %v2551_v0  ;;  %v2516_v7 = vmul.f32 %v2491_v12, %v2324_v36 }
 0x5cd   : > { %v2533_v3 = vmul.f32 %v4088_v53, %v2516_v7 }
 0x5cf   : > { %v2550_v60 = vadd.f32 %v4096_v9, %v2533_v3 }
 0x5d1   : > { %2566 = vst.msk [vmem:[%s4107_s19 + $0x70] sm:$0xff] %vm790_vm3, %v2550_v60 }
 0x5d2 PF: > { %s24_s29 = sadd.s32 1, %s2872_s29  }
 0x5d3   : > { %p21_p4 = scmp.ge.s32.totalorder %s24_s29, 4  }
 0x5d5   :  { %23 = sbr.rel (!%p21_p4) target bundleno = 1 (0x1), region = 106 }

</bundles_post_ra>
